<compile_context>
chip_gen: v6e
topology: v6e:2x2x1
jax: 0.10.0
libtpu: 0.0.40
codegen_flags: <defaults>
</compile_context>

<pallas_src>
import jax
import jax.numpy as jnp
from jax.experimental import pallas as pl
from jax.experimental.pallas import tpu as pltpu

BN_EPS = 1e-5      # nn.BatchNorm2d default eps
LANE = 128         # TPU lane width: channels padded to a multiple of this


def _round_up(x, m):
    return (x + m - 1) // m * m


# ---------------------------------------------------------------------------
# Pass A: conv3x3 (9 accumulated bf16 MXU matmuls over a haloed NHWC window)
#         + per-image partial BatchNorm statistics (sum, sum-of-squares).
# ---------------------------------------------------------------------------
def _make_conv_stats_call(N, H, W, Cp):
    Hp2, Wp2, R = H + 2, W + 2, H * W

    def kernel(a_ref, w_ref, y_ref, s_ref):
        x = a_ref[0]                                     # (H+2, W+2, Cp) bf16
        acc = jnp.zeros((R, Cp), jnp.float32)
        for ky in range(3):                              # 9 shifted-slice matmuls
            for kx in range(3):
                xs = x[ky:ky + H, kx:kx + W, :].reshape(R, Cp)
                acc = acc + jnp.dot(xs, w_ref[ky, kx, :, :],
                                    preferred_element_type=jnp.float32)
        y_ref[...] = acc.reshape(1, H, W, Cp)
        # one-pass channel statistics (sum and sum-of-squares together), f32
        stats = jnp.concatenate(
            [jnp.sum(acc, axis=0, keepdims=True),
             jnp.sum(acc * acc, axis=0, keepdims=True)], axis=0)   # (2, Cp)
        s_ref[...] = stats[None]

    flops = 2 * N * R * (9 * Cp) * Cp
    bytes_accessed = (N * Hp2 * Wp2 * Cp * 2 + 9 * Cp * Cp * 2
                      + N * R * Cp * 4 + N * 2 * Cp * 4)
    return pl.pallas_call(
        kernel,
        out_shape=(jax.ShapeDtypeStruct((N, H, W, Cp), jnp.float32),
                   jax.ShapeDtypeStruct((N, 2, Cp), jnp.float32)),
        grid=(N,),
        in_specs=[
            pl.BlockSpec((1, Hp2, Wp2, Cp), lambda n: (n, 0, 0, 0)),
            pl.BlockSpec((3, 3, Cp, Cp), lambda n: (0, 0, 0, 0)),
        ],
        out_specs=(
            pl.BlockSpec((1, H, W, Cp), lambda n: (n, 0, 0, 0)),
            pl.BlockSpec((1, 2, Cp), lambda n: (n, 0, 0)),
        ),
        compiler_params=pltpu.CompilerParams(
            dimension_semantics=("parallel",)),
        cost_estimate=pl.CostEstimate(flops=flops, transcendentals=0,
                                      bytes_accessed=bytes_accessed),
    )


# ---------------------------------------------------------------------------
# Pass B: folded BatchNorm affine (single FMA with precomputed scale/shift)
#         + ReLU, writing the next stage's zero-padded bf16 NHWC activation.
# ---------------------------------------------------------------------------
def _make_bn_relu_pad_call(N, H, W, Cp):
    Hp2, Wp2 = H + 2, W + 2

    def kernel(y_ref, sc_ref, sh_ref, o_ref):
        z = jnp.maximum(y_ref[0] * sc_ref[...] + sh_ref[...], 0.0)
        o_ref[...] = jnp.zeros_like(o_ref)               # zero halo border
        o_ref[:, 1:H + 1, 1:W + 1, :] = z[None].astype(o_ref.dtype)

    return pl.pallas_call(
        kernel,
        out_shape=jax.ShapeDtypeStruct((N, Hp2, Wp2, Cp), jnp.bfloat16),
        grid=(N,),
        in_specs=[
            pl.BlockSpec((1, H, W, Cp), lambda n: (n, 0, 0, 0)),
            pl.BlockSpec((1, Cp), lambda n: (0, 0)),
            pl.BlockSpec((1, Cp), lambda n: (0, 0)),
        ],
        out_specs=pl.BlockSpec((1, Hp2, Wp2, Cp), lambda n: (n, 0, 0, 0)),
        compiler_params=pltpu.CompilerParams(
            dimension_semantics=("parallel",)),
    )


# ---------------------------------------------------------------------------
# ODEblock: fixed-step RK4 integration of the Pallas-accelerated ODEfunc.
# ---------------------------------------------------------------------------
def build_odeblock(N, C, H, W, n_steps=2, rtol=1e-3, atol=1e-3):
    # TODO(synk): adaptive-step dopri5 odeint (rtol/atol error control) has no
    # clean Pallas equivalent; a fixed-step classic RK4 over [0, 1] is used.
    del rtol, atol
    Cp = _round_up(C, LANE)
    conv_stats = _make_conv_stats_call(N, H, W, Cp)
    bn_relu_pad = _make_bn_relu_pad_call(N, H, W, Cp)
    count = float(N * H * W)

    def _prep_params(params):
        def pad_w(w):   # (3,3,C,C) HWIO -> (3,3,Cp,Cp) bf16, zero-padded
            return (jnp.zeros((3, 3, Cp, Cp), jnp.float32)
                    .at[:, :, :C, :C].set(w).astype(jnp.bfloat16))

        def pad_g(g):   # pad gamma with 1 so padded channels stay exactly zero
            return jnp.ones((Cp,), jnp.float32).at[:C].set(g)

        def pad_b(b):
            return jnp.zeros((Cp,), jnp.float32).at[:C].set(b)

        # bn1 is constructed but unused, and bn4 is applied after BOTH conv3
        # and conv4 -- mirrors the original PyTorch ODEfunc (intentional).
        w = jnp.stack([pad_w(params["w1"]), pad_w(params["w2"]),
                       pad_w(params["w3"]), pad_w(params["w4"])])
        g = jnp.stack([pad_g(params["g2"]), pad_g(params["g3"]),
                       pad_g(params["g4"]), pad_g(params["g4"])])
        b = jnp.stack([pad_b(params["b2"]), pad_b(params["b3"]),
                       pad_b(params["b4"]), pad_b(params["b4"])])
        return w, g, b

    def _odefunc(t, x_nchw, stacked):
        # ODEfunc.forward ignores t.
        # TODO(synk): `self.nfe += 1` is a host-side stateful counter; not modeled.
        del t
        a = jnp.transpose(x_nchw, (0, 2, 3, 1))                   # NCHW -> NHWC
        a = jnp.pad(a, ((0, 0), (1, 1), (1, 1), (0, Cp - C)))     # halo + lane pad
        a = a.astype(jnp.bfloat16)

        def stage(carry, wgb):
            w, g, b = wgb
            y, part = conv_stats(carry, w)              # pass A (Pallas)
            s = jnp.sum(part, axis=0)                   # (2, Cp) finalize (tiny)
            mean = s[0] / count
            var = jnp.maximum(s[1] / count - mean * mean, 0.0)
            scale = g * jax.lax.rsqrt(var + BN_EPS)     # folded BN affine
            shift = b - mean * scale
            nxt = bn_relu_pad(y, scale.reshape(1, Cp), shift.reshape(1, Cp))
            return nxt, None

        a, _ = jax.lax.scan(stage, a, stacked)
        out = a[:, 1:H + 1, 1:W + 1, :C].astype(jnp.float32)
        return jnp.transpose(out, (0, 3, 1, 2))                   # NHWC -> NCHW

    def forward(x, params):
        # ODEblock.forward: odeint(odefunc, x, [0, 1]); return the state at t=1.
        stacked = _prep_params(params)
        dt = 1.0 / n_steps

        def rk4_step(i, xk):
            t = i * dt
            k1 = _odefunc(t, xk, stacked)
            k2 = _odefunc(t + 0.5 * dt, xk + 0.5 * dt * k1, stacked)
            k3 = _odefunc(t + 0.5 * dt, xk + 0.5 * dt * k2, stacked)
            k4 = _odefunc(t + dt, xk + dt * k3, stacked)
            return xk + (dt / 6.0) * (k1 + 2.0 * k2 + 2.0 * k3 + k4)

        return jax.lax.fori_loop(0, n_steps, rk4_step, x)

    return jax.jit(forward)


# ---------------------------------------------------------------------------
# Deterministic parameter init (shapes from ODEfunc.__init__, in_planes = dim)
# ---------------------------------------------------------------------------
def init_params(key, dim):
    ks = jax.random.split(key, 4)

    def conv_w(k):
        fan_in = 9 * dim
        # stored as (Kh, Kw, Cin, Cout); PyTorch OIHW == transpose(3, 2, 0, 1)
        return jax.random.normal(k, (3, 3, dim, dim), jnp.float32) * (2.0 / fan_in) ** 0.5

    ar = jnp.arange(dim, dtype=jnp.float32)
    return {
        "w1": conv_w(ks[0]), "w2": conv_w(ks[1]), "w3": conv_w(ks[2]), "w4": conv_w(ks[3]),
        "g2": 1.0 + 0.10 * ar, "b2": 0.01 * ar,
        "g3": 1.0 - 0.05 * ar, "b3": -0.02 * ar,
        "g4": 0.9 + 0.05 * ar, "b4": 0.03 * ar,
    }


# ---------------------------------------------------------------------------
# Pure-JAX f32 reference (same fixed-step RK4; validates the Pallas kernels)
# ---------------------------------------------------------------------------
def reference_forward(x, params, n_steps=2):
    def conv(z, w_hwio):
        w_oihw = jnp.transpose(w_hwio, (3, 2, 0, 1))
        return jax.lax.conv_general_dilated(
            z, w_oihw, (1, 1), ((1, 1), (1, 1)),
            dimension_numbers=("NCHW", "OIHW", "NCHW"))

    def bn(z, g, b):
        mean = jnp.mean(z, axis=(0, 2, 3), keepdims=True)
        var = jnp.mean((z - mean) ** 2, axis=(0, 2, 3), keepdims=True)
        zn = (z - mean) * jax.lax.rsqrt(var + BN_EPS)
        return zn * g[None, :, None, None] + b[None, :, None, None]

    def f(z):
        for w, g, b in [(params["w1"], params["g2"], params["b2"]),
                        (params["w2"], params["g3"], params["b3"]),
                        (params["w3"], params["g4"], params["b4"]),
                        (params["w4"], params["g4"], params["b4"])]:
            z = jnp.maximum(bn(conv(z, w), g, b), 0.0)
        return z

    dt = 1.0 / n_steps
    xk = x
    for _ in range(n_steps):
        k1 = f(xk)
        k2 = f(xk + 0.5 * dt * k1)
        k3 = f(xk + 0.5 * dt * k2)
        k4 = f(xk + dt * k3)
        xk = xk + (dt / 6.0) * (k1 + 2.0 * k2 + 2.0 * k3 + k4)
    return xk


if __name__ == "__main__":
    N, C, H, W = 2, 4, 16, 16
    key = jax.random.PRNGKey(0)
    kx, kp = jax.random.split(key)
    x = jax.random.normal(kx, (N, C, H, W), jnp.float32)
    params = init_params(kp, C)

    odeblock = build_odeblock(N, C, H, W, n_steps=2)
    out = jax.block_until_ready(odeblock(x, params))
    assert out.shape == (N, C, H, W) and out.dtype == jnp.float32

    ref = jax.block_until_ready(reference_forward(x, params, n_steps=2))
    # bf16 MXU operands + bf16 inter-stage activations in the kernel path =>
    # compare against the pure-f32 reference with a correspondingly wider tol.
    err = float(jnp.max(jnp.abs(out - ref)))
    assert jnp.allclose(out, ref, rtol=5e-2, atol=5e-2), err
    print("KERNEL_OK")
</pallas_src>

<mosaic_0001>
module attributes {stable_mosaic.version = 11 : i64} {
  func.func @kernel(%arg0: i32, %arg1: memref<1x18x18x128xbf16, #tpu.memory_space<vmem>>, %arg2: memref<3x3x128x128xbf16, #tpu.memory_space<vmem>>, %arg3: memref<1x16x16x128xf32, #tpu.memory_space<vmem>>, %arg4: memref<1x2x128xf32, #tpu.memory_space<vmem>>) attributes {dimension_semantics = [#tpu.dimension_semantics<parallel>], iteration_bounds = array<i64: 2>, scalar_prefetch = 0 : i64, scratch_operands = 0 : i64, tpu.core_type = #tpu.core_type<tc>, window_params = [{transform_indices = @transform_0, window_bounds = array<i64: 1, 18, 18, 128>}, {pipeline_mode = #tpu.pipeline_mode<synchronous>, transform_indices = @transform_1, window_bounds = array<i64: 3, 3, 128, 128>}, {transform_indices = @transform_2, window_bounds = array<i64: 1, 16, 16, 128>}, {transform_indices = @transform_3, window_bounds = array<i64: 1, 2, 128>}]} {
    %c0 = arith.constant 0 : index
    %c0_0 = arith.constant 0 : index
    %c0_1 = arith.constant 0 : index
    %c0_2 = arith.constant 0 : index
    %0 = vector.load %arg1[%c0, %c0_0, %c0_1, %c0_2] : memref<1x18x18x128xbf16, #tpu.memory_space<vmem>>, vector<1x18x18x128xbf16>
    %1 = vector.shape_cast %0 : vector<1x18x18x128xbf16> to vector<18x18x128xbf16>
    %cst = arith.constant 0.000000e+00 : f32
    %2 = vector.broadcast %cst : f32 to vector<256x128xf32>
    %3 = vector.extract_strided_slice %1 {offsets = [0, 0, 0], sizes = [16, 16, 128], strides = [1, 1, 1]} : vector<18x18x128xbf16> to vector<16x16x128xbf16>
    %4 = vector.shape_cast %3 : vector<16x16x128xbf16> to vector<256x128xbf16>
    %c0_3 = arith.constant 0 : index
    %c0_4 = arith.constant 0 : index
    %c0_5 = arith.constant 0 : index
    %c0_6 = arith.constant 0 : index
    %5 = vector.load %arg2[%c0_3, %c0_4, %c0_5, %c0_6] : memref<3x3x128x128xbf16, #tpu.memory_space<vmem>>, vector<1x1x128x128xbf16>
    %6 = vector.shape_cast %5 : vector<1x1x128x128xbf16> to vector<128x128xbf16>
    %cst_7 = arith.constant dense<0.000000e+00> : vector<256x128xf32>
    %7 = tpu.matmul %4, %6, %cst_7 {dimension_numbers = #tpu.dot_dimension_numbers<[1], [0], [0], [1], [0, 0, 1, 1], [], []>} : vector<256x128xbf16>, vector<128x128xbf16>, vector<256x128xf32> -> vector<256x128xf32>
    %8 = arith.addf %2, %7 : vector<256x128xf32>
    %9 = vector.extract_strided_slice %1 {offsets = [0, 1, 0], sizes = [16, 16, 128], strides = [1, 1, 1]} : vector<18x18x128xbf16> to vector<16x16x128xbf16>
    %10 = vector.shape_cast %9 : vector<16x16x128xbf16> to vector<256x128xbf16>
    %c0_8 = arith.constant 0 : index
    %c1 = arith.constant 1 : index
    %c0_9 = arith.constant 0 : index
    %c0_10 = arith.constant 0 : index
    %11 = vector.load %arg2[%c0_8, %c1, %c0_9, %c0_10] : memref<3x3x128x128xbf16, #tpu.memory_space<vmem>>, vector<1x1x128x128xbf16>
    %12 = vector.shape_cast %11 : vector<1x1x128x128xbf16> to vector<128x128xbf16>
    %cst_11 = arith.constant dense<0.000000e+00> : vector<256x128xf32>
    %13 = tpu.matmul %10, %12, %cst_11 {dimension_numbers = #tpu.dot_dimension_numbers<[1], [0], [0], [1], [0, 0, 1, 1], [], []>} : vector<256x128xbf16>, vector<128x128xbf16>, vector<256x128xf32> -> vector<256x128xf32>
    %14 = arith.addf %8, %13 : vector<256x128xf32>
    %15 = vector.extract_strided_slice %1 {offsets = [0, 2, 0], sizes = [16, 16, 128], strides = [1, 1, 1]} : vector<18x18x128xbf16> to vector<16x16x128xbf16>
    %16 = vector.shape_cast %15 : vector<16x16x128xbf16> to vector<256x128xbf16>
    %c0_12 = arith.constant 0 : index
    %c2 = arith.constant 2 : index
    %c0_13 = arith.constant 0 : index
    %c0_14 = arith.constant 0 : index
    %17 = vector.load %arg2[%c0_12, %c2, %c0_13, %c0_14] : memref<3x3x128x128xbf16, #tpu.memory_space<vmem>>, vector<1x1x128x128xbf16>
    %18 = vector.shape_cast %17 : vector<1x1x128x128xbf16> to vector<128x128xbf16>
    %cst_15 = arith.constant dense<0.000000e+00> : vector<256x128xf32>
    %19 = tpu.matmul %16, %18, %cst_15 {dimension_numbers = #tpu.dot_dimension_numbers<[1], [0], [0], [1], [0, 0, 1, 1], [], []>} : vector<256x128xbf16>, vector<128x128xbf16>, vector<256x128xf32> -> vector<256x128xf32>
    %20 = arith.addf %14, %19 : vector<256x128xf32>
    %21 = vector.extract_strided_slice %1 {offsets = [1, 0, 0], sizes = [16, 16, 128], strides = [1, 1, 1]} : vector<18x18x128xbf16> to vector<16x16x128xbf16>
    %22 = vector.shape_cast %21 : vector<16x16x128xbf16> to vector<256x128xbf16>
    %c1_16 = arith.constant 1 : index
    %c0_17 = arith.constant 0 : index
    %c0_18 = arith.constant 0 : index
    %c0_19 = arith.constant 0 : index
    %23 = vector.load %arg2[%c1_16, %c0_17, %c0_18, %c0_19] : memref<3x3x128x128xbf16, #tpu.memory_space<vmem>>, vector<1x1x128x128xbf16>
    %24 = vector.shape_cast %23 : vector<1x1x128x128xbf16> to vector<128x128xbf16>
    %cst_20 = arith.constant dense<0.000000e+00> : vector<256x128xf32>
    %25 = tpu.matmul %22, %24, %cst_20 {dimension_numbers = #tpu.dot_dimension_numbers<[1], [0], [0], [1], [0, 0, 1, 1], [], []>} : vector<256x128xbf16>, vector<128x128xbf16>, vector<256x128xf32> -> vector<256x128xf32>
    %26 = arith.addf %20, %25 : vector<256x128xf32>
    %27 = vector.extract_strided_slice %1 {offsets = [1, 1, 0], sizes = [16, 16, 128], strides = [1, 1, 1]} : vector<18x18x128xbf16> to vector<16x16x128xbf16>
    %28 = vector.shape_cast %27 : vector<16x16x128xbf16> to vector<256x128xbf16>
    %c1_21 = arith.constant 1 : index
    %c1_22 = arith.constant 1 : index
    %c0_23 = arith.constant 0 : index
    %c0_24 = arith.constant 0 : index
    %29 = vector.load %arg2[%c1_21, %c1_22, %c0_23, %c0_24] : memref<3x3x128x128xbf16, #tpu.memory_space<vmem>>, vector<1x1x128x128xbf16>
    %30 = vector.shape_cast %29 : vector<1x1x128x128xbf16> to vector<128x128xbf16>
    %cst_25 = arith.constant dense<0.000000e+00> : vector<256x128xf32>
    %31 = tpu.matmul %28, %30, %cst_25 {dimension_numbers = #tpu.dot_dimension_numbers<[1], [0], [0], [1], [0, 0, 1, 1], [], []>} : vector<256x128xbf16>, vector<128x128xbf16>, vector<256x128xf32> -> vector<256x128xf32>
    %32 = arith.addf %26, %31 : vector<256x128xf32>
    %33 = vector.extract_strided_slice %1 {offsets = [1, 2, 0], sizes = [16, 16, 128], strides = [1, 1, 1]} : vector<18x18x128xbf16> to vector<16x16x128xbf16>
    %34 = vector.shape_cast %33 : vector<16x16x128xbf16> to vector<256x128xbf16>
    %c1_26 = arith.constant 1 : index
    %c2_27 = arith.constant 2 : index
    %c0_28 = arith.constant 0 : index
    %c0_29 = arith.constant 0 : index
    %35 = vector.load %arg2[%c1_26, %c2_27, %c0_28, %c0_29] : memref<3x3x128x128xbf16, #tpu.memory_space<vmem>>, vector<1x1x128x128xbf16>
    %36 = vector.shape_cast %35 : vector<1x1x128x128xbf16> to vector<128x128xbf16>
    %cst_30 = arith.constant dense<0.000000e+00> : vector<256x128xf32>
    %37 = tpu.matmul %34, %36, %cst_30 {dimension_numbers = #tpu.dot_dimension_numbers<[1], [0], [0], [1], [0, 0, 1, 1], [], []>} : vector<256x128xbf16>, vector<128x128xbf16>, vector<256x128xf32> -> vector<256x128xf32>
    %38 = arith.addf %32, %37 : vector<256x128xf32>
    %39 = vector.extract_strided_slice %1 {offsets = [2, 0, 0], sizes = [16, 16, 128], strides = [1, 1, 1]} : vector<18x18x128xbf16> to vector<16x16x128xbf16>
    %40 = vector.shape_cast %39 : vector<16x16x128xbf16> to vector<256x128xbf16>
    %c2_31 = arith.constant 2 : index
    %c0_32 = arith.constant 0 : index
    %c0_33 = arith.constant 0 : index
    %c0_34 = arith.constant 0 : index
    %41 = vector.load %arg2[%c2_31, %c0_32, %c0_33, %c0_34] : memref<3x3x128x128xbf16, #tpu.memory_space<vmem>>, vector<1x1x128x128xbf16>
    %42 = vector.shape_cast %41 : vector<1x1x128x128xbf16> to vector<128x128xbf16>
    %cst_35 = arith.constant dense<0.000000e+00> : vector<256x128xf32>
    %43 = tpu.matmul %40, %42, %cst_35 {dimension_numbers = #tpu.dot_dimension_numbers<[1], [0], [0], [1], [0, 0, 1, 1], [], []>} : vector<256x128xbf16>, vector<128x128xbf16>, vector<256x128xf32> -> vector<256x128xf32>
    %44 = arith.addf %38, %43 : vector<256x128xf32>
    %45 = vector.extract_strided_slice %1 {offsets = [2, 1, 0], sizes = [16, 16, 128], strides = [1, 1, 1]} : vector<18x18x128xbf16> to vector<16x16x128xbf16>
    %46 = vector.shape_cast %45 : vector<16x16x128xbf16> to vector<256x128xbf16>
    %c2_36 = arith.constant 2 : index
    %c1_37 = arith.constant 1 : index
    %c0_38 = arith.constant 0 : index
    %c0_39 = arith.constant 0 : index
    %47 = vector.load %arg2[%c2_36, %c1_37, %c0_38, %c0_39] : memref<3x3x128x128xbf16, #tpu.memory_space<vmem>>, vector<1x1x128x128xbf16>
    %48 = vector.shape_cast %47 : vector<1x1x128x128xbf16> to vector<128x128xbf16>
    %cst_40 = arith.constant dense<0.000000e+00> : vector<256x128xf32>
    %49 = tpu.matmul %46, %48, %cst_40 {dimension_numbers = #tpu.dot_dimension_numbers<[1], [0], [0], [1], [0, 0, 1, 1], [], []>} : vector<256x128xbf16>, vector<128x128xbf16>, vector<256x128xf32> -> vector<256x128xf32>
    %50 = arith.addf %44, %49 : vector<256x128xf32>
    %51 = vector.extract_strided_slice %1 {offsets = [2, 2, 0], sizes = [16, 16, 128], strides = [1, 1, 1]} : vector<18x18x128xbf16> to vector<16x16x128xbf16>
    %52 = vector.shape_cast %51 : vector<16x16x128xbf16> to vector<256x128xbf16>
    %c2_41 = arith.constant 2 : index
    %c2_42 = arith.constant 2 : index
    %c0_43 = arith.constant 0 : index
    %c0_44 = arith.constant 0 : index
    %53 = vector.load %arg2[%c2_41, %c2_42, %c0_43, %c0_44] : memref<3x3x128x128xbf16, #tpu.memory_space<vmem>>, vector<1x1x128x128xbf16>
    %54 = vector.shape_cast %53 : vector<1x1x128x128xbf16> to vector<128x128xbf16>
    %cst_45 = arith.constant dense<0.000000e+00> : vector<256x128xf32>
    %55 = tpu.matmul %52, %54, %cst_45 {dimension_numbers = #tpu.dot_dimension_numbers<[1], [0], [0], [1], [0, 0, 1, 1], [], []>} : vector<256x128xbf16>, vector<128x128xbf16>, vector<256x128xf32> -> vector<256x128xf32>
    %56 = arith.addf %50, %55 : vector<256x128xf32>
    %57 = vector.shape_cast %56 : vector<256x128xf32> to vector<1x16x16x128xf32>
    %c0_46 = arith.constant 0 : index
    %c0_47 = arith.constant 0 : index
    %c0_48 = arith.constant 0 : index
    %c0_49 = arith.constant 0 : index
    %58 = vector.load %arg3[%c0_46, %c0_47, %c0_48, %c0_49] : memref<1x16x16x128xf32, #tpu.memory_space<vmem>>, vector<1x16x16x128xf32>
    tpu.vector_store %arg3[%c0_46, %c0_47, %c0_48, %c0_49], %57 {strides = array<i32>} : memref<1x16x16x128xf32, #tpu.memory_space<vmem>>, vector<1x16x16x128xf32>,
    %cst_50 = arith.constant dense<0.000000e+00> : vector<128xf32>
    %59 = vector.multi_reduction <add>, %56, %cst_50 [0] : vector<256x128xf32> to vector<128xf32>
    %60 = vector.shape_cast %59 : vector<128xf32> to vector<1x128xf32>
    %61 = arith.mulf %56, %56 : vector<256x128xf32>
    %cst_51 = arith.constant dense<0.000000e+00> : vector<128xf32>
    %62 = vector.multi_reduction <add>, %61, %cst_51 [0] : vector<256x128xf32> to vector<128xf32>
    %63 = vector.shape_cast %62 : vector<128xf32> to vector<1x128xf32>
    %64 = tpu.concatenate %60, %63 in 0 : vector<1x128xf32>, vector<1x128xf32> -> vector<2x128xf32>
    %65 = vector.shape_cast %64 : vector<2x128xf32> to vector<1x2x128xf32>
    %c0_52 = arith.constant 0 : index
    %c0_53 = arith.constant 0 : index
    %c0_54 = arith.constant 0 : index
    %66 = vector.load %arg4[%c0_52, %c0_53, %c0_54] : memref<1x2x128xf32, #tpu.memory_space<vmem>>, vector<1x2x128xf32>
    tpu.vector_store %arg4[%c0_52, %c0_53, %c0_54], %65 {strides = array<i32>} : memref<1x2x128xf32, #tpu.memory_space<vmem>>, vector<1x2x128xf32>,
    return
  }
  func.func @transform_0(%arg0: i32) -> (i32, i32, i32, i32) {
    %c0_i32 = arith.constant 0 : i32
    %c0_i32_0 = arith.constant 0 : i32
    %c0_i32_1 = arith.constant 0 : i32
    %c0_i32_2 = arith.constant 0 : i32
    return %arg0, %c0_i32, %c0_i32_0, %c0_i32_1 : i32, i32, i32, i32
  }
  func.func @transform_1(%arg0: i32) -> (i32, i32, i32, i32) {
    %c0_i32 = arith.constant 0 : i32
    %c0_i32_0 = arith.constant 0 : i32
    %c0_i32_1 = arith.constant 0 : i32
    %c0_i32_2 = arith.constant 0 : i32
    %c0_i32_3 = arith.constant 0 : i32
    return %c0_i32, %c0_i32_0, %c0_i32_1, %c0_i32_2 : i32, i32, i32, i32
  }
  func.func @transform_2(%arg0: i32) -> (i32, i32, i32, i32) {
    %c0_i32 = arith.constant 0 : i32
    %c0_i32_0 = arith.constant 0 : i32
    %c0_i32_1 = arith.constant 0 : i32
    %c0_i32_2 = arith.constant 0 : i32
    return %arg0, %c0_i32, %c0_i32_0, %c0_i32_1 : i32, i32, i32, i32
  }
  func.func @transform_3(%arg0: i32) -> (i32, i32, i32) {
    %c0_i32 = arith.constant 0 : i32
    %c0_i32_0 = arith.constant 0 : i32
    %c0_i32_1 = arith.constant 0 : i32
    return %arg0, %c0_i32, %c0_i32_0 : i32, i32, i32
  }
}

module attributes {stable_mosaic.version = 11 : i64} {
  func.func @kernel(%arg0: i32, %arg1: memref<1x16x16x128xf32, #tpu.memory_space<vmem>>, %arg2: memref<1x128xf32, #tpu.memory_space<vmem>>, %arg3: memref<1x128xf32, #tpu.memory_space<vmem>>, %arg4: memref<1x18x18x128xbf16, #tpu.memory_space<vmem>>) attributes {dimension_semantics = [#tpu.dimension_semantics<parallel>], iteration_bounds = array<i64: 2>, scalar_prefetch = 0 : i64, scratch_operands = 0 : i64, tpu.core_type = #tpu.core_type<tc>, window_params = [{transform_indices = @transform_0, window_bounds = array<i64: 1, 16, 16, 128>}, {pipeline_mode = #tpu.pipeline_mode<synchronous>, transform_indices = @transform_1, window_bounds = array<i64: 1, 128>}, {pipeline_mode = #tpu.pipeline_mode<synchronous>, transform_indices = @transform_2, window_bounds = array<i64: 1, 128>}, {transform_indices = @transform_3, window_bounds = array<i64: 1, 18, 18, 128>}]} {
    %c0 = arith.constant 0 : index
    %c0_0 = arith.constant 0 : index
    %c0_1 = arith.constant 0 : index
    %c0_2 = arith.constant 0 : index
    %0 = vector.load %arg1[%c0, %c0_0, %c0_1, %c0_2] : memref<1x16x16x128xf32, #tpu.memory_space<vmem>>, vector<1x16x16x128xf32>
    %1 = vector.shape_cast %0 : vector<1x16x16x128xf32> to vector<16x16x128xf32>
    %c0_3 = arith.constant 0 : index
    %c0_4 = arith.constant 0 : index
    %2 = vector.load %arg2[%c0_3, %c0_4] : memref<1x128xf32, #tpu.memory_space<vmem>>, vector<1x128xf32>
    %3 = vector.shape_cast %2 : vector<1x128xf32> to vector<1x1x128xf32>
    %4 = vector.broadcast %3 : vector<1x1x128xf32> to vector<16x16x128xf32>
    %5 = arith.mulf %1, %4 : vector<16x16x128xf32>
    %c0_5 = arith.constant 0 : index
    %c0_6 = arith.constant 0 : index
    %6 = vector.load %arg3[%c0_5, %c0_6] : memref<1x128xf32, #tpu.memory_space<vmem>>, vector<1x128xf32>
    %7 = vector.shape_cast %6 : vector<1x128xf32> to vector<1x1x128xf32>
    %8 = vector.broadcast %7 : vector<1x1x128xf32> to vector<16x16x128xf32>
    %9 = arith.addf %5, %8 : vector<16x16x128xf32>
    %cst = arith.constant 0.000000e+00 : f32
    %10 = vector.broadcast %cst : f32 to vector<16x16x128xf32>
    %11 = arith.maximumf %9, %10 : vector<16x16x128xf32>
    %cst_7 = arith.constant 0.000000e+00 : bf16
    %12 = vector.broadcast %cst_7 : bf16 to vector<1x18x18x128xbf16>
    %c0_8 = arith.constant 0 : index
    %c0_9 = arith.constant 0 : index
    %c0_10 = arith.constant 0 : index
    %c0_11 = arith.constant 0 : index
    %13 = vector.load %arg4[%c0_8, %c0_9, %c0_10, %c0_11] : memref<1x18x18x128xbf16, #tpu.memory_space<vmem>>, vector<1x18x18x128xbf16>
    tpu.vector_store %arg4[%c0_8, %c0_9, %c0_10, %c0_11], %12 {strides = array<i32>} : memref<1x18x18x128xbf16, #tpu.memory_space<vmem>>, vector<1x18x18x128xbf16>,
    %14 = vector.shape_cast %11 : vector<16x16x128xf32> to vector<1x16x16x128xf32>
    %15 = arith.truncf %14 : vector<1x16x16x128xf32> to vector<1x16x16x128xbf16>
    %c0_12 = arith.constant 0 : index
    %c1 = arith.constant 1 : index
    %c1_13 = arith.constant 1 : index
    %c0_14 = arith.constant 0 : index
    %16 = vector.load %arg4[%c0_12, %c1, %c1_13, %c0_14] : memref<1x18x18x128xbf16, #tpu.memory_space<vmem>>, vector<1x16x16x128xbf16>
    tpu.vector_store %arg4[%c0_12, %c1, %c1_13, %c0_14], %15 {strides = array<i32>} : memref<1x18x18x128xbf16, #tpu.memory_space<vmem>>, vector<1x16x16x128xbf16>,
    return
  }
  func.func @transform_0(%arg0: i32) -> (i32, i32, i32, i32) {
    %c0_i32 = arith.constant 0 : i32
    %c0_i32_0 = arith.constant 0 : i32
    %c0_i32_1 = arith.constant 0 : i32
    %c0_i32_2 = arith.constant 0 : i32
    return %arg0, %c0_i32, %c0_i32_0, %c0_i32_1 : i32, i32, i32, i32
  }
  func.func @transform_1(%arg0: i32) -> (i32, i32) {
    %c0_i32 = arith.constant 0 : i32
    %c0_i32_0 = arith.constant 0 : i32
    %c0_i32_1 = arith.constant 0 : i32
    return %c0_i32, %c0_i32_0 : i32, i32
  }
  func.func @transform_2(%arg0: i32) -> (i32, i32) {
    %c0_i32 = arith.constant 0 : i32
    %c0_i32_0 = arith.constant 0 : i32
    %c0_i32_1 = arith.constant 0 : i32
    return %c0_i32, %c0_i32_0 : i32, i32
  }
  func.func @transform_3(%arg0: i32) -> (i32, i32, i32, i32) {
    %c0_i32 = arith.constant 0 : i32
    %c0_i32_0 = arith.constant 0 : i32
    %c0_i32_1 = arith.constant 0 : i32
    %c0_i32_2 = arith.constant 0 : i32
    return %arg0, %c0_i32, %c0_i32_0, %c0_i32_1 : i32, i32, i32, i32
  }
}

</mosaic_0001>

<bundles_post_ra>
// kernel: closed_call.30
= control target key start
LH: loop header
LB: loop body
LE: loop exit
PB: predicated region body
PF: predicated region fallthrough
CT: control target
= control target key end

     0   :  { %s1156_s12 = smov 0   ;;  %s1537_s0 = inlined_call_operand.vmem [shape: f32[2,16,16,128], index: 0, kind: input, shape index: {}]   ;;  %s1538_s1 = inlined_call_operand.vmem [shape: f32[1,128], index: 1, kind: input, shape index: {}]   ;;  %s1539_s2 = inlined_call_operand.vmem [shape: f32[1,128], index: 2, kind: input, shape index: {}]   ;;  %s1540_s3 = inlined_call_operand.vmem [shape: bf16[2,18,18,128], index: 3, kind: output, shape index: {}]  }
   0x1 LB: > { %s960_s13 = sadd.s32 4294967295, %s1133_s12   ;;  %p964_p0 = scmp.ge.s32.totalorder %s1133_s12, 1  ;;  %s1133_s12 = sphi %s1156_s12, %s13_s12  }
   0x2   : > { %p137_p1 = scmp.lt.s32.totalorder %s1133_s12, 3 }
   0x4   : > { %p138_p2 = pnand %p964_p0, %p137_p1 }
   0x5   : > { %p161_p3 = scmp.lt.s32.totalorder (!%p138_p2), %s960_s13, 1 }
   0x6   : > { %141 = sbr.rel (%p138_p2) target bundleno = 115 (0x73), region = 32 }
   0xb   : > { %s1548_s13 = smov (!%p161_p3, %s960_s13), 1  ;;  %v1167_v0 = vld [vmem:[%s1538_s1] ss:$0 sm:$0xff]  ;;  %vm789_vm0 = vsmask.f32 7938  ;;  %vm788_vm1 = vcmask 1043456  }
   0xc   : > { %s1117_s14 = smul.u32 216, %s1548_s13  ;;  %s1084_s15 = sshll.u32 %s1548_s13, 8  ;;  %v1177_v1 = vld [vmem:[%s1539_s2] ss:$0 sm:$0xff]  ;;  %vm464_vm2 = vsmask.f32 256  ;;  %vm1271_vm5 = vmand %vm788_vm1, %vm789_vm0 }
   0xd   : > { %s1172_s20 = scalar_lea.vmem %s1537_s0, %s1084_s15  ;;  %v1135_v5 = vmov 0   ;;  %vm795_vm3 = vcmask 1040384   ;;  %vm465_vm4 = vsmask.f32 4368 }
   0xe   : > { %s1182_s25 = scalar_lea.vmem %s1540_s3, %s1117_s14  ;;  %v172_v2 = vld [vmem:[%s1172_s20] sm:$0xff]  ;;  %v173_v3 = vld [vmem:[%s1172_s20 + $0x8] sm:$0xff]  ;;  %v174_v4 = vld [vmem:[%s1172_s20 + $0x10] sm:$0xff] }
   0xf   : > { %317 = vst [vmem:[%s1182_s25 + $0xc] sm:$0xf] %v1135_v5  ;;  %314 = vst [vmem:[%s1182_s25] sm:$0xf] %v1135_v5  ;;  %v211_v6 = vmul.f32 %v1167_v0, %v172_v2  ;;  %v212_v7 = vmul.f32 %v1167_v0, %v173_v3  ;;  %v213_v8 = vmul.f32 %v1167_v0, %v174_v4  ;;  %v175_v9 = vld [vmem:[%s1172_s20 + $0x18] sm:$0xff]  ;;  %v176_v10 = vld [vmem:[%s1172_s20 + $0x20] sm:$0xff] }
  0x10   : > { %315 = vst [vmem:[%s1182_s25 + $0x4] sm:$0xf] %v1135_v5  ;;  %316 = vst [vmem:[%s1182_s25 + $0x8] sm:$0x1] %v1135_v5  ;;  %v177_v11 = vld [vmem:[%s1172_s20 + $0x28] sm:$0xff]  ;;  %v214_v12 = vmul.f32 %v1167_v0, %v175_v9  ;;  %v215_v13 = vmul.f32 %v1167_v0, %v176_v10  ;;  %v178_v15 = vld [vmem:[%s1172_s20 + $0x30] sm:$0xff] }
  0x11   : > { %318 = vst [vmem:[%s1182_s25 + $0x10] sm:$0xf] %v1135_v5  ;;  %319 = vst [vmem:[%s1182_s25 + $0x14] sm:$0x1] %v1135_v5  ;;  %v216_v14 = vmul.f32 %v1167_v0, %v177_v11  ;;  %v179_v16 = vld [vmem:[%s1172_s20 + $0x38] sm:$0xff]  ;;  %v250_v17 = vadd.f32 %v1177_v1, %v211_v6  ;;  %v251_v18 = vadd.f32 %v1177_v1, %v212_v7  ;;  %v180_v29 = vld [vmem:[%s1172_s20 + $0x40] sm:$0xff] }
  0x12   : > { %320 = vst [vmem:[%s1182_s25 + $0x18] sm:$0xf] %v1135_v5  ;;  %321 = vst [vmem:[%s1182_s25 + $0x1c] sm:$0xf] %v1135_v5  ;;  %v252_v19 = vadd.f32 %v1177_v1, %v213_v8  ;;  %v217_v20 = vmul.f32 %v1167_v0, %v178_v15  ;;  %v253_v21 = vadd.f32 %v1177_v1, %v214_v12  ;;  %v181_v15 = vld [vmem:[%s1172_s20 + $0x48] sm:$0xff] }
  0x13   : > { %322 = vst [vmem:[%s1182_s25 + $0x20] sm:$0x1] %v1135_v5  ;;  %323 = vst [vmem:[%s1182_s25 + $0x24] sm:$0xf] %v1135_v5  ;;  %v254_v22 = vadd.f32 %v1177_v1, %v215_v13  ;;  %v255_v23 = vadd.f32 %v1177_v1, %v216_v14  ;;  %v218_v24 = vmul.f32 %v1167_v0, %v179_v16  ;;  %v282_v25 = vmax.f32 %v250_v17, 0.0 }
  0x14   : > { %324 = vst [vmem:[%s1182_s25 + $0x28] sm:$0xf] %v1135_v5  ;;  %325 = vst [vmem:[%s1182_s25 + $0x2c] sm:$0x1] %v1135_v5  ;;  %v283_v26 = vmax.f32 %v251_v18, 0.0  ;;  %v284_v27 = vmax.f32 %v252_v19, 0.0  ;;  %v1261_v28 = vadd.f32 %v1177_v1, %v217_v20  ;;  %v219_v41 = vmul.f32 %v1167_v0, %v180_v29 }
  0x15   : > { %326 = vst [vmem:[%s1182_s25 + $0x30] sm:$0xf] %v1135_v5  ;;  %327 = vst [vmem:[%s1182_s25 + $0x34] sm:$0xf] %v1135_v5  ;;  %v285_v30 = vmax.f32 %v253_v21, 0.0  ;;  %v286_v31 = vmax.f32 %v254_v22, 0.0  ;;  %v1265_v33 = vadd.f32 %v1177_v1, %v218_v24  ;;  %v1085_v34 = vpack.c.bf16 %v282_v25, %v282_v25 }
  0x16   : > { %328 = vst [vmem:[%s1182_s25 + $0x38] sm:$0x1] %v1135_v5  ;;  %329 = vst [vmem:[%s1182_s25 + $0x3c] sm:$0xf] %v1135_v5  ;;  %v287_v32 = vmax.f32 %v255_v23, 0.0  ;;  %v1086_v35 = vpack.c.bf16 %v283_v26, %v283_v26  ;;  %v1087_v36 = vpack.c.bf16 %v284_v27, %v284_v27  ;;  %v288_v37 = vmax.f32 %v1261_v28, 0.0 }
  0x17   : > { %330 = vst [vmem:[%s1182_s25 + $0x40] sm:$0xf] %v1135_v5  ;;  %331 = vst [vmem:[%s1182_s25 + $0x44] sm:$0x1] %v1135_v5  ;;  %v1088_v38 = vpack.c.bf16 %v285_v30, %v285_v30  ;;  %v1089_v39 = vpack.c.bf16 %v286_v31, %v286_v31  ;;  %v468_v42 = vshrl.u32 %v1085_v34, 16  ;;  %v471_v43 = vshll.u32 %v1085_v34, 16 }
  0x18   : > { %332 = vst [vmem:[%s1182_s25 + $0x48] sm:$0xf] %v1135_v5  ;;  %333 = vst [vmem:[%s1182_s25 + $0x4c] sm:$0xf] %v1135_v5  ;;  %v1090_v40 = vpack.c.bf16 %v287_v32, %v287_v32  ;;  %v476_v44 = vshrl.u32 %v1086_v35, 16  ;;  %v479_v45 = vshll.u32 %v1086_v35, 16  ;;  %v1091_v24 = vpack.c.bf16 %v288_v37, %v288_v37 }
  0x19   : > { %334 = vst [vmem:[%s1182_s25 + $0x50] sm:$0x1] %v1135_v5  ;;  %335 = vst [vmem:[%s1182_s25 + $0x54] sm:$0xf] %v1135_v5  ;;  %v485_v47 = vshrl.u32 %v1087_v36, 16  ;;  %v488_v48 = vshll.u32 %v1087_v36, 16  ;;  %v258_v28 = vadd.f32 %v1177_v1, %v219_v41  ;;  %v220_v29 = vmul.f32 %v1167_v0, %v181_v15 }
  0x1a   : > { %336 = vst [vmem:[%s1182_s25 + $0x58] sm:$0xf] %v1135_v5  ;;  %337 = vst [vmem:[%s1182_s25 + $0x5c] sm:$0x1] %v1135_v5  ;;  %v493_v49 = vshrl.u32 %v1088_v38, 16  ;;  %v496_v50 = vshll.u32 %v1088_v38, 16 }
  0x1b   : > { %338 = vst [vmem:[%s1182_s25 + $0x60] sm:$0xf] %v1135_v5  ;;  %339 = vst [vmem:[%s1182_s25 + $0x64] sm:$0xf] %v1135_v5  ;;  %v470_v51 = vrot.slane %v468_v42, 7  ;;  %v478_v54 = vrot.slane %v476_v44, 7 }
  0x1c   : > { %340 = vst [vmem:[%s1182_s25 + $0x68] sm:$0x1] %v1135_v5  ;;  %341 = vst [vmem:[%s1182_s25 + $0x6c] sm:$0xf] %v1135_v5  ;;  %v1002_v52 = vld [vmem:[%s1182_s25 + $0xc] sm:$0xf] }
  0x1d   : > { %342 = vst [vmem:[%s1182_s25 + $0x70] sm:$0xf] %v1135_v5  ;;  %343 = vst [vmem:[%s1182_s25 + $0x74] sm:$0x1] %v1135_v5  ;;  %v502_v55 = vshrl.u32 %v1089_v39, 16  ;;  %v505_v56 = vshll.u32 %v1089_v39, 16  ;;  %v473_v63 = vor.u32 %v471_v43, %v470_v51  ;;  %v481_v3 = vor.u32 %v479_v45, %v478_v54 }
  0x1e   : > { %344 = vst [vmem:[%s1182_s25 + $0x78] sm:$0xf] %v1135_v5  ;;  %345 = vst [vmem:[%s1182_s25 + $0x7c] sm:$0xf] %v1135_v5  ;;  %v1005_v58 = vld [vmem:[%s1182_s25 + $0x14] sm:$0x1] }
  0x1f   : > { %346 = vst [vmem:[%s1182_s25 + $0x80] sm:$0x1] %v1135_v5  ;;  %347 = vst [vmem:[%s1182_s25 + $0x84] sm:$0xf] %v1135_v5  ;;  %v487_v59 = vrot.slane %v485_v47, 7  ;;  %v495_v60 = vrot.slane %v493_v49, 7  ;;  %v792_v11 = vsel %vm1271_vm5, %v473_v63, %v1002_v52 }
  0x20   : > { %348 = vst [vmem:[%s1182_s25 + $0x88] sm:$0xf] %v1135_v5  ;;  %349 = vst [vmem:[%s1182_s25 + $0x8c] sm:$0x1] %v1135_v5  ;;  %v510_v61 = vshrl.u32 %v1090_v40, 16  ;;  %v513_v62 = vshll.u32 %v1090_v40, 16  ;;  %v259_v40 = vadd.f32 %v1177_v1, %v220_v29 }
  0x21   : > { %350 = vst [vmem:[%s1182_s25 + $0x90] sm:$0xf] %v1135_v5  ;;  %351 = vst [vmem:[%s1182_s25 + $0x94] sm:$0xf] %v1135_v5  ;;  %v474_v2 = vrot.slane %v470_v51, 4  ;;  %v483_v4 = vrot.slane %v478_v54, 4  ;;  %v490_v7 = vor.u32 %v488_v48, %v487_v59  ;;  %v498_v9 = vor.u32 %v496_v50, %v495_v60 }
  0x22   : > { %352 = vst [vmem:[%s1182_s25 + $0x98] sm:$0x1] %v1135_v5  ;;  %353 = vst [vmem:[%s1182_s25 + $0x9c] sm:$0xf] %v1135_v5  ;;  %v1010_v6 = vld [vmem:[%s1182_s25 + $0x20] sm:$0x1] }
  0x23   : > { %354 = vst [vmem:[%s1182_s25 + $0xa0] sm:$0xf] %v1135_v5  ;;  %355 = vst [vmem:[%s1182_s25 + $0xa4] sm:$0x1] %v1135_v5  ;;  %v491_v8 = vrot.slane %v487_v59, 4  ;;  %v500_v10 = vrot.slane %v495_v60, 4 }
  0x24   : > { %356 = vst [vmem:[%s1182_s25 + $0xa8] sm:$0xf] %v1135_v5  ;;  %357 = vst [vmem:[%s1182_s25 + $0xac] sm:$0xf] %v1135_v5  ;;  %v504_v14 = vrot.slane %v502_v55, 7  ;;  %v512_v20 = vrot.slane %v510_v61, 7 }
  0x25   : > { %358 = vst [vmem:[%s1182_s25 + $0xb0] sm:$0x1] %v1135_v5  ;;  %359 = vst [vmem:[%s1182_s25 + $0xb4] sm:$0xf] %v1135_v5  ;;  %v1012_v19 = vld [vmem:[%s1182_s25 + $0x24] sm:$0xf] }
  0x26   : > { %360 = vst [vmem:[%s1182_s25 + $0xb8] sm:$0xf] %v1135_v5  ;;  %361 = vst [vmem:[%s1182_s25 + $0xbc] sm:$0x1] %v1135_v5  ;;  %v507_v21 = vor.u32 %v505_v56, %v504_v14  ;;  %v508_v22 = vrot.slane %v504_v14, 4  ;;  %v289_v25 = vmax.f32 %v1265_v33, 0.0  ;;  %v515_v26 = vor.u32 %v513_v62, %v512_v20 }
  0x27   : > { %362 = vst [vmem:[%s1182_s25 + $0xc0] sm:$0xf] %v1135_v5  ;;  %363 = vst [vmem:[%s1182_s25 + $0xc4] sm:$0xf] %v1135_v5  ;;  %v1015_v23 = vld [vmem:[%s1182_s25 + $0x2c] sm:$0x1] }
  0x28   : > { %364 = vst [vmem:[%s1182_s25 + $0xc8] sm:$0x1] %v1135_v5  ;;  %365 = vst [vmem:[%s1182_s25 + $0xcc] sm:$0xf] %v1135_v5  ;;  %v517_v27 = vrot.slane %v512_v20, 4  ;;  %v182_v30 = vld [vmem:[%s1172_s20 + $0x50] sm:$0xff]  ;;  %v808_v31 = vsel %vm1271_vm5, %v507_v21, %v1012_v19  ;;  %v1092_v35 = vpack.c.bf16 %v289_v25, %v289_v25 }
  0x29   : > { %366 = vst [vmem:[%s1182_s25 + $0xd0] sm:$0xf] %v1135_v5  ;;  %367 = vst [vmem:[%s1182_s25 + $0xd4] sm:$0x1] %v1135_v5  ;;  %v1007_v5 = vld [vmem:[%s1182_s25 + $0x18] sm:$0xf]  ;;  %v221_v44 = vmul.f32 %v1167_v0, %v182_v30 }
  0x2a   : > { %vm1278_vm6 = vmor %vm464_vm2, %vm465_vm4  ;;  %1003 = vst [vmem:[%s1182_s25 + $0xc] sm:$0xf] %v792_v11  ;;  %v801_v16 = vsel %vm1271_vm5, %v490_v7, %v1007_v5  ;;  %v519_v32 = vshrl.u32 %v1091_v24, 16  ;;  %v522_v34 = vshll.u32 %v1091_v24, 16  ;;  %v183_v36 = vld [vmem:[%s1172_s20 + $0x58] sm:$0xff]  ;;  %v184_v37 = vld [vmem:[%s1172_s20 + $0x60] sm:$0xff] }
  0x2b   : > { %vm1284_vm7 = vmand %vm795_vm3, %vm464_vm2  ;;  %v482_v12 = vsel %vm1278_vm6, %v474_v2, %v481_v3  ;;  %v499_v17 = vsel %vm1278_vm6, %v491_v8, %v498_v9  ;;  %1008 = vst [vmem:[%s1182_s25 + $0x18] sm:$0xf] %v801_v16  ;;  %v516_v33 = vsel %vm1278_vm6, %v508_v22, %v515_v26  ;;  %v290_v39 = vmax.f32 %v258_v28, 0.0  ;;  %v1017_v45 = vld [vmem:[%s1182_s25 + $0x30] sm:$0xf]  ;;  %v185_v8 = vld [vmem:[%s1172_s20 + $0x68] sm:$0xff] }
  0x2c   : > { %v798_v13 = vsel %vm1284_vm7, %v483_v4, %v1005_v58  ;;  %1004 = vst [vmem:[%s1182_s25 + $0x10] sm:$0xf] %v482_v12  ;;  %v805_v18 = vsel %vm1284_vm7, %v500_v10, %v1010_v6  ;;  %1009 = vst [vmem:[%s1182_s25 + $0x1c] sm:$0xf] %v499_v17  ;;  %v812_v38 = vsel %vm1284_vm7, %v517_v27, %v1015_v23  ;;  %v521_v41 = vrot.slane %v519_v32, 7  ;;  %v186_v23 = vld [vmem:[%s1172_s20 + $0x70] sm:$0xff] }
  0x2d   : > { %1006 = vst [vmem:[%s1182_s25 + $0x14] sm:$0x1] %v798_v13  ;;  %1011 = vst [vmem:[%s1182_s25 + $0x20] sm:$0x1] %v805_v18  ;;  %v527_v42 = vshrl.u32 %v1092_v35, 16  ;;  %v530_v43 = vshll.u32 %v1092_v35, 16  ;;  %v1093_v47 = vpack.c.bf16 %v290_v39, %v290_v39  ;;  %v222_v49 = vmul.f32 %v1167_v0, %v183_v36 }
  0x2e   : > { %1013 = vst [vmem:[%s1182_s25 + $0x24] sm:$0xf] %v808_v31  ;;  %1014 = vst [vmem:[%s1182_s25 + $0x28] sm:$0xf] %v516_v33  ;;  %v291_v48 = vmax.f32 %v259_v40, 0.0  ;;  %v223_v50 = vmul.f32 %v1167_v0, %v184_v37  ;;  %v524_v51 = vor.u32 %v522_v34, %v521_v41  ;;  %v525_v52 = vrot.slane %v521_v41, 4 }
  0x2f   : > { %1016 = vst [vmem:[%s1182_s25 + $0x2c] sm:$0x1] %v812_v38  ;;  %v529_v54 = vrot.slane %v527_v42, 7  ;;  %v260_v55 = vadd.f32 %v1177_v1, %v221_v44  ;;  %v1020_v56 = vld [vmem:[%s1182_s25 + $0x38] sm:$0x1]  ;;  %v536_v58 = vshrl.u32 %v1093_v47, 16  ;;  %v261_v61 = vadd.f32 %v1177_v1, %v222_v49 }
  0x30   : > { %v539_v59 = vshll.u32 %v1093_v47, 16  ;;  %v1094_v60 = vpack.c.bf16 %v291_v48, %v291_v48  ;;  %v815_v62 = vsel %vm1271_vm5, %v524_v51, %v1017_v45  ;;  %v1022_v11 = vld [vmem:[%s1182_s25 + $0x3c] sm:$0xf]  ;;  %v262_v13 = vadd.f32 %v1177_v1, %v223_v50  ;;  %v1025_v18 = vld [vmem:[%s1182_s25 + $0x44] sm:$0x1] }
  0x31   : > { %v532_v63 = vor.u32 %v530_v43, %v529_v54  ;;  %v534_v2 = vrot.slane %v529_v54, 4  ;;  %v292_v3 = vmax.f32 %v260_v55, 0.0  ;;  %1018 = vst [vmem:[%s1182_s25 + $0x30] sm:$0xf] %v815_v62  ;;  %v538_v4 = vrot.slane %v536_v58, 7  ;;  %v187_v33 = vld [vmem:[%s1172_s20 + $0x78] sm:$0xff] }
  0x32   : > { %v544_v5 = vshrl.u32 %v1094_v60, 16  ;;  %v547_v6 = vshll.u32 %v1094_v60, 16  ;;  %v293_v7 = vmax.f32 %v261_v61, 0.0  ;;  %v294_v21 = vmax.f32 %v262_v13, 0.0  ;;  %v1027_v35 = vld [vmem:[%s1182_s25 + $0x48] sm:$0xf] }
  0x33   : > { %v533_v9 = vsel %vm1278_vm6, %v525_v52, %v532_v63  ;;  %v819_v10 = vsel %vm1284_vm7, %v534_v2, %v1020_v56  ;;  %v1095_v12 = vpack.c.bf16 %v292_v3, %v292_v3  ;;  %v541_v14 = vor.u32 %v539_v59, %v538_v4  ;;  %v188_v38 = vld [vmem:[%s1172_s20 + $0x80] sm:$0xff]  ;;  %v1030_v41 = vld [vmem:[%s1182_s25 + $0x50] sm:$0x1]  ;;  %v189_v54 = vld [vmem:[%s1172_s20 + $0x88] sm:$0xff] }
  0x34   : > { %1019 = vst [vmem:[%s1182_s25 + $0x34] sm:$0xf] %v533_v9  ;;  %1021 = vst [vmem:[%s1182_s25 + $0x38] sm:$0x1] %v819_v10  ;;  %v542_v15 = vrot.slane %v538_v4, 4  ;;  %v546_v16 = vrot.slane %v544_v5, 7  ;;  %v1096_v17 = vpack.c.bf16 %v293_v7, %v293_v7  ;;  %v224_v22 = vmul.f32 %v1167_v0, %v185_v8 }
  0x35   : > { %v553_v19 = vshrl.u32 %v1095_v12, 16  ;;  %v556_v20 = vshll.u32 %v1095_v12, 16  ;;  %v822_v24 = vsel %vm1271_vm5, %v541_v14, %v1022_v11  ;;  %v1097_v30 = vpack.c.bf16 %v294_v21, %v294_v21  ;;  %v1032_v58 = vld [vmem:[%s1182_s25 + $0x54] sm:$0xf]  ;;  %v191_v8 = vld [vmem:[%s1172_s20 + $0x98] sm:$0xff] }
  0x36   : > { %v549_v25 = vor.u32 %v547_v6, %v546_v16  ;;  %v551_v26 = vrot.slane %v546_v16, 4  ;;  %v561_v27 = vshrl.u32 %v1096_v17, 16  ;;  %1023 = vst [vmem:[%s1182_s25 + $0x3c] sm:$0xf] %v822_v24  ;;  %v564_v29 = vshll.u32 %v1096_v17, 16  ;;  %v190_v61 = vld [vmem:[%s1172_s20 + $0x90] sm:$0xff] }
  0x37   : > { %v555_v28 = vrot.slane %v553_v19, 7  ;;  %v263_v31 = vadd.f32 %v1177_v1, %v224_v22  ;;  %v225_v37 = vmul.f32 %v1167_v0, %v186_v23  ;;  %v570_v42 = vshrl.u32 %v1097_v30, 16  ;;  %v1035_v17 = vld [vmem:[%s1182_s25 + $0x5c] sm:$0x1] }
  0x38   : > { %v550_v32 = vsel %vm1278_vm6, %v542_v15, %v549_v25  ;;  %v826_v34 = vsel %vm1284_vm7, %v551_v26, %v1025_v18  ;;  %v563_v36 = vrot.slane %v561_v27, 7  ;;  %v573_v43 = vshll.u32 %v1097_v30, 16  ;;  %v192_v26 = vld [vmem:[%s1172_s20 + $0xa0] sm:$0xff]  ;;  %v193_v27 = vld [vmem:[%s1172_s20 + $0xa8] sm:$0xff] }
  0x39   : > { %1024 = vst [vmem:[%s1182_s25 + $0x40] sm:$0xf] %v550_v32  ;;  %1026 = vst [vmem:[%s1182_s25 + $0x44] sm:$0x1] %v826_v34  ;;  %v558_v39 = vor.u32 %v556_v20, %v555_v28  ;;  %v559_v40 = vrot.slane %v555_v28, 4  ;;  %v295_v47 = vmax.f32 %v263_v31, 0.0  ;;  %v264_v48 = vadd.f32 %v1177_v1, %v225_v37 }
  0x3a   : > { %v566_v44 = vor.u32 %v564_v29, %v563_v36  ;;  %v568_v45 = vrot.slane %v563_v36, 4  ;;  %v572_v50 = vrot.slane %v570_v42, 7  ;;  %v226_v51 = vmul.f32 %v1167_v0, %v187_v33  ;;  %v1037_v28 = vld [vmem:[%s1182_s25 + $0x60] sm:$0xf]  ;;  %v1040_v42 = vld [vmem:[%s1182_s25 + $0x68] sm:$0x1] }
  0x3b   : > { %v829_v49 = vsel %vm1271_vm5, %v558_v39, %v1027_v35  ;;  %v227_v52 = vmul.f32 %v1167_v0, %v188_v38  ;;  %v1098_v59 = vpack.c.bf16 %v295_v47, %v295_v47  ;;  %v296_v60 = vmax.f32 %v264_v48, 0.0 }
  0x3c   : > { %1028 = vst [vmem:[%s1182_s25 + $0x48] sm:$0xf] %v829_v49  ;;  %v567_v55 = vsel %vm1278_vm6, %v559_v40, %v566_v44  ;;  %v833_v56 = vsel %vm1284_vm7, %v568_v45, %v1030_v41  ;;  %v575_v62 = vor.u32 %v573_v43, %v572_v50  ;;  %v576_v63 = vrot.slane %v572_v50, 4  ;;  %v1042_v43 = vld [vmem:[%s1182_s25 + $0x6c] sm:$0xf] }
  0x3d   : > { %1029 = vst [vmem:[%s1182_s25 + $0x4c] sm:$0xf] %v567_v55  ;;  %1031 = vst [vmem:[%s1182_s25 + $0x50] sm:$0x1] %v833_v56  ;;  %v265_v2 = vadd.f32 %v1177_v1, %v226_v51  ;;  %v266_v3 = vadd.f32 %v1177_v1, %v227_v52  ;;  %v578_v4 = vshrl.u32 %v1098_v59, 16  ;;  %v581_v5 = vshll.u32 %v1098_v59, 16 }
  0x3e   : > { %v1099_v6 = vpack.c.bf16 %v296_v60, %v296_v60  ;;  %v228_v7 = vmul.f32 %v1167_v0, %v189_v54  ;;  %v836_v9 = vsel %vm1271_vm5, %v575_v62, %v1032_v58  ;;  %v229_v12 = vmul.f32 %v1167_v0, %v190_v61  ;;  %v194_v58 = vld [vmem:[%s1172_s20 + $0xb0] sm:$0xff]  ;;  %v195_v59 = vld [vmem:[%s1172_s20 + $0xb8] sm:$0xff] }
  0x3f   : > { %v297_v10 = vmax.f32 %v265_v2, 0.0  ;;  %v298_v11 = vmax.f32 %v266_v3, 0.0  ;;  %1033 = vst [vmem:[%s1182_s25 + $0x54] sm:$0xf] %v836_v9  ;;  %v580_v13 = vrot.slane %v578_v4, 7  ;;  %v230_v21 = vmul.f32 %v1167_v0, %v191_v8 }
  0x40   : > { %v587_v14 = vshrl.u32 %v1099_v6, 16  ;;  %v590_v15 = vshll.u32 %v1099_v6, 16  ;;  %v267_v16 = vadd.f32 %v1177_v1, %v228_v7  ;;  %v268_v20 = vadd.f32 %v1177_v1, %v229_v12  ;;  %v1045_v6 = vld [vmem:[%s1182_s25 + $0x74] sm:$0x1] }
  0x41   : > { %v1100_v18 = vpack.c.bf16 %v297_v10, %v297_v10  ;;  %v1101_v19 = vpack.c.bf16 %v298_v11, %v298_v11  ;;  %v583_v22 = vor.u32 %v581_v5, %v580_v13  ;;  %v585_v23 = vrot.slane %v580_v13, 4 }
  0x42   : > { %v589_v24 = vrot.slane %v587_v14, 7  ;;  %v299_v25 = vmax.f32 %v267_v16, 0.0  ;;  %v300_v40 = vmax.f32 %v268_v20, 0.0  ;;  %v269_v44 = vadd.f32 %v1177_v1, %v230_v21  ;;  %v196_v20 = vld [vmem:[%s1172_s20 + $0xc0] sm:$0xff] }
  0x43   : > { %v595_v29 = vshrl.u32 %v1100_v18, 16  ;;  %v598_v30 = vshll.u32 %v1100_v18, 16  ;;  %v604_v31 = vshrl.u32 %v1101_v19, 16  ;;  %v607_v32 = vshll.u32 %v1101_v19, 16 }
  0x44   : > { %v584_v34 = vsel %vm1278_vm6, %v576_v63, %v583_v22  ;;  %v840_v35 = vsel %vm1284_vm7, %v585_v23, %v1035_v17  ;;  %v592_v36 = vor.u32 %v590_v15, %v589_v24  ;;  %v593_v37 = vrot.slane %v589_v24, 4  ;;  %v1047_v15 = vld [vmem:[%s1182_s25 + $0x78] sm:$0xf] }
  0x45   : > { %1034 = vst [vmem:[%s1182_s25 + $0x58] sm:$0xf] %v584_v34  ;;  %1036 = vst [vmem:[%s1182_s25 + $0x5c] sm:$0x1] %v840_v35  ;;  %v597_v33 = vrot.slane %v595_v29, 7  ;;  %v606_v38 = vrot.slane %v604_v31, 7  ;;  %v1102_v39 = vpack.c.bf16 %v299_v25, %v299_v25  ;;  %v231_v45 = vmul.f32 %v1167_v0, %v192_v26 }
  0x46   : > { %v843_v41 = vsel %vm1271_vm5, %v592_v36, %v1037_v28  ;;  %v232_v47 = vmul.f32 %v1167_v0, %v193_v27  ;;  %v1103_v55 = vpack.c.bf16 %v300_v40, %v300_v40  ;;  %v301_v56 = vmax.f32 %v269_v44, 0.0  ;;  %v198_v44 = vld [vmem:[%s1172_s20 + $0xd0] sm:$0xff] }
  0x47   : > { %1038 = vst [vmem:[%s1182_s25 + $0x60] sm:$0xf] %v843_v41  ;;  %v600_v48 = vor.u32 %v598_v30, %v597_v33  ;;  %v602_v49 = vrot.slane %v597_v33, 4  ;;  %v609_v50 = vor.u32 %v607_v32, %v606_v38  ;;  %v610_v51 = vrot.slane %v606_v38, 4  ;;  %v1050_v30 = vld [vmem:[%s1182_s25 + $0x80] sm:$0x1] }
  0x48   : > { %v612_v52 = vshrl.u32 %v1102_v39, 16  ;;  %v615_v54 = vshll.u32 %v1102_v39, 16  ;;  %v270_v63 = vadd.f32 %v1177_v1, %v231_v45  ;;  %v621_v3 = vshrl.u32 %v1103_v55, 16  ;;  %v1052_v38 = vld [vmem:[%s1182_s25 + $0x84] sm:$0xf] }
  0x49   : > { %v601_v60 = vsel %vm1278_vm6, %v593_v37, %v600_v48  ;;  %v847_v61 = vsel %vm1284_vm7, %v602_v49, %v1040_v42  ;;  %v850_v62 = vsel %vm1271_vm5, %v609_v50, %v1042_v43  ;;  %v624_v4 = vshll.u32 %v1103_v55, 16  ;;  %v197_v43 = vld [vmem:[%s1172_s20 + $0xc8] sm:$0xff] }
  0x4a   : > { %1039 = vst [vmem:[%s1182_s25 + $0x64] sm:$0xf] %v601_v60  ;;  %1041 = vst [vmem:[%s1182_s25 + $0x68] sm:$0x1] %v847_v61  ;;  %v614_v2 = vrot.slane %v612_v52, 7  ;;  %v1104_v5 = vpack.c.bf16 %v301_v56, %v301_v56  ;;  %v302_v7 = vmax.f32 %v270_v63, 0.0  ;;  %v271_v8 = vadd.f32 %v1177_v1, %v232_v47 }
  0x4b   : > { %1043 = vst [vmem:[%s1182_s25 + $0x6c] sm:$0xf] %v850_v62  ;;  %v233_v9 = vmul.f32 %v1167_v0, %v194_v58  ;;  %v234_v10 = vmul.f32 %v1167_v0, %v195_v59  ;;  %v623_v13 = vrot.slane %v621_v3, 7  ;;  %v235_v34 = vmul.f32 %v1167_v0, %v196_v20  ;;  %v1055_v56 = vld [vmem:[%s1182_s25 + $0x8c] sm:$0x1] }
  0x4c   : > { %v617_v11 = vor.u32 %v615_v54, %v614_v2  ;;  %v619_v12 = vrot.slane %v614_v2, 4  ;;  %v629_v14 = vshrl.u32 %v1104_v5, 16  ;;  %v632_v16 = vshll.u32 %v1104_v5, 16  ;;  %v1057_v3 = vld [vmem:[%s1182_s25 + $0x90] sm:$0xf] }
  0x4d   : > { %v1105_v17 = vpack.c.bf16 %v302_v7, %v302_v7  ;;  %v303_v18 = vmax.f32 %v271_v8, 0.0  ;;  %v272_v19 = vadd.f32 %v1177_v1, %v233_v9  ;;  %v626_v23 = vor.u32 %v624_v4, %v623_v13  ;;  %v199_v8 = vld [vmem:[%s1172_s20 + $0xd8] sm:$0xff]  ;;  %v200_v9 = vld [vmem:[%s1172_s20 + $0xe0] sm:$0xff] }
  0x4e   : > { %v618_v21 = vsel %vm1278_vm6, %v610_v51, %v617_v11  ;;  %v854_v22 = vsel %vm1284_vm7, %v619_v12, %v1045_v6  ;;  %v627_v24 = vrot.slane %v623_v13, 4  ;;  %v631_v25 = vrot.slane %v629_v14, 7  ;;  %v1060_v20 = vld [vmem:[%s1182_s25 + $0x98] sm:$0x1] }
  0x4f   : > { %1044 = vst [vmem:[%s1182_s25 + $0x70] sm:$0xf] %v618_v21  ;;  %1046 = vst [vmem:[%s1182_s25 + $0x74] sm:$0x1] %v854_v22  ;;  %v638_v26 = vshrl.u32 %v1105_v17, 16  ;;  %v641_v27 = vshll.u32 %v1105_v17, 16  ;;  %v1106_v28 = vpack.c.bf16 %v303_v18, %v303_v18  ;;  %v857_v29 = vsel %vm1271_vm5, %v626_v23, %v1047_v15 }
  0x50   : > { %v304_v31 = vmax.f32 %v272_v19, 0.0  ;;  %v273_v32 = vadd.f32 %v1177_v1, %v234_v10  ;;  %1048 = vst [vmem:[%s1182_s25 + $0x78] sm:$0xf] %v857_v29  ;;  %v634_v35 = vor.u32 %v632_v16, %v631_v25  ;;  %v636_v36 = vrot.slane %v631_v25, 4  ;;  %v201_v18 = vld [vmem:[%s1172_s20 + $0xe8] sm:$0xff] }
  0x51   : > { %v640_v37 = vrot.slane %v638_v26, 7  ;;  %v646_v33 = vshrl.u32 %v1106_v28, 16  ;;  %v649_v39 = vshll.u32 %v1106_v28, 16  ;;  %v274_v42 = vadd.f32 %v1177_v1, %v235_v34  ;;  %v1062_v28 = vld [vmem:[%s1182_s25 + $0x9c] sm:$0xf] }
  0x52   : > { %v1107_v40 = vpack.c.bf16 %v304_v31, %v304_v31  ;;  %v305_v41 = vmax.f32 %v273_v32, 0.0  ;;  %v635_v45 = vsel %vm1278_vm6, %v627_v24, %v634_v35  ;;  %v861_v47 = vsel %vm1284_vm7, %v636_v36, %v1050_v30 }
  0x53   : > { %v643_v48 = vor.u32 %v641_v27, %v640_v37  ;;  %v644_v49 = vrot.slane %v640_v37, 4  ;;  %1049 = vst [vmem:[%s1182_s25 + $0x7c] sm:$0xf] %v635_v45  ;;  %1051 = vst [vmem:[%s1182_s25 + $0x80] sm:$0x1] %v861_v47  ;;  %v648_v50 = vrot.slane %v646_v33, 7  ;;  %v236_v59 = vmul.f32 %v1167_v0, %v197_v43 }
  0x54   : > { %v655_v51 = vshrl.u32 %v1107_v40, 16  ;;  %v658_v52 = vshll.u32 %v1107_v40, 16  ;;  %v1108_v54 = vpack.c.bf16 %v305_v41, %v305_v41  ;;  %v306_v58 = vmax.f32 %v274_v42, 0.0  ;;  %v202_v37 = vld [vmem:[%s1172_s20 + $0xf0] sm:$0xff]  ;;  %v203_v41 = vld [vmem:[%s1172_s20 + $0xf8] sm:$0xff] }
  0x55   : > { %v864_v55 = vsel %vm1271_vm5, %v643_v48, %v1052_v38  ;;  %v237_v60 = vmul.f32 %v1167_v0, %v198_v44  ;;  %v651_v61 = vor.u32 %v649_v39, %v648_v50  ;;  %v653_v62 = vrot.slane %v648_v50, 4 }
  0x56   : > { %1053 = vst [vmem:[%s1182_s25 + $0x84] sm:$0xf] %v864_v55  ;;  %v657_v63 = vrot.slane %v655_v51, 7  ;;  %v663_v2 = vshrl.u32 %v1108_v54, 16  ;;  %v666_v4 = vshll.u32 %v1108_v54, 16  ;;  %v1109_v5 = vpack.c.bf16 %v306_v58, %v306_v58 }
  0x57   : > { %v275_v6 = vadd.f32 %v1177_v1, %v236_v59  ;;  %v276_v7 = vadd.f32 %v1177_v1, %v237_v60  ;;  %v652_v10 = vsel %vm1278_vm6, %v644_v49, %v651_v61  ;;  %v868_v11 = vsel %vm1284_vm7, %v653_v62, %v1055_v56  ;;  %v1065_v51 = vld [vmem:[%s1182_s25 + $0xa4] sm:$0x1] }
  0x58   : > { %v660_v12 = vor.u32 %v658_v52, %v657_v63  ;;  %v661_v13 = vrot.slane %v657_v63, 4  ;;  %1054 = vst [vmem:[%s1182_s25 + $0x88] sm:$0xf] %v652_v10  ;;  %1056 = vst [vmem:[%s1182_s25 + $0x8c] sm:$0x1] %v868_v11  ;;  %v665_v14 = vrot.slane %v663_v2, 7  ;;  %v238_v22 = vmul.f32 %v1167_v0, %v199_v8 }
  0x59   : > { %v672_v15 = vshrl.u32 %v1109_v5, 16  ;;  %v675_v16 = vshll.u32 %v1109_v5, 16  ;;  %v307_v17 = vmax.f32 %v275_v6, 0.0  ;;  %v308_v21 = vmax.f32 %v276_v7, 0.0  ;;  %v1067_v52 = vld [vmem:[%s1182_s25 + $0xa8] sm:$0xf] }
  0x5a   : > { %v871_v19 = vsel %vm1271_vm5, %v660_v12, %v1057_v3  ;;  %v239_v23 = vmul.f32 %v1167_v0, %v200_v9  ;;  %v668_v24 = vor.u32 %v666_v4, %v665_v14  ;;  %v670_v25 = vrot.slane %v665_v14, 4  ;;  %v1070_v12 = vld [vmem:[%s1182_s25 + $0xb0] sm:$0x1] }
  0x5b   : > { %1058 = vst [vmem:[%s1182_s25 + $0x90] sm:$0xf] %v871_v19  ;;  %v674_v26 = vrot.slane %v672_v15, 7  ;;  %v1110_v27 = vpack.c.bf16 %v307_v17, %v307_v17  ;;  %v1111_v29 = vpack.c.bf16 %v308_v21, %v308_v21  ;;  %v277_v30 = vadd.f32 %v1177_v1, %v238_v22 }
  0x5c   : > { %v278_v31 = vadd.f32 %v1177_v1, %v239_v23  ;;  %v240_v32 = vmul.f32 %v1167_v0, %v201_v18  ;;  %v669_v34 = vsel %vm1278_vm6, %v661_v13, %v668_v24  ;;  %v875_v35 = vsel %vm1284_vm7, %v670_v25, %v1060_v20  ;;  %v1072_v13 = vld [vmem:[%s1182_s25 + $0xb4] sm:$0xf]  ;;  %v1075_v25 = vld [vmem:[%s1182_s25 + $0xbc] sm:$0x1] }
  0x5d   : > { %v677_v36 = vor.u32 %v675_v16, %v674_v26  ;;  %1059 = vst [vmem:[%s1182_s25 + $0x94] sm:$0xf] %v669_v34  ;;  %1061 = vst [vmem:[%s1182_s25 + $0x98] sm:$0x1] %v875_v35  ;;  %v680_v33 = vshrl.u32 %v1110_v27, 16  ;;  %v683_v38 = vshll.u32 %v1110_v27, 16  ;;  %v241_v50 = vmul.f32 %v1167_v0, %v202_v37 }
  0x5e   : > { %v689_v39 = vshrl.u32 %v1111_v29, 16  ;;  %v692_v40 = vshll.u32 %v1111_v29, 16  ;;  %v309_v43 = vmax.f32 %v277_v30, 0.0  ;;  %v310_v44 = vmax.f32 %v278_v31, 0.0 }
  0x5f   : > { %v878_v42 = vsel %vm1271_vm5, %v677_v36, %v1062_v28  ;;  %v279_v45 = vadd.f32 %v1177_v1, %v240_v32  ;;  %v678_v47 = vrot.slane %v674_v26, 4  ;;  %v682_v48 = vrot.slane %v680_v33, 7  ;;  %v1077_v33 = vld [vmem:[%s1182_s25 + $0xc0] sm:$0xf] }
  0x60   : > { %1063 = vst [vmem:[%s1182_s25 + $0x9c] sm:$0xf] %v878_v42  ;;  %v691_v49 = vrot.slane %v689_v39, 7  ;;  %v1112_v54 = vpack.c.bf16 %v309_v43, %v309_v43  ;;  %v1113_v55 = vpack.c.bf16 %v310_v44, %v310_v44  ;;  %v242_v58 = vmul.f32 %v1167_v0, %v203_v41  ;;  %v1080_v41 = vld [vmem:[%s1182_s25 + $0xc8] sm:$0x1] }
  0x61   : > { %v311_v56 = vmax.f32 %v279_v45, 0.0  ;;  %v685_v59 = vor.u32 %v683_v38, %v682_v48  ;;  %v687_v60 = vrot.slane %v682_v48, 4  ;;  %v280_v10 = vadd.f32 %v1177_v1, %v241_v50 }
  0x62   : > { %v694_v61 = vor.u32 %v692_v40, %v691_v49  ;;  %v695_v62 = vrot.slane %v691_v49, 4  ;;  %v697_v63 = vshrl.u32 %v1112_v54, 16  ;;  %v700_v2 = vshll.u32 %v1112_v54, 16 }
  0x63   : > { %v706_v3 = vshrl.u32 %v1113_v55, 16  ;;  %v709_v4 = vshll.u32 %v1113_v55, 16  ;;  %v686_v5 = vsel %vm1278_vm6, %v678_v47, %v685_v59  ;;  %v882_v6 = vsel %vm1284_vm7, %v687_v60, %v1065_v51 }
  0x64   : > { %v885_v7 = vsel %vm1271_vm5, %v694_v61, %v1067_v52  ;;  %v1114_v0 = vpack.c.bf16 %v311_v56, %v311_v56  ;;  %1064 = vst [vmem:[%s1182_s25 + $0xa0] sm:$0xf] %v686_v5  ;;  %1066 = vst [vmem:[%s1182_s25 + $0xa4] sm:$0x1] %v882_v6  ;;  %v699_v8 = vrot.slane %v697_v63, 7  ;;  %v281_v11 = vadd.f32 %v1177_v1, %v242_v58 }
  0x65   : > { %1068 = vst [vmem:[%s1182_s25 + $0xa8] sm:$0xf] %v885_v7  ;;  %v708_v9 = vrot.slane %v706_v3, 7  ;;  %v312_v21 = vmax.f32 %v280_v10, 0.0 }
  0x66   : > { %v714_v14 = vshrl.u32 %v1114_v0, 16  ;;  %v717_v15 = vshll.u32 %v1114_v0, 16  ;;  %v702_v16 = vor.u32 %v700_v2, %v699_v8  ;;  %v704_v17 = vrot.slane %v699_v8, 4 }
  0x67   : > { %v711_v18 = vor.u32 %v709_v4, %v708_v9  ;;  %v712_v19 = vrot.slane %v708_v9, 4  ;;  %v313_v22 = vmax.f32 %v281_v11, 0.0  ;;  %v1115_v28 = vpack.c.bf16 %v312_v21, %v312_v21 }
  0x68   : > { %v716_v20 = vrot.slane %v714_v14, 7  ;;  %v703_v23 = vsel %vm1278_vm6, %v695_v62, %v702_v16  ;;  %v889_v1 = vsel %vm1284_vm7, %v704_v17, %v1070_v12 }
  0x69   : > { %v892_v24 = vsel %vm1271_vm5, %v711_v18, %v1072_v13  ;;  %1069 = vst [vmem:[%s1182_s25 + $0xac] sm:$0xf] %v703_v23  ;;  %1071 = vst [vmem:[%s1182_s25 + $0xb0] sm:$0x1] %v889_v1  ;;  %v1116_v29 = vpack.c.bf16 %v313_v22, %v313_v22  ;;  %v723_v32 = vshrl.u32 %v1115_v28, 16  ;;  %v726_v34 = vshll.u32 %v1115_v28, 16 }
  0x6a   : > { %1073 = vst [vmem:[%s1182_s25 + $0xb4] sm:$0xf] %v892_v24  ;;  %v719_v26 = vor.u32 %v717_v15, %v716_v20  ;;  %v721_v27 = vrot.slane %v716_v20, 4 }
  0x6b   : > { %v731_v35 = vshrl.u32 %v1116_v29, 16  ;;  %v734_v36 = vshll.u32 %v1116_v29, 16  ;;  %v725_v37 = vrot.slane %v723_v32, 7 }
  0x6c   : > { %v720_v30 = vsel %vm1278_vm6, %v712_v19, %v719_v26  ;;  %v896_v31 = vsel %vm1284_vm7, %v721_v27, %v1075_v25 }
  0x6d   : > { %1074 = vst [vmem:[%s1182_s25 + $0xb8] sm:$0xf] %v720_v30  ;;  %1076 = vst [vmem:[%s1182_s25 + $0xbc] sm:$0x1] %v896_v31  ;;  %v733_v38 = vrot.slane %v731_v35, 7  ;;  %v728_v39 = vor.u32 %v726_v34, %v725_v37  ;;  %v729_v40 = vrot.slane %v725_v37, 4 }
  0x6f   : > { %v736_v42 = vor.u32 %v734_v36, %v733_v38  ;;  %v738_v43 = vrot.slane %v733_v38, 4  ;;  %v899_v44 = vsel %vm1271_vm5, %v728_v39, %v1077_v33 }
  0x70   : > { %1078 = vst [vmem:[%s1182_s25 + $0xc0] sm:$0xf] %v899_v44 }
  0x71   : > { %v737_v45 = vsel %vm1278_vm6, %v729_v40, %v736_v42  ;;  %v903_v47 = vsel %vm1284_vm7, %v738_v43, %v1080_v41 }
  0x72   : > { %1079 = vst [vmem:[%s1182_s25 + $0xc4] sm:$0xf] %v737_v45  ;;  %1081 = vst [vmem:[%s1182_s25 + $0xc8] sm:$0x1] %v903_v47 }
  0x73 PF: > { %s13_s12 = sadd.s32 1, %s1133_s12  }
  0x74   : > { %p10_p4 = scmp.ge.s32.totalorder %s13_s12, 4  }
  0x76   :  { %12 = sbr.rel (!%p10_p4) target bundleno = 1 (0x1), region = 63 }

// kernel: closed_call.29
= control target key start
LH: loop header
LB: loop body
LE: loop exit
PB: predicated region body
PF: predicated region fallthrough
CT: control target
= control target key end

     0   :  { %s4639_s12 = smov 0   ;;  %s6116_s0 = inlined_call_operand.vmem [shape: bf16[2,18,18,128], index: 0, kind: input, shape index: {}]   ;;  %s6117_s1 = inlined_call_operand.vmem [shape: bf16[3,3,128,128], index: 1, kind: input, shape index: {}]   ;;  %s6118_s2 = inlined_call_operand.vmem [shape: f32[2,16,16,128], index: 2, kind: output, shape index: {0}]   ;;  %s6119_s3 = inlined_call_operand.vmem [shape: f32[2,2,128], index: 3, kind: output, shape index: {1}]  }
   0x1 LB: > { %s3555_s13 = sadd.s32 4294967295, %s4617_s12   ;;  %p3559_p0 = scmp.ge.s32.totalorder %s4617_s12, 1  ;;  %s4617_s12 = sphi %s4639_s12, %s14_s12  }
   0x2   : > { %p140_p1 = scmp.lt.s32.totalorder %s4617_s12, 3 }
   0x4   : > { %p141_p2 = pnand %p3559_p0, %p140_p1 }
   0x6   : > { %144 = sbr.rel (%p141_p2) target bundleno = 575 (0x23f), region = 28 }
   0xb   : > { %v4512_v0 = vld [vmem:[%s6117_s1 + $0x78] sm:$0xff]   ;;  %p168_p3 = scmp.lt.s32.totalorder %s3555_s13, 1  ;;  %v4513_v1 = vld [vmem:[%s6117_s1 + $0x70] sm:$0xff]   ;;  %v4514_v2 = vld [vmem:[%s6117_s1 + $0x68] sm:$0xff]   ;;  %vm253_vm0 = vsmask.f32 3328 }
   0xc   : > { %4055 = vmatprep.subr.bf16.mxu0 %v4512_v0  ;;  %4487 = vmatprep.subr.bf16.mxu1 %v4512_v0  ;;  %v4515_v3 = vld [vmem:[%s6117_s1 + $0x60] sm:$0xff]   ;;  %vm254_vm1 = vsmask.f32 7440  ;;  %v4516_v9 = vld [vmem:[%s6117_s1 + $0x58] sm:$0xff]   ;;  %v4517_v28 = vld [vmem:[%s6117_s1 + $0x50] sm:$0xff]   ;;  %v6156_v29 = vmov 0 }
   0xd   : > { %s6303_s13 = smov (!%p168_p3, %s3555_s13), 1  ;;  %4056 = vmatpush3.bf16.msra.mxu0 %v4512_v0  ;;  %4495 = vmatpush3.bf16.msra.mxu1 %v4512_v0  ;;  %vm4696_vm2 = vmor %vm253_vm0, %vm254_vm1  ;;  %v4518_v59 = vld [vmem:[%s6117_s1 + $0x48] sm:$0xff]   ;;  %vm1251_vm3 = vcmask 1042432   ;;  %vm1252_vm4 = vcmask 1046532   ;;  %vm3466_vm6 = vcmask 1040384  }
   0xe   : > { %4057 = vmatprep.subr.bf16.mxu0 %v4513_v1  ;;  %4488 = vmatprep.subr.bf16.mxu1 %v4513_v1  ;;  %s4503_s20 = smul.u32 216, %s6303_s13  ;;  %v6157_v29 = vsel %vm4696_vm2, 4294967295, %v6156_v29  ;;  %vm5042_vm5 = vmor %vm1251_vm3, %vm1252_vm4 }
   0xf   : > { %6158 = vst [vmem:[#allocation2_spill] sm:$0xff] %v6157_v29 }
  0x10   : > { %s4662_s23 = scalar_lea.vmem %s6116_s0, %s4503_s20  ;;  %s3563_s20 = sshll.u32 %s6303_s13, 1 }
  0x11   : > { %4058 = vmatpush3.bf16.msra.mxu0 %v4513_v1  ;;  %4496 = vmatpush3.bf16.msra.mxu1 %v4513_v1  ;;  %v4668_v4 = vld [vmem:[%s4662_s23] sm:$0xf]  ;;  %v4671_v5 = vld [vmem:[%s4662_s23 + $0x4] sm:$0xf]  ;;  %v4674_v6 = vld [vmem:[%s4662_s23 + $0x8] sm:$0x1]  ;;  %s181_s24 = scalar_lea.vmem %s6119_s3, %s3563_s20 }
  0x12   : > { %4059 = vmatprep.subr.bf16.mxu0 %v4514_v2  ;;  %4489 = vmatprep.subr.bf16.mxu1 %v4514_v2  ;;  %v257_v7 = vshrl.u32 %v4668_v4, 16  ;;  %v260_v8 = vshll.u32 %v4668_v4, 16  ;;  %v266_v10 = vshll.u32 %v4671_v5, 16  ;;  %v270_v11 = vshrl.u32 %v4671_v5, 16  ;;  %v207_v14 = vld [vmem:[%s4662_s23 + $0x60] sm:$0xf] }
  0x13   : > { %v276_v12 = vshll.u32 %v4674_v6, 16  ;;  %v208_v17 = vld [vmem:[%s4662_s23 + $0x64] sm:$0xf]  ;;  %v209_v18 = vld [vmem:[%s4662_s23 + $0x68] sm:$0x1]  ;;  %v449_v22 = vshrl.u32 %v207_v14, 16 }
  0x14   : > { %v259_v15 = vrot.slane %v257_v7, 4  ;;  %v262_v16 = vrot.slane %v260_v8, 5  ;;  %v268_v19 = vrot.slane %v266_v10, 5  ;;  %v272_v20 = vrot.slane %v270_v11, 4  ;;  %v4689_v23 = vld [vmem:[%s4662_s23 + $0xc] sm:$0xf] }
  0x15   : > { %4060 = vmatpush3.bf16.msra.mxu0 %v4514_v2  ;;  %4497 = vmatpush3.bf16.msra.mxu1 %v4514_v2  ;;  %v278_v21 = vrot.slane %v276_v12, 5  ;;  %v452_v25 = vshll.u32 %v207_v14, 16  ;;  %v458_v26 = vshll.u32 %v208_v17, 16  ;;  %v462_v27 = vshrl.u32 %v208_v17, 16  ;;  %v4701_v33 = vld [vmem:[%s4662_s23 + $0x10] sm:$0xf] }
  0x16   : > { %4061 = vmatprep.subr.bf16.mxu0 %v4515_v3  ;;  %4490 = vmatprep.subr.bf16.mxu1 %v4515_v3  ;;  %v263_v24 = vor.u32 %v262_v16, %v259_v15  ;;  %v273_v30 = vor.u32 %v272_v20, %v268_v19  ;;  %v451_v31 = vrot.slane %v449_v22, 4  ;;  %v468_v32 = vshll.u32 %v209_v18, 16  ;;  %v4705_v39 = vld [vmem:[%s4662_s23 + $0x14] sm:$0x1]  ;;  %v210_v44 = vld [vmem:[%s4662_s23 + $0x6c] sm:$0xf] }
  0x17   : > { %v281_v34 = vshrl.u32 %v4689_v23, 16  ;;  %v454_v36 = vrot.slane %v452_v25, 5  ;;  %v460_v37 = vrot.slane %v458_v26, 5  ;;  %v464_v38 = vrot.slane %v462_v27, 4  ;;  %v211_v49 = vld [vmem:[%s4662_s23 + $0x70] sm:$0xf] }
  0x18   : > { %v264_v35 = vrot.slane %v263_v24, 4  ;;  %v274_v40 = vrot.slane %v273_v30, 4  ;;  %v470_v41 = vrot.slane %v468_v32, 5  ;;  %v284_v43 = vshll.u32 %v4689_v23, 16  ;;  %v212_v54 = vld [vmem:[%s4662_s23 + $0x74] sm:$0x1] }
  0x19   : > { %4062 = vmatpush3.bf16.msra.mxu0 %v4515_v3  ;;  %4498 = vmatpush3.bf16.msra.mxu1 %v4515_v3  ;;  %v283_v42 = vrot.slane %v281_v34, 4  ;;  %v455_v46 = vor.u32 %v454_v36, %v451_v31  ;;  %v465_v47 = vor.u32 %v464_v38, %v460_v37  ;;  %v290_v48 = vshll.u32 %v4701_v33, 16  ;;  %v4729_v16 = vld [vmem:[%s4662_s23 + $0x18] sm:$0xf]  ;;  %v4519_v17 = vld [vmem:[%s6117_s1 + $0x40] sm:$0xff]  }
  0x1a   : > { %4063 = vmatprep.subr.bf16.mxu0 %v4516_v9  ;;  %4491 = vmatprep.subr.bf16.mxu1 %v4516_v9  ;;  %v269_v45 = vsel %vm4696_vm2, %v264_v35, %v268_v19  ;;  %v279_v50 = vsel %vm4696_vm2, %v274_v40, %v278_v21  ;;  %v286_v51 = vrot.slane %v284_v43, 5  ;;  %v294_v52 = vshrl.u32 %v4701_v33, 16  ;;  %v4737_v21 = vld [vmem:[%s4662_s23 + $0x1c] sm:$0xf]  ;;  %v4745_v27 = vld [vmem:[%s4662_s23 + $0x20] sm:$0x1] }
  0x1b   : > { %v300_v53 = vshll.u32 %v4705_v39, 16  ;;  %v3580_v55 = vcombine.low %v269_v45, %v279_v50  ;;  %v456_v56 = vrot.slane %v455_v46, 4  ;;  %v466_v57 = vrot.slane %v465_v47, 4  ;;  %v213_v35 = vld [vmem:[%s4662_s23 + $0x78] sm:$0xf] }
  0x1c   : > { %v292_v58 = vrot.slane %v290_v48, 5  ;;  %v287_v60 = vor.u32 %v286_v51, %v283_v42  ;;  %v296_v61 = vrot.slane %v294_v52, 4  ;;  %v473_v2 = vshrl.u32 %v210_v44, 16  ;;  %v4520_v42 = vld [vmem:[%s6117_s1 + $0x38] sm:$0xff]  }
  0x1d   : > { %4064 = vmatpush3.bf16.msra.mxu0 %v4516_v9  ;;  %4499 = vmatpush3.bf16.msra.mxu1 %v4516_v9  ;;  %v302_v62 = vrot.slane %v300_v53, 5  ;;  %v461_v0 = vsel %vm4696_vm2, %v456_v56, %v460_v37  ;;  %v471_v1 = vsel %vm4696_vm2, %v466_v57, %v470_v41  ;;  %v476_v3 = vshll.u32 %v210_v44, 16  ;;  %v4757_v41 = vld [vmem:[%s4662_s23 + $0x7c] sm:$0xf]  ;;  %v4771_v57 = vld [vmem:[%s4662_s23 + $0x24] sm:$0xf] }
  0x1e   : > { %4065 = vmatprep.subr.bf16.mxu0 %v4517_v28  ;;  %4492 = vmatprep.subr.bf16.mxu1 %v4517_v28  ;;  %v4726_v7 = vcombine.low %v461_v0, %v471_v1  ;;  %v288_v8 = vrot.slane %v287_v60, 4  ;;  %v297_v9 = vor.u32 %v296_v61, %v292_v58  ;;  %v482_v10 = vshll.u32 %v211_v49, 16  ;;  %v4521_v43 = vld [vmem:[%s6117_s1 + $0xb8] sm:$0xff]   ;;  %v4780_v0 = vld [vmem:[%s4662_s23 + $0x28] sm:$0xf] }
  0x1f   : > { %4071 = vmatprep.mubr.bf16.mxu0 %v3580_v55  ;;  %v475_v11 = vrot.slane %v473_v2, 4  ;;  %v478_v12 = vrot.slane %v476_v3, 5  ;;  %v486_v14 = vshrl.u32 %v211_v49, 16  ;;  %v492_v15 = vshll.u32 %v212_v54, 16  ;;  %v215_v55 = vld [vmem:[%s4662_s23 + $0x80] sm:$0x1] }
  0x20   : > { %6159 = vst [vmem:[#allocation3_spill] sm:$0xff] %v4726_v7  ;;  %v293_v18 = vsel %vm4696_vm2, %v288_v8, %v292_v58  ;;  %v298_v19 = vrot.slane %v297_v9, 4  ;;  %v484_v20 = vrot.slane %v482_v10, 5  ;;  %v4741_v22 = vcombine.low %v4689_v23, %v4701_v33  ;;  %4087 = vmatprep.mubr.bf16.mxu1 %v4726_v7  ;;  %v4523_v2 = vld [vmem:[%s6117_s1 + $0xb0] sm:$0xff]   ;;  %v4788_v10 = vld [vmem:[%s4662_s23 + $0x2c] sm:$0x1] }
  0x21   : > { %4066 = vmatpush3.bf16.msra.mxu0 %v4517_v28  ;;  %4500 = vmatpush3.bf16.msra.mxu1 %v4517_v28  ;;  %v479_v24 = vor.u32 %v478_v12, %v475_v11  ;;  %v488_v25 = vrot.slane %v486_v14, 4  ;;  %v494_v26 = vrot.slane %v492_v15, 5  ;;  %v305_v28 = vshrl.u32 %v4729_v16, 16  ;;  %v4791_v11 = vld [vmem:[%s4662_s23 + $0x84] sm:$0xf] }
  0x22   : > { %4067 = vmatprep.subr.bf16.mxu0 %v4518_v59  ;;  %4493 = vmatprep.subr.bf16.mxu1 %v4518_v59  ;;  %v303_v30 = vsel %vm4696_vm2, %v298_v19, %v302_v62  ;;  %v308_v31 = vshll.u32 %v4729_v16, 16  ;;  %v314_v32 = vshll.u32 %v4737_v21, 16  ;;  %v318_v34 = vshrl.u32 %v4737_v21, 16 }
  0x23   : > { %v4754_v36 = vcombine.low %v293_v18, %v303_v30  ;;  %v480_v37 = vrot.slane %v479_v24, 4  ;;  %v489_v38 = vor.u32 %v488_v25, %v484_v20  ;;  %v307_v40 = vrot.slane %v305_v28, 4  ;;  %v4795_v18 = vld [vmem:[%s4662_s23 + $0x88] sm:$0xf] }
  0x24   : > { %v310_v44 = vrot.slane %v308_v31, 5  ;;  %v316_v45 = vrot.slane %v314_v32, 5  ;;  %v320_v46 = vrot.slane %v318_v34, 4  ;;  %v324_v47 = vshll.u32 %v4745_v27, 16  ;;  %v4525_v28 = vld [vmem:[%s6117_s1 + $0xa8] sm:$0xff]  }
  0x25   : > { %4068 = vmatpush3.bf16.msra.mxu0 %v4518_v59  ;;  %4501 = vmatpush3.bf16.msra.mxu1 %v4518_v59  ;;  %6160 = vst [vmem:[#allocation4_spill] sm:$0xff] %v4754_v36  ;;  %v485_v48 = vsel %vm4696_vm2, %v480_v37, %v484_v20  ;;  %v490_v49 = vrot.slane %v489_v38, 4  ;;  %v497_v50 = vshrl.u32 %v213_v35, 16  ;;  %v500_v51 = vshll.u32 %v213_v35, 16  ;;  %v4522_v59 = vld [vmem:[%s6117_s1 + $0x30] sm:$0xff]  }
  0x26   : > { %4069 = vmatprep.subr.bf16.mxu0 %v4519_v17  ;;  %4494 = vmatprep.subr.bf16.mxu1 %v4519_v17  ;;  %v311_v52 = vor.u32 %v310_v44, %v307_v40  ;;  %v321_v53 = vor.u32 %v320_v46, %v316_v45  ;;  %v326_v54 = vrot.slane %v324_v47, 5  ;;  %v506_v56 = vshll.u32 %v4757_v41, 16  ;;  %v4815_v44 = vld [vmem:[%s4662_s23 + $0x8c] sm:$0x1] }
  0x27   : > { %v495_v58 = vsel %vm4696_vm2, %v490_v49, %v494_v26  ;;  %v499_v60 = vrot.slane %v497_v50, 4  ;;  %v502_v61 = vrot.slane %v500_v51, 5  ;;  %v510_v62 = vshrl.u32 %v4757_v41, 16  ;;  %v4524_v26 = vld [vmem:[%s6117_s1 + $0x28] sm:$0xff]   ;;  %v4825_v51 = vld [vmem:[%s4662_s23 + $0x30] sm:$0xf] }
  0x28   : > { %v4782_v1 = vcombine.low %v485_v48, %v495_v58  ;;  %v312_v3 = vrot.slane %v311_v52, 4  ;;  %v322_v8 = vrot.slane %v321_v53, 4  ;;  %v508_v9 = vrot.slane %v506_v56, 5 }
  0x29   : > { %4070 = vmatpush3.bf16.msra.mxu0 %v4519_v17  ;;  %4502 = vmatpush3.bf16.msra.mxu1 %v4519_v17  ;;  %v503_v12 = vor.u32 %v502_v61, %v499_v60  ;;  %v512_v14 = vrot.slane %v510_v62, 4  ;;  %v516_v15 = vshll.u32 %v215_v55, 16  ;;  %v329_v17 = vshrl.u32 %v4771_v57, 16  ;;  %v4527_v62 = vld [vmem:[%s6117_s1 + $0xa0] sm:$0xff]  }
  0x2a   : > { %6161 = vst [vmem:[#allocation5_spill] sm:$0xff] %v4782_v1  ;;  %4103 = vmatprep.subr.bf16.mxu1 %v4520_v42  ;;  %4151 = vmatprep.subr.bf16.mxu0 %v4521_v43  ;;  %v317_v19 = vsel %vm4696_vm2, %v312_v3, %v316_v45  ;;  %v327_v20 = vsel %vm4696_vm2, %v322_v8, %v326_v54  ;;  %v332_v24 = vshll.u32 %v4771_v57, 16  ;;  %v338_v25 = vshll.u32 %v4780_v0, 16 }
  0x2b   : > { %v4811_v30 = vcombine.low %v317_v19, %v327_v20  ;;  %v504_v31 = vrot.slane %v503_v12, 4  ;;  %v513_v32 = vor.u32 %v512_v14, %v508_v9  ;;  %v518_v34 = vrot.slane %v516_v15, 5  ;;  %v4847_v19 = vld [vmem:[%s4662_s23 + $0x38] sm:$0x1] }
  0x2c   : > { %4072 = vmatmul.mubr.bf16.vlgmr.msra.gmra.mxu0 %v4754_v36  ;;  %4088 = vmatmul.mubr.bf16.vlgmr.msra.gmra.mxu1 %v4782_v1  ;;  %v331_v35 = vrot.slane %v329_v17, 4  ;;  %v334_v37 = vrot.slane %v332_v24, 5  ;;  %v340_v38 = vrot.slane %v338_v25, 5  ;;  %v342_v40 = vshrl.u32 %v4780_v0, 16  ;;  %v4993_v1 = vld [vmem:[%s4662_s23 + $0x58] sm:$0xf] }
  0x2d   : > { %4104 = vmatpush3.bf16.msra.mxu1 %v4520_v42  ;;  %4152 = vmatpush3.bf16.msra.mxu0 %v4521_v43  ;;  %6162 = vst [vmem:[#allocation6_spill] sm:$0xff] %v4811_v30  ;;  %v509_v42 = vsel %vm4696_vm2, %v504_v31, %v508_v9  ;;  %v514_v43 = vrot.slane %v513_v32, 4  ;;  %v348_v45 = vshll.u32 %v4788_v10, 16  ;;  %v521_v46 = vshrl.u32 %v4791_v11, 16 }
  0x2e   : > { %4105 = vmatprep.subr.bf16.mxu1 %v4522_v59  ;;  %4153 = vmatprep.subr.bf16.mxu0 %v4523_v2  ;;  %v335_v47 = vor.u32 %v334_v37, %v331_v35  ;;  %v344_v48 = vrot.slane %v342_v40, 4  ;;  %v524_v49 = vshll.u32 %v4791_v11, 16  ;;  %v530_v50 = vshll.u32 %v4795_v18, 16 }
  0x2f   : > { %4075 = vmatprep.mubr.bf16.mxu0 %v4811_v30  ;;  %v519_v52 = vsel %vm4696_vm2, %v514_v43, %v518_v34  ;;  %v350_v53 = vrot.slane %v348_v45, 5  ;;  %v523_v54 = vrot.slane %v521_v46, 4  ;;  %v534_v55 = vshrl.u32 %v4795_v18, 16  ;;  %v4852_v34 = vld [vmem:[%s4662_s23 + $0x90] sm:$0xf] }
  0x30   : > { %v4830_v56 = vcombine.low %v509_v42, %v519_v52  ;;  %v336_v58 = vrot.slane %v335_v47, 4  ;;  %v345_v60 = vor.u32 %v344_v48, %v340_v38  ;;  %v526_v61 = vrot.slane %v524_v49, 5  ;;  %v4858_v42 = vld [vmem:[%s4662_s23 + $0x94] sm:$0xf]  ;;  %v4867_v47 = vld [vmem:[%s4662_s23 + $0x98] sm:$0x1] }
  0x31   : > { %4106 = vmatpush3.bf16.msra.mxu1 %v4522_v59  ;;  %4154 = vmatpush3.bf16.msra.mxu0 %v4523_v2  ;;  %v4526_v59 = vld [vmem:[%s6117_s1 + $0x20] sm:$0xff]   ;;  %v4839_v2 = vld [vmem:[%s4662_s23 + $0x34] sm:$0xf]  ;;  %v532_v3 = vrot.slane %v530_v50, 5  ;;  %v536_v8 = vrot.slane %v534_v55, 4  ;;  %v540_v9 = vshll.u32 %v4815_v44, 16 }
  0x32   : > { %6163 = vst [vmem:[#allocation7_spill] sm:$0xff] %v4830_v56  ;;  %4107 = vmatprep.subr.bf16.mxu1 %v4524_v26  ;;  %4155 = vmatprep.subr.bf16.mxu0 %v4525_v28  ;;  %v353_v12 = vshrl.u32 %v4825_v51, 16  ;;  %v341_v14 = vsel %vm4696_vm2, %v336_v58, %v340_v38  ;;  %v346_v15 = vrot.slane %v345_v60, 4  ;;  %v527_v17 = vor.u32 %v526_v61, %v523_v54  ;;  %v4529_v48 = vld [vmem:[%s6117_s1 + $0x98] sm:$0xff]   ;;  %v4879_v55 = vld [vmem:[%s4662_s23 + $0x40] sm:$0xf] }
  0x33   : > { %4091 = vmatprep.mubr.bf16.mxu1 %v4830_v56  ;;  %v356_v20 = vshll.u32 %v4825_v51, 16  ;;  %v537_v24 = vor.u32 %v536_v8, %v532_v3  ;;  %v542_v25 = vrot.slane %v540_v9, 5  ;;  %v362_v32 = vshll.u32 %v4839_v2, 16  ;;  %v4876_v54 = vld [vmem:[%s4662_s23 + $0x3c] sm:$0xf]  ;;  %v4530_v58 = vld [vmem:[%s6117_s1 + $0x10] sm:$0xff]  }
  0x34   : > { %v355_v31 = vrot.slane %v353_v12, 4  ;;  %v351_v35 = vsel %vm4696_vm2, %v346_v15, %v350_v53  ;;  %v528_v37 = vrot.slane %v527_v17, 4  ;;  %v366_v40 = vshrl.u32 %v4839_v2, 16  ;;  %v4531_v9 = vld [vmem:[%s6117_s1 + $0x90] sm:$0xff]  }
  0x35   : > { %4108 = vmatpush3.bf16.msra.mxu1 %v4524_v26  ;;  %4156 = vmatpush3.bf16.msra.mxu0 %v4525_v28  ;;  %v358_v38 = vrot.slane %v356_v20, 5  ;;  %v4528_v26 = vld [vmem:[%s6117_s1 + $0x18] sm:$0xff]   ;;  %v4863_v28 = vcombine.low %v341_v14, %v351_v35  ;;  %v538_v43 = vrot.slane %v537_v24, 4  ;;  %v364_v45 = vrot.slane %v362_v32, 5 }
  0x36   : > { %4109 = vmatprep.subr.bf16.mxu1 %v4526_v59  ;;  %4157 = vmatprep.subr.bf16.mxu0 %v4527_v62  ;;  %v372_v46 = vshll.u32 %v4847_v19, 16  ;;  %v533_v49 = vsel %vm4696_vm2, %v528_v37, %v532_v3  ;;  %v368_v52 = vrot.slane %v366_v40, 4  ;;  %v545_v53 = vshrl.u32 %v4852_v34, 16  ;;  %v4900_v32 = vld [vmem:[%s4662_s23 + $0x9c] sm:$0xf] }
  0x37   : > { %6164 = vst [vmem:[#allocation8_spill] sm:$0xff] %v4863_v28  ;;  %v359_v50 = vor.u32 %v358_v38, %v355_v31  ;;  %4076 = vmatmul.mubr.bf16.gmra.mxu0 %v4863_v28  ;;  %v543_v60 = vsel %vm4696_vm2, %v538_v43, %v542_v25  ;;  %v548_v3 = vshll.u32 %v4852_v34, 16  ;;  %v554_v8 = vshll.u32 %v4858_v42, 16  ;;  %v4897_v31 = vld [vmem:[%s4662_s23 + $0x44] sm:$0x1] }
  0x38   : > { %v374_v61 = vrot.slane %v372_v46, 5  ;;  %v4892_v12 = vcombine.low %v533_v49, %v543_v60  ;;  %v369_v15 = vor.u32 %v368_v52, %v364_v45  ;;  %v547_v17 = vrot.slane %v545_v53, 4  ;;  %v4908_v40 = vld [vmem:[%s4662_s23 + $0xa0] sm:$0xf] }
  0x39   : > { %4110 = vmatpush3.bf16.msra.mxu1 %v4526_v59  ;;  %4158 = vmatpush3.bf16.msra.mxu0 %v4527_v62  ;;  %v360_v14 = vrot.slane %v359_v50, 4  ;;  %v550_v20 = vrot.slane %v548_v3, 5  ;;  %v556_v59 = vrot.slane %v554_v8, 5  ;;  %v558_v24 = vshrl.u32 %v4858_v42, 16  ;;  %v4532_v3 = vld [vmem:[%s6117_s1 + $0x8] sm:$0xff]  }
  0x3a   : > { %6165 = vst [vmem:[#allocation9_spill] sm:$0xff] %v4892_v12  ;;  %4111 = vmatprep.subr.bf16.mxu1 %v4528_v26  ;;  %v564_v25 = vshll.u32 %v4867_v47, 16  ;;  %4159 = vmatprep.subr.bf16.mxu0 %v4529_v48  ;;  %v370_v35 = vrot.slane %v369_v15, 4  ;;  %v377_v37 = vshrl.u32 %v4876_v54, 16  ;;  %v380_v38 = vshll.u32 %v4876_v54, 16 }
  0x3b   : > { %4092 = vmatmul.mubr.bf16.gmra.mxu1 %v4892_v12  ;;  %v365_v62 = vsel %vm4696_vm2, %v360_v14, %v364_v45  ;;  %v551_v43 = vor.u32 %v550_v20, %v547_v17  ;;  %v560_v46 = vrot.slane %v558_v24, 4  ;;  %v386_v50 = vshll.u32 %v4879_v55, 16 }
  0x3c   : > { %v566_v49 = vrot.slane %v564_v25, 5  ;;  %v375_v52 = vsel %vm4696_vm2, %v370_v35, %v374_v61  ;;  %v379_v53 = vrot.slane %v377_v37, 4  ;;  %v382_v60 = vrot.slane %v380_v38, 5  ;;  %v4928_v35 = vld [vmem:[%s4662_s23 + $0xa4] sm:$0x1] }
  0x3d   : > { %4112 = vmatpush3.bf16.msra.mxu1 %v4528_v26  ;;  %v390_v45 = vshrl.u32 %v4879_v55, 16  ;;  %4160 = vmatpush3.bf16.msra.mxu0 %v4529_v48  ;;  %v4917_v8 = vcombine.low %v365_v62, %v375_v52  ;;  %v552_v14 = vrot.slane %v551_v43, 4  ;;  %v561_v15 = vor.u32 %v560_v46, %v556_v59  ;;  %v4533_v26 = vld [vmem:[%s6117_s1 + $0x88] sm:$0xff]  }
  0x3e   : > { %4113 = vmatprep.subr.bf16.mxu1 %v4530_v58  ;;  %v388_v17 = vrot.slane %v386_v50, 5  ;;  %4161 = vmatprep.subr.bf16.mxu0 %v4531_v9  ;;  %v383_v61 = vor.u32 %v382_v60, %v379_v53  ;;  %v396_v48 = vshll.u32 %v4897_v31, 16  ;;  %v569_v24 = vshrl.u32 %v4900_v32, 16  ;;  %v4933_v53 = vld [vmem:[%s4662_s23 + $0x48] sm:$0xf] }
  0x3f   : > { %6166 = vst [vmem:[#allocation10_spill] sm:$0xff] %v4917_v8  ;;  %v392_v20 = vrot.slane %v390_v45, 4  ;;  %4079 = vmatprep.mubr.bf16.mxu0 %v4917_v8  ;;  %v557_v25 = vsel %vm4696_vm2, %v552_v14, %v556_v59  ;;  %v562_v62 = vrot.slane %v561_v15, 4  ;;  %v572_v37 = vshll.u32 %v4900_v32, 16  ;;  %v4534_v59 = vld [vmem:[%s6117_s1] sm:$0xff]  }
  0x40   : > { %v578_v38 = vshll.u32 %v4908_v40, 16  ;;  %v384_v43 = vrot.slane %v383_v61, 4  ;;  %v398_v50 = vrot.slane %v396_v48, 5  ;;  %v571_v52 = vrot.slane %v569_v24, 4  ;;  %v4942_v15 = vld [vmem:[%s4662_s23 + $0x4c] sm:$0xf] }
  0x41   : > { %4114 = vmatpush3.bf16.msra.mxu1 %v4530_v58  ;;  %v393_v46 = vor.u32 %v392_v20, %v388_v17  ;;  %4162 = vmatpush3.bf16.msra.mxu0 %v4531_v9  ;;  %v567_v60 = vsel %vm4696_vm2, %v562_v62, %v566_v49  ;;  %v574_v45 = vrot.slane %v572_v37, 5  ;;  %v582_v58 = vshrl.u32 %v4908_v40, 16  ;;  %v4535_v9 = vld [vmem:[%s6117_s1 + $0x80] sm:$0xff]   ;;  %v4953_v37 = vld [vmem:[%s4662_s23 + $0x50] sm:$0x1] }
  0x42   : > { %4115 = vmatprep.subr.bf16.mxu1 %v4532_v3  ;;  %v580_v14 = vrot.slane %v578_v38, 5  ;;  %4163 = vmatprep.subr.bf16.mxu0 %v4533_v26  ;;  %v4947_v61 = vcombine.low %v557_v25, %v567_v60  ;;  %v389_v20 = vsel %vm4696_vm2, %v384_v43, %v388_v17  ;;  %v588_v49 = vshll.u32 %v4928_v35, 16 }
  0x43   : > { %v394_v48 = vrot.slane %v393_v46, 4  ;;  %v575_v24 = vor.u32 %v574_v45, %v571_v52  ;;  %v584_v62 = vrot.slane %v582_v58, 4  ;;  %v401_v38 = vshrl.u32 %v4933_v53, 16  ;;  %v4963_v46 = vld [vmem:[%s4662_s23 + $0xa8] sm:$0xf]  ;;  %v4968_v52 = vld [vmem:[%s6117_s1 + $0xf8] sm:$0xff]  }
  0x44   : > { %6167 = vst [vmem:[#allocation11_spill] sm:$0xff] %v4947_v61  ;;  %v404_v63 = vshll.u32 %v4933_v53, 16  ;;  %4095 = vmatprep.mubr.bf16.mxu1 %v4947_v61  ;;  %v590_v60 = vrot.slane %v588_v49, 5  ;;  %v410_v17 = vshll.u32 %v4942_v15, 16  ;;  %v414_v43 = vshrl.u32 %v4942_v15, 16  ;;  %6168 = vst [vmem:[#allocation12_spill] sm:$0xff] %v4963_v46 }
  0x45   : > { %4116 = vmatpush3.bf16.msra.mxu1 %v4532_v3  ;;  %v399_v25 = vsel %vm4696_vm2, %v394_v48, %v398_v50  ;;  %4164 = vmatpush3.bf16.msra.mxu0 %v4533_v26  ;;  %v576_v45 = vrot.slane %v575_v24, 4  ;;  %v585_v58 = vor.u32 %v584_v62, %v580_v14  ;;  %v403_v50 = vrot.slane %v401_v38, 4  ;;  %v4973_v48 = vld [vmem:[%s4662_s23 + $0xac] sm:$0xf]  ;;  %v4978_v49 = vld [vmem:[%s6117_s1 + $0x138] sm:$0xff]  }
  0x46   : > { %v4970_v3 = vcombine.low %v389_v20, %v399_v25  ;;  %6170 = vst [vmem:[#allocation14_spill] sm:$0xff] %v4973_v48  ;;  %4117 = vmatprep.subr.bf16.mxu1 %v4534_v59  ;;  %4165 = vmatprep.subr.bf16.mxu0 %v4535_v9  ;;  %v406_v26 = vrot.slane %v404_v63, 5  ;;  %v412_v13 = vrot.slane %v410_v17, 5  ;;  %v416_v61 = vrot.slane %v414_v43, 4  ;;  %v4982_v20 = vld [vmem:[%s4662_s23 + $0xb0] sm:$0x1] }
  0x47   : > { %v420_v12 = vshll.u32 %v4953_v37, 16  ;;  %6171 = vst [vmem:[#allocation15_spill] sm:$0xff] %v4982_v20  ;;  %v4985_v24 = vld [vmem:[%s4662_s23 + $0x54] sm:$0xf]  ;;  %v581_v62 = vsel %vm4696_vm2, %v576_v45, %v580_v14  ;;  %v586_v38 = vrot.slane %v585_v58, 4  ;;  %v593_v25 = vshrl.u32 %v4963_v46, 16 }
  0x48   : > { %6169 = vst [vmem:[#allocation13_spill] sm:$0xff] %v4970_v3  ;;  %4080 = vmatmul.mubr.bf16.gmra.mxu0 %v4970_v3  ;;  %v596_v56 = vshll.u32 %v4963_v46, 16  ;;  %v407_v63 = vor.u32 %v406_v26, %v403_v50  ;;  %v417_v17 = vor.u32 %v416_v61, %v412_v13  ;;  %v602_v7 = vshll.u32 %v4973_v48, 16  ;;  %v5007_v3 = vld [vmem:[%s4662_s23 + $0xb4] sm:$0xf] }
  0x49   : > { %4118 = vmatpush3.bf16.msra.mxu1 %v4534_v59  ;;  %v422_v43 = vrot.slane %v420_v12, 5  ;;  %4166 = vmatpush3.bf16.msra.mxu0 %v4535_v9  ;;  %v591_v14 = vsel %vm4696_vm2, %v586_v38, %v590_v60  ;;  %v595_v45 = vrot.slane %v593_v25, 4  ;;  %v606_v59 = vshrl.u32 %v4973_v48, 16  ;;  %v5004_v9 = vld [vmem:[%s4662_s23 + $0x5c] sm:$0x1] }
  0x4a   : > { %4199 = vmatprep.subr.bf16.mxu1 %v4968_v52  ;;  %v598_v58 = vrot.slane %v596_v56, 5  ;;  %4247 = vmatprep.subr.bf16.mxu0 %v4978_v49  ;;  %v5001_v61 = vcombine.low %v581_v62, %v591_v14  ;;  %v408_v12 = vrot.slane %v407_v63, 4  ;;  %v418_v50 = vrot.slane %v417_v17, 4  ;;  %v5012_v60 = vld [vmem:[%s4662_s23 + $0xb8] sm:$0xf] }
  0x4b   : > { %v604_v26 = vrot.slane %v602_v7, 5  ;;  %v608_v28 = vrot.slane %v606_v59, 4  ;;  %v612_v30 = vshll.u32 %v4982_v20, 16  ;;  %v425_v56 = vshrl.u32 %v4985_v24, 16  ;;  %v5025_v20 = vld [vmem:[%s4662_s23 + $0xbc] sm:$0x1] }
  0x4c   : > { %6172 = vst [vmem:[#allocation16_spill] sm:$0xff] %v5001_v61  ;;  %v599_v8 = vor.u32 %v598_v58, %v595_v45  ;;  %4096 = vmatmul.mubr.bf16.gmra.mxu1 %v5001_v61  ;;  %v413_v62 = vsel %vm4696_vm2, %v408_v12, %v412_v13  ;;  %v423_v7 = vsel %vm4696_vm2, %v418_v50, %v422_v43  ;;  %v428_v38 = vshll.u32 %v4985_v24, 16 }
  0x4d   : > { %v434_v25 = vshll.u32 %v4993_v1, 16  ;;  %v5021_v63 = vcombine.low %v413_v62, %v423_v7  ;;  %v609_v14 = vor.u32 %v608_v28, %v604_v26  ;;  %v614_v45 = vrot.slane %v612_v30, 5  ;;  %6174 = vst [vmem:[#allocation18_spill] sm:$0xff] %v5025_v20 }
  0x4e   : > { %v600_v17 = vrot.slane %v599_v8, 4  ;;  %v427_v58 = vrot.slane %v425_v56, 4  ;;  %v430_v59 = vrot.slane %v428_v38, 5  ;;  %v438_v61 = vshrl.u32 %v4993_v1, 16 }
  0x4f   : > { %6173 = vst [vmem:[#allocation17_spill] sm:$0xff] %v5021_v63  ;;  %v436_v36 = vrot.slane %v434_v25, 5  ;;  %4083 = vmatprep.mubr.bf16.mxu0 %v5021_v63  ;;  %v610_v43 = vrot.slane %v609_v14, 4  ;;  %v444_v12 = vshll.u32 %v5004_v9, 16  ;;  %v617_v50 = vshrl.u32 %v5007_v3, 16 }
  0x50   : > { %v605_v13 = vsel %vm4696_vm2, %v600_v17, %v604_v26  ;;  %v431_v8 = vor.u32 %v430_v59, %v427_v58  ;;  %v440_v28 = vrot.slane %v438_v61, 4  ;;  %v620_v30 = vshll.u32 %v5007_v3, 16 }
  0x51   : > { %v626_v56 = vshll.u32 %v5012_v60, 16  ;;  %v615_v62 = vsel %vm4696_vm2, %v610_v43, %v614_v45  ;;  %v446_v7 = vrot.slane %v444_v12, 5  ;;  %v619_v38 = vrot.slane %v617_v50, 4 }
  0x52   : > { %v630_v25 = vshrl.u32 %v5012_v60, 16  ;;  %v5037_v63 = vcombine.low %v605_v13, %v615_v62  ;;  %v432_v26 = vrot.slane %v431_v8, 4  ;;  %v441_v17 = vor.u32 %v440_v28, %v436_v36 }
  0x53   : > { %v622_v14 = vrot.slane %v620_v30, 5  ;;  %v628_v46 = vrot.slane %v626_v56, 5  ;;  %v636_v61 = vshll.u32 %v5025_v20, 16  ;;  %v6176_v58 = vmov 0 }
  0x54   : > { %6175 = vst [vmem:[#allocation19_spill] sm:$0xff] %v5037_v63  ;;  %v632_v48 = vrot.slane %v630_v25, 4  ;;  %v6177_v58 = vsel %vm5042_vm5, 4294967295, %v6176_v58  ;;  %v3628_v45 = vrot.slane %v4668_v4, 9  ;;  %4099 = vmatprep.mubr.bf16.mxu1 %v5037_v63  ;;  %v437_v59 = vsel %vm4696_vm2, %v432_v26, %v436_v36 }
  0x55   : > { %6178 = vst [vmem:[#allocation20_spill] sm:$0xff] %v6177_v58  ;;  %v442_v13 = vrot.slane %v441_v17, 4  ;;  %v623_v43 = vor.u32 %v622_v14, %v619_v38  ;;  %v1256_v12 = vrot.slane %v4671_v5, 5  ;;  %v638_v8 = vrot.slane %v636_v61, 5 }
  0x56   : > { %v633_v50 = vor.u32 %v632_v48, %v628_v46  ;;  %v3629_v28 = vrot.slane %v4689_v23, 9  ;;  %v1263_v30 = vrot.slane %v4701_v33, 5  ;;  %v6179_v26 = vrot.slane %v4674_v6, 5 }
  0x57   : > { %v447_v56 = vsel %vm4696_vm2, %v442_v13, %v446_v7  ;;  %v624_v62 = vrot.slane %v623_v43, 4  ;;  %v1257_v25 = vsel %vm5042_vm5, %v3628_v45, %v1256_v12  ;;  %v1258_v63 = vrot.slane %v1256_v12, 4 }
  0x58   : > { %v5057_v20 = vcombine.low %v437_v59, %v447_v56  ;;  %v634_v36 = vrot.slane %v633_v50, 4  ;;  %v1265_v38 = vrot.slane %v1263_v30, 4  ;;  %v5067_v33 = vcombine.low %v4729_v16, %v4737_v21 }
  0x59   : > { %v629_v48 = vsel %vm4696_vm2, %v624_v62, %v628_v46  ;;  %v1260_v23 = vsel %vm5042_vm5, %v1258_v63, %v6179_v26  ;;  %v3630_v7 = vrot.slane %v4729_v16, 9  ;;  %v3604_v14 = vcombine.low %v4668_v4, %v4671_v5 }
  0x5a   : > { %4084 = vmatmul.mubr.bf16.gmra.mxu0 %v5057_v20  ;;  %v639_v17 = vsel %vm4696_vm2, %v634_v36, %v638_v8  ;;  %v3660_v46 = vcombine.low %v1257_v25, %v1260_v23  ;;  %v1270_v6 = vrot.slane %v4737_v21, 5  ;;  %v1264_v63 = vsel %vm5042_vm5, %v3629_v28, %v1263_v30  ;;  %v4542_v36 = vld [vmem:[%s6117_s1 + $0xf0] sm:$0xff]  }
  0x5b   : > { %v5076_v61 = vcombine.low %v629_v48, %v639_v17  ;;  %v6180_v45 = vrot.slane %v4705_v39, 5  ;;  %v1273_v59 = vrot.slane %v4745_v27, 5  ;;  %v1277_v5 = vrot.slane %v4780_v0, 5  ;;  %v6197_v58 = vld [vmem:[#allocation19_spill] sm:$0xff] }
  0x5c   : > { %4167 = vmatprep.mubr.bf16.mxu0 %v3660_v46  ;;  %v1271_v13 = vsel %vm5042_vm5, %v3630_v7, %v1270_v6  ;;  %v1272_v4 = vrot.slane %v1270_v6, 4  ;;  %v3631_v21 = vrot.slane %v4771_v57, 9  ;;  %v1280_v43 = vrot.slane %v4788_v10, 5  ;;  %v4543_v10 = vld [vmem:[%s6117_s1 + $0x130] sm:$0xff]  }
  0x5d   : > { %v1267_v16 = vsel %vm5042_vm5, %v1265_v38, %v6180_v45  ;;  %4100 = vmatmul.mubr.bf16.gmra.mxu1 %v5076_v61  ;;  %v1284_v39 = vrot.slane %v4839_v2, 5  ;;  %v1279_v50 = vrot.slane %v1277_v5, 4  ;;  %v3632_v8 = vrot.slane %v4825_v51, 9 }
  0x5e   : > { %4119 = vmatprep.mubr.bf16.mxu1 %v3604_v14  ;;  %v5092_v12 = vcombine.low %v1264_v63, %v1267_v16  ;;  %v1274_v27 = vsel %vm5042_vm5, %v1272_v4, %v1273_v59  ;;  %v1287_v56 = vrot.slane %v4847_v19, 5  ;;  %v1291_v62 = vrot.slane %v4879_v55, 5  ;;  %v4547_v14 = vld [vmem:[%s6117_s1 + $0x128] sm:$0xff]  }
  0x5f   : > { %v5097_v28 = vcombine.low %v1271_v13, %v1274_v27  ;;  %v1286_v30 = vrot.slane %v1284_v39, 4  ;;  %v1278_v25 = vsel %vm5042_vm5, %v3631_v21, %v1277_v5  ;;  %v3633_v38 = vrot.slane %v4876_v54, 9  ;;  %v4546_v16 = vld [vmem:[%s6117_s1 + $0xe8] sm:$0xff]   ;;  %v5139_v13 = vld [vmem:[%s4662_s23 + $0x64] sm:$0xf] }
  0x60   : > { %v1281_v19 = vsel %vm5042_vm5, %v1279_v50, %v1280_v43  ;;  %v1285_v48 = vsel %vm5042_vm5, %v3632_v8, %v1284_v39  ;;  %v1294_v26 = vrot.slane %v4897_v31, 5  ;;  %v1298_v23 = vrot.slane %v4942_v15, 5 }
  0x61   : > { %v1288_v7 = vsel %vm5042_vm5, %v1286_v30, %v1287_v56  ;;  %v1293_v17 = vrot.slane %v1291_v62, 4  ;;  %v3634_v46 = vrot.slane %v4933_v53, 9  ;;  %v1305_v6 = vrot.slane %v4993_v1, 5  ;;  %v5174_v30 = vld [vmem:[%s4662_s23 + $0x60] sm:$0xf] }
  0x62   : > { %4168 = vmatmul.mubr.bf16.vlgmr.msra.gmra.mxu0 %v5092_v12  ;;  %v1300_v31 = vrot.slane %v1298_v23, 4  ;;  %v1301_v63 = vrot.slane %v4953_v37, 5  ;;  %v5132_v45 = vcombine.low %v1285_v48, %v1288_v7  ;;  %v3635_v59 = vrot.slane %v4985_v24, 9 }
  0x63   : > { %4248 = vmatpush3.bf16.msra.mxu0 %v4978_v49  ;;  %4171 = vmatprep.mubr.bf16.mxu0 %v5097_v28  ;;  %v5130_v49 = vcombine.low %v1278_v25, %v1281_v19  ;;  %v1312_v37 = vrot.slane %v5139_v13, 5  ;;  %v1295_v4 = vsel %vm5042_vm5, %v1293_v17, %v1294_v26  ;;  %v1307_v5 = vrot.slane %v1305_v6, 4 }
  0x64   : > { %4249 = vmatprep.subr.bf16.mxu0 %v4543_v10  ;;  %v1308_v21 = vrot.slane %v5004_v9, 5  ;;  %v5149_v43 = vcombine.low %v4771_v57, %v4780_v0  ;;  %v1299_v39 = vsel %vm5042_vm5, %v3634_v46, %v1298_v23  ;;  %v1302_v27 = vsel %vm5042_vm5, %v1300_v31, %v1301_v63  ;;  %v4550_v0 = vld [vmem:[%s6117_s1 + $0xe0] sm:$0xff]  }
  0x65   : > { %4120 = vmatmul.mubr.bf16.vlgmr.msra.gmra.mxu1 %v4741_v22  ;;  %v5157_v50 = vcombine.low %v4825_v51, %v4839_v2  ;;  %v5161_v8 = vcombine.low %v4876_v54, %v4879_v55  ;;  %v5165_v57 = vcombine.low %v4933_v53, %v4942_v15  ;;  %v4551_v9 = vld [vmem:[%s6117_s1 + $0x120] sm:$0xff]   ;;  %v3636_v51 = vrot.slane %v5174_v30, 9  ;;  %v4604_v53 = vld [vmem:[%s4662_s23 + $0x68] sm:$0x1] }
  0x66   : > { %4200 = vmatpush3.bf16.msra.mxu1 %v4968_v52  ;;  %4123 = vmatprep.mubr.bf16.mxu1 %v5067_v33  ;;  %v1292_v52 = vsel %vm5042_vm5, %v3633_v38, %v1291_v62  ;;  %v5182_v54 = vsel %vm5042_vm5, %v3635_v59, %v1305_v6  ;;  %v1314_v55 = vrot.slane %v1312_v37, 4  ;;  %v1315_v15 = vrot.slane %v4604_v53, 5  ;;  %v4555_v62 = vld [vmem:[%s6117_s1 + $0x118] sm:$0xff]   ;;  %v4558_v53 = vld [vmem:[%s6117_s1 + $0xd0] sm:$0xff]  }
  0x67   : > { %4201 = vmatprep.subr.bf16.mxu1 %v4542_v36  ;;  %4250 = vmatpush3.bf16.msra.mxu0 %v4543_v10  ;;  %v5178_v2 = vcombine.low %v1292_v52, %v1295_v4  ;;  %v5186_v56 = vcombine.low %v1299_v39, %v1302_v27  ;;  %v1309_v10 = vsel %vm5042_vm5, %v1307_v5, %v1308_v21  ;;  %v3639_v19 = vrot.slane %v4791_v11, 9  ;;  %v4554_v6 = vld [vmem:[%s6117_s1 + $0xd8] sm:$0xff]   ;;  %v4559_v4 = vld [vmem:[%s6117_s1 + $0x110] sm:$0xff]   ;;  %v6181_v5 = vld [vmem:[#allocation14_spill] sm:$0xff] }
  0x68   : > { %4251 = vmatprep.subr.bf16.mxu0 %v4547_v14  ;;  %v5195_v25 = vcombine.low %v4791_v11, %v4795_v18  ;;  %v1333_v48 = vrot.slane %v4795_v18, 5  ;;  %v1336_v26 = vrot.slane %v4815_v44, 5  ;;  %v1313_v23 = vsel %vm5042_vm5, %v3636_v51, %v1312_v37  ;;  %v6182_v21 = vld [vmem:[#allocation12_spill] sm:$0xff]  ;;  %v6183_v51 = vld [vmem:[#allocation15_spill] sm:$0xff] }
  0x69   : > { %v1326_v7 = vrot.slane %v4757_v41, 5  ;;  %v5210_v17 = vcombine.low %v4852_v34, %v4858_v42  ;;  %v1316_v11 = vsel %vm5042_vm5, %v1314_v55, %v1315_v15  ;;  %v1340_v46 = vrot.slane %v4858_v42, 5 }
  0x6a   : > { %4172 = vmatmul.mubr.bf16.gmra.mxu0 %v5130_v49  ;;  %4202 = vmatpush3.bf16.msra.mxu1 %v4542_v36  ;;  %v5198_v36 = vld [vmem:[%s4662_s23 + $0x70] sm:$0xf]  ;;  %v1334_v18 = vsel %vm5042_vm5, %v3639_v19, %v1333_v48  ;;  %v1335_v44 = vrot.slane %v1333_v48, 4  ;;  %v1343_v31 = vrot.slane %v4867_v47, 5  ;;  %v3641_v63 = vrot.slane %v4900_v32, 9 }
  0x6b   : > { %4175 = vmatprep.mubr.bf16.mxu0 %v5132_v45  ;;  %4203 = vmatprep.subr.bf16.mxu1 %v4546_v16  ;;  %v1319_v38 = vrot.slane %v5198_v36, 5  ;;  %v1342_v37 = vrot.slane %v1340_v46, 4  ;;  %v1350_v52 = vrot.slane %v4928_v35, 5  ;;  %v5243_v39 = vcombine.low %v6182_v21, %v6181_v5 }
  0x6c   : > { %4252 = vmatpush3.bf16.msra.mxu0 %v4547_v14  ;;  %v3640_v14 = vrot.slane %v4852_v34, 9  ;;  %v5225_v34 = vcombine.low %v4900_v32, %v4908_v40  ;;  %v1337_v59 = vsel %vm5042_vm5, %v1335_v44, %v1336_v26  ;;  %v3642_v27 = vrot.slane %v6182_v21, 9 }
  0x6d   : > { %4124 = vmatmul.mubr.bf16.gmra.mxu1 %v5149_v43  ;;  %4253 = vmatprep.subr.bf16.mxu0 %v4551_v9  ;;  %v5234_v47 = vcombine.low %v1334_v18, %v1337_v59  ;;  %v1344_v35 = vsel %vm5042_vm5, %v1342_v37, %v1343_v31  ;;  %v1357_v55 = vrot.slane %v6183_v51, 5  ;;  %v5261_v19 = vcombine.low %v5007_v3, %v5012_v60  ;;  %v4606_v31 = vld [vmem:[%s4662_s23 + $0x6c] sm:$0xf]  ;;  %v4607_v59 = vld [vmem:[%s4662_s23 + $0x74] sm:$0x1]  ;;  %v4567_v51 = vld [vmem:[%s6117_s1 + $0x100] sm:$0xff]  }
  0x6e   : > { %4127 = vmatprep.mubr.bf16.mxu1 %v5157_v50  ;;  %4204 = vmatpush3.bf16.msra.mxu1 %v4546_v16  ;;  %v1347_v16 = vrot.slane %v4908_v40, 5  ;;  %v1341_v42 = vsel %vm5042_vm5, %v3640_v14, %v1340_v46  ;;  %v3643_v48 = vrot.slane %v5007_v3, 9  ;;  %v1361_v44 = vrot.slane %v5012_v60, 5  ;;  %v4563_v3 = vld [vmem:[%s6117_s1 + $0x108] sm:$0xff]  }
  0x6f   : > { %4205 = vmatprep.subr.bf16.mxu1 %v4550_v0  ;;  %v5255_v15 = vcombine.low %v1341_v42, %v1344_v35  ;;  %v5271_v46 = vcombine.low %v5182_v54, %v1309_v10  ;;  %v1322_v60 = vrot.slane %v4607_v59, 5  ;;  %v5284_v37 = vcombine.low %v1313_v23, %v1316_v11  ;;  %v4609_v35 = vld [vmem:[%s4662_s23 + $0x80] sm:$0x1] }
  0x70   : > { %4254 = vmatpush3.bf16.msra.mxu0 %v4551_v9  ;;  %v1348_v32 = vsel %vm5042_vm5, %v3641_v63, %v1347_v16  ;;  %v1349_v40 = vrot.slane %v1347_v16, 4  ;;  %v1354_v9 = vrot.slane %v6181_v5, 5  ;;  %v3637_v63 = vrot.slane %v4606_v31, 9  ;;  %v4562_v5 = vld [vmem:[%s6117_s1 + $0xc8] sm:$0xff]  }
  0x71   : > { %4255 = vmatprep.subr.bf16.mxu0 %v4555_v62  ;;  %v1362_v54 = vsel %vm5042_vm5, %v3643_v48, %v1361_v44  ;;  %v1363_v10 = vrot.slane %v1361_v44, 4  ;;  %v1328_v21 = vrot.slane %v1326_v7, 4  ;;  %v5301_v11 = vcombine.low %v4985_v24, %v4993_v1  ;;  %v4610_v48 = vld [vmem:[%s4662_s23 + $0x7c] sm:$0xf]  ;;  %v5364_v44 = vld [vmem:[%s4662_s23 + $0xc0] sm:$0xf] }
  0x72   : > { %4176 = vmatmul.mubr.bf16.gmra.mxu0 %v5178_v2  ;;  %4206 = vmatpush3.bf16.msra.mxu1 %v4550_v0  ;;  %v1351_v0 = vsel %vm5042_vm5, %v1349_v40, %v1350_v52  ;;  %v1355_v14 = vsel %vm5042_vm5, %v3642_v27, %v1354_v9  ;;  %v1356_v18 = vrot.slane %v1354_v9, 4  ;;  %v1321_v52 = vrot.slane %v1319_v38, 4 }
  0x73   : > { %4179 = vmatprep.mubr.bf16.mxu0 %v5186_v56  ;;  %4207 = vmatprep.subr.bf16.mxu1 %v4554_v6  ;;  %v5264_v26 = vcombine.low %v1348_v32, %v1351_v0  ;;  %v4608_v32 = vld [vmem:[%s4662_s23 + $0x78] sm:$0xf]  ;;  %v1329_v27 = vrot.slane %v4609_v35, 5  ;;  %v1320_v1 = vsel %vm5042_vm5, %v3637_v63, %v1319_v38  ;;  %v5342_v0 = vcombine.low %v4606_v31, %v5198_v36  ;;  %v5359_v36 = vld [vmem:[%s4662_s23 + $0xc4] sm:$0xf] }
  0x74   : > { %4256 = vmatpush3.bf16.msra.mxu0 %v4555_v62  ;;  %v6184_v62 = vld [vmem:[#allocation18_spill] sm:$0xff]  ;;  %v1358_v42 = vsel %vm5042_vm5, %v1356_v18, %v1357_v55  ;;  %v3638_v40 = vrot.slane %v4608_v32, 9  ;;  %v5311_v55 = vcombine.low %v5174_v30, %v5139_v13  ;;  %v1323_v24 = vsel %vm5042_vm5, %v1321_v52, %v1322_v60  ;;  %v4569_v38 = vld [vmem:[%s6117_s1 + $0x1b8] sm:$0xff]   ;;  %v5367_v31 = vld [vmem:[%s4662_s23 + $0xc8] sm:$0x1] }
  0x75   : > { %4128 = vmatmul.mubr.bf16.gmra.mxu1 %v5161_v8  ;;  %4257 = vmatprep.subr.bf16.mxu0 %v4559_v4  ;;  %v1364_v16 = vrot.slane %v6184_v62, 5  ;;  %v1330_v30 = vsel %vm5042_vm5, %v1328_v21, %v1329_v27  ;;  %v2241_v18 = vrot.slane %v5359_v36, 5  ;;  %v3734_v63 = vrot.slane %v5364_v44, 9  ;;  %v6185_v60 = vld [vmem:[#allocation4_spill] sm:$0xff]  ;;  %v6188_v21 = vld [vmem:[#allocation10_spill] sm:$0xff]  ;;  %v6189_v35 = vld [vmem:[#allocation13_spill] sm:$0xff] }
  0x76   : > { %4131 = vmatprep.mubr.bf16.mxu1 %v5165_v57  ;;  %4208 = vmatpush3.bf16.msra.mxu1 %v4554_v6  ;;  %v5292_v6 = vcombine.low %v1355_v14, %v1358_v42  ;;  %v1327_v13 = vsel %vm5042_vm5, %v3638_v40, %v1326_v7  ;;  %v4568_v7 = vld [vmem:[%s6117_s1 + $0x178] sm:$0xff]   ;;  %v5346_v14 = vcombine.low %v4608_v32, %v4610_v48  ;;  %v2244_v62 = vrot.slane %v5367_v31, 5  ;;  %v6187_v52 = vld [vmem:[#allocation8_spill] sm:$0xff]  ;;  %v4573_v40 = vld [vmem:[%s6117_s1 + $0x1a8] sm:$0xff]  }
  0x77   : > { %4209 = vmatprep.subr.bf16.mxu1 %v4558_v53  ;;  %v1365_v23 = vsel %vm5042_vm5, %v1363_v10, %v1364_v16  ;;  %v5336_v41 = vcombine.low %v1327_v13, %v1330_v30  ;;  %v2242_v16 = vsel %vm5042_vm5, %v3734_v63, %v2241_v18  ;;  %v6186_v10 = vld [vmem:[#allocation6_spill] sm:$0xff]  ;;  %v4570_v32 = vld [vmem:[%s6117_s1 + $0x170] sm:$0xff]   ;;  %v4581_v13 = vld [vmem:[%s6117_s1 + $0x188] sm:$0xff]  }
  0x78   : > { %4258 = vmatpush3.bf16.msra.mxu0 %v4559_v4  ;;  %v5303_v9 = vcombine.low %v1362_v54, %v1365_v23  ;;  %v4566_v4 = vld [vmem:[%s6117_s1 + $0xc0] sm:$0xff]   ;;  %v4571_v54 = vld [vmem:[%s6117_s1 + $0x1b0] sm:$0xff]   ;;  %v4577_v23 = vld [vmem:[%s6117_s1 + $0x198] sm:$0xff]  }
  0x79   : > { %4259 = vmatprep.subr.bf16.mxu0 %v4563_v3  ;;  %v4574_v27 = vld [vmem:[%s6117_s1 + $0x160] sm:$0xff]   ;;  %v4580_v30 = vld [vmem:[%s6117_s1 + $0x148] sm:$0xff]   ;;  %v6192_v48 = vld [vmem:[#allocation5_spill] sm:$0xff] }
  0x7a   : > { %4180 = vmatmul.mubr.bf16.gmra.mxu0 %v5271_v46  ;;  %4210 = vmatpush3.bf16.msra.mxu1 %v4558_v53  ;;  %v5334_v53 = vcombine.low %v1320_v1, %v1323_v24  ;;  %v4579_v1 = vld [vmem:[%s6117_s1 + $0x190] sm:$0xff]   ;;  %v6190_v24 = vld [vmem:[#allocation17_spill] sm:$0xff] }
  0x7b   : > { %4183 = vmatprep.mubr.bf16.mxu0 %v5284_v37  ;;  %4211 = vmatprep.subr.bf16.mxu1 %v4562_v5  ;;  %v4586_v63 = vld [vmem:[%s6117_s1 + $0x238] sm:$0xff]  }
  0x7c   : > { %4260 = vmatpush3.bf16.msra.mxu0 %v4563_v3  ;;  %v2243_v3 = vrot.slane %v2241_v18, 4  ;;  %v4583_v18 = vld [vmem:[%s6117_s1 + $0x140] sm:$0xff]  }
  0x7d   : > { %4132 = vmatmul.mubr.bf16.gmra.mxu1 %v5301_v11  ;;  %4261 = vmatprep.subr.bf16.mxu0 %v4567_v51 }
  0x7e   : > { %4135 = vmatprep.mubr.bf16.mxu1 %v5311_v55  ;;  %4212 = vmatpush3.bf16.msra.mxu1 %v4562_v5  ;;  %v2245_v59 = vsel %vm5042_vm5, %v2243_v3, %v2244_v62  ;;  %v4575_v5 = vld [vmem:[%s6117_s1 + $0x1a0] sm:$0xff]   ;;  %v4585_v3 = vld [vmem:[%s6117_s1 + $0x1f8] sm:$0xff]   ;;  %v6193_v62 = vld [vmem:[#allocation7_spill] sm:$0xff] }
  0x7f   : > { %4213 = vmatprep.subr.bf16.mxu1 %v4566_v4  ;;  %v5377_v42 = vcombine.low %v2242_v16, %v2245_v59  ;;  %v6194_v16 = vld [vmem:[#allocation9_spill] sm:$0xff]  ;;  %v1953_v59 = vshrl.u32 %v5364_v44, 16 }
  0x80   : > { %4262 = vmatpush3.bf16.msra.mxu0 %v4567_v51  ;;  %v4576_v51 = vld [vmem:[%s6117_s1 + $0x158] sm:$0xff]  }
  0x81   : > { %4343 = vmatprep.subr.bf16.mxu0 %v4569_v38 }
  0x82   : > { %4184 = vmatmul.mubr.bf16.gmra.mxu0 %v5334_v53  ;;  %4214 = vmatpush3.bf16.msra.mxu1 %v4566_v4  ;;  %v4578_v4 = vld [vmem:[%s6117_s1 + $0x150] sm:$0xff]  }
  0x83   : > { %4187 = vmatprep.mubr.bf16.mxu0 %v5336_v41  ;;  %4295 = vmatprep.subr.bf16.mxu1 %v4568_v7 }
  0x85   : > { %4136 = vmatmul.mubr.bf16.gmra.mxu1 %v5342_v0 }
  0x86   : > { %4139 = vmatprep.mubr.bf16.mxu1 %v5346_v14 }
  0x8a   : > { %4188 = vmatmul.mubr.bf16.gmra.mxu0 %v5234_v47 }
  0x8b   : > { %4191 = vmatprep.mubr.bf16.mxu0 %v5255_v15 }
  0x8d   : > { %4140 = vmatmul.mubr.bf16.gmra.mxu1 %v5195_v25 }
  0x8e   : > { %4143 = vmatprep.mubr.bf16.mxu1 %v5210_v17 }
  0x92   : > { %4192 = vmatmul.mubr.bf16.gmra.mxu0 %v5264_v26 }
  0x93   : > { %4195 = vmatprep.mubr.bf16.mxu0 %v5292_v6 }
  0x95   : > { %4144 = vmatmul.mubr.bf16.gmra.mxu1 %v5225_v34 }
  0x96   : > { %4147 = vmatprep.mubr.bf16.mxu1 %v5243_v39 }
  0x9a   : > { %4196 = vmatmul.mubr.bf16.gmra.mxu0 %v5303_v9 }
  0x9b   : > { %4263 = vmatprep.mubr.bf16.mxu0 %v6185_v60  ;;  %v1956_v60 = vshll.u32 %v5364_v44, 16 }
  0x9d   : > { %4148 = vmatmul.mubr.bf16.gmra.mxu1 %v5261_v19 }
  0x9e   : > { %4215 = vmatprep.mubr.bf16.mxu1 %v4741_v22  ;;  %v4572_v22 = vld [vmem:[%s6117_s1 + $0x168] sm:$0xff]  }
  0xa2   : > { %4264 = vmatmul.mubr.bf16.vlgmr.msra.gmra.mxu0 %v6186_v10 }
  0xa3   : > { %4344 = vmatpush3.bf16.msra.mxu0 %v4569_v38  ;;  %4267 = vmatprep.mubr.bf16.mxu0 %v6187_v52  ;;  %v4584_v38 = vld [vmem:[%s6117_s1 + $0x180] sm:$0xff]  }
  0xa4   : > { %4345 = vmatprep.subr.bf16.mxu0 %v4571_v54 }
  0xa5   : > { %4216 = vmatmul.mubr.bf16.vlgmr.msra.gmra.mxu1 %v5067_v33 }
  0xa6   : > { %4296 = vmatpush3.bf16.msra.mxu1 %v4568_v7  ;;  %4219 = vmatprep.mubr.bf16.mxu1 %v5149_v43  ;;  %v6191_v7 = vld [vmem:[#allocation3_spill] sm:$0xff] }
  0xa7   : > { %4297 = vmatprep.subr.bf16.mxu1 %v4570_v32  ;;  %4346 = vmatpush3.bf16.msra.mxu0 %v4571_v54  ;;  %v1966_v54 = vshrl.u32 %v5359_v36, 16 }
  0xa8   : > { %4347 = vmatprep.subr.bf16.mxu0 %v4573_v40 }
  0xaa   : > { %4268 = vmatmul.mubr.bf16.gmra.mxu0 %v6188_v21  ;;  %4298 = vmatpush3.bf16.msra.mxu1 %v4570_v32  ;;  %v1962_v32 = vshll.u32 %v5359_v36, 16 }
  0xab   : > { %4271 = vmatprep.mubr.bf16.mxu0 %v6189_v35  ;;  %4299 = vmatprep.subr.bf16.mxu1 %v4572_v22 }
  0xac   : > { %4348 = vmatpush3.bf16.msra.mxu0 %v4573_v40  ;;  %v1955_v40 = vrot.slane %v1953_v59, 4 }
  0xad   : > { %4220 = vmatmul.mubr.bf16.gmra.mxu1 %v5157_v50  ;;  %4349 = vmatprep.subr.bf16.mxu0 %v4575_v5 }
  0xae   : > { %4223 = vmatprep.mubr.bf16.mxu1 %v5161_v8  ;;  %4300 = vmatpush3.bf16.msra.mxu1 %v4572_v22  ;;  %v1958_v22 = vrot.slane %v1956_v60, 5 }
  0xaf   : > { %4301 = vmatprep.subr.bf16.mxu1 %v4574_v27 }
  0xb0   : > { %4350 = vmatpush3.bf16.msra.mxu0 %v4575_v5  ;;  %v1964_v5 = vrot.slane %v1962_v32, 5  ;;  %v4588_v32 = vld [vmem:[%s6117_s1 + $0x230] sm:$0xff]  }
  0xb1   : > { %4351 = vmatprep.subr.bf16.mxu0 %v4577_v23 }
  0xb2   : > { %4272 = vmatmul.mubr.bf16.gmra.mxu0 %v6190_v24  ;;  %4302 = vmatpush3.bf16.msra.mxu1 %v4574_v27  ;;  %v1968_v27 = vrot.slane %v1966_v54, 4  ;;  %v5470_v54 = vcombine.low %v5364_v44, %v5359_v36  ;;  %v4587_v36 = vld [vmem:[%s6117_s1 + $0x1f0] sm:$0xff]  }
  0xb3   : > { %4275 = vmatprep.mubr.bf16.mxu0 %v5057_v20  ;;  %4303 = vmatprep.subr.bf16.mxu1 %v4576_v51 }
  0xb4   : > { %4352 = vmatpush3.bf16.msra.mxu0 %v4577_v23  ;;  %v6195_v23 = vld [vmem:[#allocation11_spill] sm:$0xff] }
  0xb5   : > { %4224 = vmatmul.mubr.bf16.gmra.mxu1 %v5165_v57  ;;  %4353 = vmatprep.subr.bf16.mxu0 %v4579_v1 }
  0xb6   : > { %4227 = vmatprep.mubr.bf16.mxu1 %v5301_v11  ;;  %4304 = vmatpush3.bf16.msra.mxu1 %v4576_v51  ;;  %v6196_v51 = vld [vmem:[#allocation16_spill] sm:$0xff] }
  0xb7   : > { %4305 = vmatprep.subr.bf16.mxu1 %v4578_v4 }
  0xb8   : > { %4354 = vmatpush3.bf16.msra.mxu0 %v4579_v1  ;;  %v1959_v1 = vor.u32 %v1958_v22, %v1955_v40  ;;  %v4596_v22 = vld [vmem:[%s6117_s1 + $0x210] sm:$0xff]  }
  0xb9   : > { %4355 = vmatprep.subr.bf16.mxu0 %v4581_v13 }
  0xba   : > { %4276 = vmatmul.mubr.bf16.gmra.mxu0 %v6191_v7  ;;  %4306 = vmatpush3.bf16.msra.mxu1 %v4578_v4  ;;  %v1969_v4 = vor.u32 %v1968_v27, %v1964_v5  ;;  %v4595_v27 = vld [vmem:[%s6117_s1 + $0x1d0] sm:$0xff]  }
  0xbb   : > { %4279 = vmatprep.mubr.bf16.mxu0 %v6192_v48  ;;  %4307 = vmatprep.subr.bf16.mxu1 %v4580_v30 }
  0xbc   : > { %4356 = vmatpush3.bf16.msra.mxu0 %v4581_v13  ;;  %v1972_v13 = vshll.u32 %v5367_v31, 16 }
  0xbd   : > { %4228 = vmatmul.mubr.bf16.gmra.mxu1 %v5311_v55  ;;  %4357 = vmatprep.subr.bf16.mxu0 %v4584_v38 }
  0xbe   : > { %4231 = vmatprep.mubr.bf16.mxu1 %v5342_v0  ;;  %4308 = vmatpush3.bf16.msra.mxu1 %v4580_v30  ;;  %v1960_v30 = vrot.slane %v1959_v1, 4 }
  0xbf   : > { %4309 = vmatprep.subr.bf16.mxu1 %v4583_v18 }
  0xc0   : > { %4358 = vmatpush3.bf16.msra.mxu0 %v4584_v38  ;;  %v1970_v38 = vrot.slane %v1969_v4, 4  ;;  %v1965_v59 = vsel %vm4696_vm2, %v1960_v30, %v1964_v5  ;;  %v4601_v30 = vld [vmem:[%s6117_s1 + $0x200] sm:$0xff]  }
  0xc1   : > { %4439 = vmatprep.subr.bf16.mxu0 %v4586_v63 }
  0xc2   : > { %4280 = vmatmul.mubr.bf16.gmra.mxu0 %v6193_v62  ;;  %4310 = vmatpush3.bf16.msra.mxu1 %v4583_v18  ;;  %v1974_v18 = vrot.slane %v1972_v13, 5 }
  0xc3   : > { %4283 = vmatprep.mubr.bf16.mxu0 %v6194_v16  ;;  %4391 = vmatprep.subr.bf16.mxu1 %v4585_v3 }
  0xc4   : > { %v1975_v60 = vsel %vm4696_vm2, %v1970_v38, %v1974_v18  ;;  %v4600_v18 = vld [vmem:[%s6117_s1 + $0x1c0] sm:$0xff]  }
  0xc5   : > { %4232 = vmatmul.mubr.bf16.gmra.mxu1 %v5346_v14  ;;  %v5466_v31 = vcombine.low %v1965_v59, %v1975_v60 }
  0xc6   : > { %4235 = vmatprep.mubr.bf16.mxu1 %v5195_v25 }
  0xc7   : > { %6198 = vst [vmem:[#allocation14_spill] sm:$0xff] %v5466_v31 }
  0xca   : > { %4284 = vmatmul.mubr.bf16.gmra.mxu0 %v6195_v23 }
  0xcb   : > { %4287 = vmatprep.mubr.bf16.mxu0 %v6196_v51 }
  0xcd   : > { %4236 = vmatmul.mubr.bf16.gmra.mxu1 %v5210_v17 }
  0xce   : > { %4239 = vmatprep.mubr.bf16.mxu1 %v5225_v34 }
  0xd2   : > { %4288 = vmatmul.mubr.bf16.gmra.mxu0 %v6197_v58 }
  0xd3   : > { %4291 = vmatprep.mubr.bf16.mxu0 %v5076_v61 }
  0xd5   : > { %4240 = vmatmul.mubr.bf16.gmra.mxu1 %v5243_v39 }
  0xd6   : > { %4243 = vmatprep.mubr.bf16.mxu1 %v5261_v19 }
  0xda   : > { %4292 = vmatmul.mubr.bf16.gmra.mxu0 %v5466_v31 }
  0xdb   : > { %4359 = vmatprep.mubr.bf16.mxu0 %v5067_v33  ;;  %v4590_v33 = vld [vmem:[%s6117_s1 + $0x228] sm:$0xff]  }
  0xdd   : > { %4244 = vmatmul.mubr.bf16.gmra.mxu1 %v5470_v54 }
  0xde   : > { %4311 = vmatprep.mubr.bf16.mxu1 %v5092_v12  ;;  %v4589_v12 = vld [vmem:[%s6117_s1 + $0x1e8] sm:$0xff]  }
  0xe2   : > { %4360 = vmatmul.mubr.bf16.vlgmr.msra.gmra.mxu0 %v5149_v43  ;;  %v4592_v43 = vld [vmem:[%s6117_s1 + $0x220] sm:$0xff]  }
  0xe3   : > { %4440 = vmatpush3.bf16.msra.mxu0 %v4586_v63  ;;  %4363 = vmatprep.mubr.bf16.mxu0 %v5157_v50  ;;  %v4591_v50 = vld [vmem:[%s6117_s1 + $0x1e0] sm:$0xff]  }
  0xe4   : > { %4441 = vmatprep.subr.bf16.mxu0 %v4588_v32 }
  0xe5   : > { %4312 = vmatmul.mubr.bf16.vlgmr.msra.gmra.mxu1 %v5097_v28 }
  0xe6   : > { %4392 = vmatpush3.bf16.msra.mxu1 %v4585_v3  ;;  %4315 = vmatprep.mubr.bf16.mxu1 %v5130_v49  ;;  %v4593_v3 = vld [vmem:[%s6117_s1 + $0x1d8] sm:$0xff]  }
  0xe7   : > { %4393 = vmatprep.subr.bf16.mxu1 %v4587_v36  ;;  %4442 = vmatpush3.bf16.msra.mxu0 %v4588_v32 }
  0xe8   : > { %4443 = vmatprep.subr.bf16.mxu0 %v4590_v33 }
  0xea   : > { %4364 = vmatmul.mubr.bf16.gmra.mxu0 %v5161_v8  ;;  %4394 = vmatpush3.bf16.msra.mxu1 %v4587_v36  ;;  %v4594_v8 = vld [vmem:[%s6117_s1 + $0x218] sm:$0xff]  }
  0xeb   : > { %4367 = vmatprep.mubr.bf16.mxu0 %v5165_v57  ;;  %4395 = vmatprep.subr.bf16.mxu1 %v4589_v12 }
  0xec   : > { %v5500_v44 = vpop.f32.mrf.mxu0  ;;  %4444 = vmatpush3.bf16.msra.mxu0 %v4590_v33  ;;  %v5503_v63 = vpop.f32.mrf.mxu1 }
  0xed   : > { %4316 = vmatmul.mubr.bf16.gmra.mxu1 %v5132_v45  ;;  %4445 = vmatprep.subr.bf16.mxu0 %v4592_v43 }
  0xee   : > { %4319 = vmatprep.mubr.bf16.mxu1 %v5178_v2  ;;  %4396 = vmatpush3.bf16.msra.mxu1 %v4589_v12  ;;  %v5509_v57 = vpop.f32.mrf.mxu0  ;;  %v5514_v40 = vpop.f32.mrf.mxu1 }
  0xef   : > { %4397 = vmatprep.subr.bf16.mxu1 %v4591_v50 }
  0xf0   : > { %4446 = vmatpush3.bf16.msra.mxu0 %v4592_v43  ;;  %v5520_v5 = vpop.f32.mrf.mxu0  ;;  %v5527_v1 = vpop.f32.mrf.mxu1 }
  0xf1   : > { %4447 = vmatprep.subr.bf16.mxu0 %v4594_v8 }
  0xf2   : > { %4368 = vmatmul.mubr.bf16.gmra.mxu0 %v5301_v11  ;;  %4398 = vmatpush3.bf16.msra.mxu1 %v4591_v50  ;;  %v4598_v11 = vld [vmem:[%s6117_s1 + $0x208] sm:$0xff]   ;;  %v5533_v4 = vpop.f32.mrf.mxu0  ;;  %v5538_v13 = vpop.f32.mrf.mxu1 }
  0xf3   : > { %4371 = vmatprep.mubr.bf16.mxu0 %v5311_v55  ;;  %4399 = vmatprep.subr.bf16.mxu1 %v4593_v3  ;;  %v4597_v55 = vld [vmem:[%s6117_s1 + $0x1c8] sm:$0xff]  }
  0xf4   : > { %4448 = vmatpush3.bf16.msra.mxu0 %v4594_v8  ;;  %v5590_v8 = vld [vmem:[%s4662_s23 + $0xd0] sm:$0xf] }
  0xf5   : > { %4320 = vmatmul.mubr.bf16.gmra.mxu1 %v5186_v56  ;;  %4449 = vmatprep.subr.bf16.mxu0 %v4596_v22 }
  0xf6   : > { %4323 = vmatprep.mubr.bf16.mxu1 %v5271_v46  ;;  %4400 = vmatpush3.bf16.msra.mxu1 %v4593_v3 }
  0xf7   : > { %4401 = vmatprep.subr.bf16.mxu1 %v4595_v27  ;;  %v5544_v38 = vpop.f32.mrf.mxu0 }
  0xf8   : > { %4450 = vmatpush3.bf16.msra.mxu0 %v4596_v22 }
  0xf9   : > { %4451 = vmatprep.subr.bf16.mxu0 %v4598_v11  ;;  %v5554_v60 = vpop.f32.mrf.mxu0 }
  0xfa   : > { %4372 = vmatmul.mubr.bf16.gmra.mxu0 %v5342_v0  ;;  %4402 = vmatpush3.bf16.msra.mxu1 %v4595_v27 }
  0xfb   : > { %4375 = vmatprep.mubr.bf16.mxu0 %v5346_v14  ;;  %4403 = vmatprep.subr.bf16.mxu1 %v4597_v55  ;;  %v5551_v59 = vpop.f32.mrf.mxu1  ;;  %v5559_v14 = vpop.f32.mrf.mxu0 }
  0xfc   : > { %4452 = vmatpush3.bf16.msra.mxu0 %v4598_v11 }
  0xfd   : > { %4324 = vmatmul.mubr.bf16.gmra.mxu1 %v5284_v37  ;;  %4453 = vmatprep.subr.bf16.mxu0 %v4601_v30  ;;  %v5556_v0 = vpop.f32.mrf.mxu1  ;;  %v5566_v36 = vpop.f32.mrf.mxu0 }
  0xfe   : > { %4327 = vmatprep.mubr.bf16.mxu1 %v5334_v53  ;;  %4404 = vmatpush3.bf16.msra.mxu1 %v4597_v55 }
  0xff   : > { %4405 = vmatprep.subr.bf16.mxu1 %v4600_v18  ;;  %v5563_v32 = vpop.f32.mrf.mxu1 }
 0x100   : > { %4454 = vmatpush3.bf16.msra.mxu0 %v4601_v30 }
 0x101   : > { %v5568_v33 = vpop.f32.mrf.mxu1 }
 0x102   : > { %4376 = vmatmul.mubr.bf16.gmra.mxu0 %v5195_v25  ;;  %4406 = vmatpush3.bf16.msra.mxu1 %v4600_v18 }
 0x103   : > { %4379 = vmatprep.mubr.bf16.mxu0 %v5210_v17 }
 0x105   : > { %4328 = vmatmul.mubr.bf16.gmra.mxu1 %v5336_v41 }
 0x106   : > { %4331 = vmatprep.mubr.bf16.mxu1 %v5234_v47 }
 0x108   : > { %v5571_v25 = vpop.f32.mrf.mxu0 }
 0x10a   : > { %4380 = vmatmul.mubr.bf16.gmra.mxu0 %v5225_v34  ;;  %v5578_v12 = vpop.f32.mrf.mxu0  ;;  %v5587_v34 = vld [vmem:[%s4662_s23 + $0xcc] sm:$0xf] }
 0x10b   : > { %4383 = vmatprep.mubr.bf16.mxu0 %v5243_v39  ;;  %v3776_v22 = vcombine.low %v5587_v34, %v5590_v8 }
 0x10c   : > { %v5575_v17 = vpop.f32.mrf.mxu1  ;;  %v5583_v50 = vpop.f32.mrf.mxu0 }
 0x10d   : > { %4332 = vmatmul.mubr.bf16.gmra.mxu1 %v5255_v15  ;;  %6199 = vst [vmem:[#allocation12_spill] sm:$0xff] %v5575_v17 }
 0x10e   : > { %4335 = vmatprep.mubr.bf16.mxu1 %v5264_v26  ;;  %v5580_v43 = vpop.f32.mrf.mxu1  ;;  %v5595_v3 = vpop.f32.mrf.mxu0 }
 0x10f   : > { %6200 = vst [vmem:[#allocation15_spill] sm:$0xff] %v5580_v43 }
 0x110   : > { %v5593_v39 = vpop.f32.mrf.mxu1 }
 0x111   : > { %6201 = vst [vmem:[#allocation18_spill] sm:$0xff] %v5593_v39 }
 0x112   : > { %4384 = vmatmul.mubr.bf16.gmra.mxu0 %v5261_v19  ;;  %v5600_v19 = vpop.f32.mrf.mxu1 }
 0x113   : > { %4387 = vmatprep.mubr.bf16.mxu0 %v5470_v54  ;;  %6202 = vst [vmem:[#allocation4_spill] sm:$0xff] %v5600_v19 }
 0x115   : > { %4336 = vmatmul.mubr.bf16.gmra.mxu1 %v5292_v6 }
 0x116   : > { %4339 = vmatprep.mubr.bf16.mxu1 %v5303_v9 }
 0x11a   : > { %v5602_v27 = vpop.f32.mrf.mxu0  ;;  %4388 = vmatmul.mubr.bf16.gmra.mxu0 %v3776_v22 }
 0x11b   : > { %4455 = vmatprep.mubr.bf16.mxu0 %v5097_v28 }
 0x11c   : > { %v5605_v54 = vpop.f32.mrf.mxu0 }
 0x11d   : > { %v5607_v11 = vpop.f32.mrf.mxu1  ;;  %4340 = vmatmul.mubr.bf16.gmra.mxu1 %v5377_v42 }
 0x11e   : > { %6203 = vst [vmem:[#allocation6_spill] sm:$0xff] %v5607_v11  ;;  %v5610_v55 = vpop.f32.mrf.mxu0  ;;  %4407 = vmatprep.mubr.bf16.mxu1 %v6186_v10 }
 0x11f   : > { %v5613_v30 = vpop.f32.mrf.mxu1 }
 0x120   : > { %6204 = vst [vmem:[#allocation8_spill] sm:$0xff] %v5613_v30  ;;  %v5615_v18 = vpop.f32.mrf.mxu0 }
 0x121   : > { %v5617_v19 = vpop.f32.mrf.mxu1 }
 0x122   : > { %6205 = vst [vmem:[#allocation10_spill] sm:$0xff] %v5617_v19  ;;  %v4169_v39 = vpop.f32.mrf.mxu0  ;;  %4456 = vmatmul.mubr.bf16.vlgmr.msra.gmra.mxu0 %v5130_v49 }
 0x123   : > { %v5620_v28 = vpop.f32.mrf.mxu1  ;;  %4459 = vmatprep.mubr.bf16.mxu0 %v5132_v45 }
 0x124   : > { %6206 = vst [vmem:[#allocation13_spill] sm:$0xff] %v5620_v28  ;;  %v1529_v22 = vpop.f32.mrf.mxu0 }
 0x125   : > { %v4121_v11 = vpop.f32.mrf.mxu1  ;;  %4408 = vmatmul.mubr.bf16.vlgmr.msra.gmra.mxu1 %v6187_v52 }
 0x126   : > { %v1117_v43 = vadd.f32 %v4121_v11, %v5500_v44  ;;  %v4170_v10 = vpop.f32.mrf.mxu0  ;;  %4411 = vmatprep.mubr.bf16.mxu1 %v6188_v21 }
 0x127   : > { %v1108_v30 = vpop.f32.mrf.mxu1 }
 0x128   : > { %v5626_v31 = vadd.f32 %v4169_v39, %v1117_v43  ;;  %v1109_v19 = vadd.f32 %v1108_v30, %v5509_v57  ;;  %v1532_v17 = vpop.f32.mrf.mxu0 }
 0x129   : > { %v4122_v49 = vpop.f32.mrf.mxu1 }
 0x12a   : > { %v5629_v29 = vadd.f32 %v1529_v22, %v1109_v19  ;;  %v1120_v45 = vadd.f32 %v4122_v49, %v5520_v5  ;;  %v4173_v28 = vpop.f32.mrf.mxu0  ;;  %4460 = vmatmul.mubr.bf16.gmra.mxu0 %v5178_v2 }
 0x12b   : > { %v1111_v52 = vpop.f32.mrf.mxu1  ;;  %4463 = vmatprep.mubr.bf16.mxu0 %v5186_v56 }
 0x12c   : > { %v5634_v44 = vadd.f32 %v4170_v10, %v1120_v45  ;;  %v1112_v21 = vadd.f32 %v1111_v52, %v5533_v4  ;;  %v1545_v43 = vpop.f32.mrf.mxu0 }
 0x12d   : > { %v4125_v39 = vpop.f32.mrf.mxu1  ;;  %4412 = vmatmul.mubr.bf16.gmra.mxu1 %v6189_v35 }
 0x12e   : > { %v5638_v57 = vadd.f32 %v1532_v17, %v1112_v21  ;;  %v1133_v19 = vadd.f32 %v4125_v39, %v5544_v38  ;;  %v4174_v11 = vpop.f32.mrf.mxu0  ;;  %4415 = vmatprep.mubr.bf16.mxu1 %v6190_v24 }
 0x12f   : > { %v1124_v5 = vpop.f32.mrf.mxu1 }
 0x130   : > { %v5642_v2 = vadd.f32 %v4173_v28, %v1133_v19  ;;  %v1125_v56 = vadd.f32 %v1124_v5, %v5554_v60  ;;  %v1548_v30 = vpop.f32.mrf.mxu0 }
 0x131   : > { %v4126_v22 = vpop.f32.mrf.mxu1 }
 0x132   : > { %v5645_v10 = vadd.f32 %v1545_v43, %v1125_v56  ;;  %v1136_v4 = vadd.f32 %v4126_v22, %v5559_v14  ;;  %v4177_v49 = vpop.f32.mrf.mxu0  ;;  %4464 = vmatmul.mubr.bf16.gmra.mxu0 %v5271_v46 }
 0x133   : > { %v1127_v35 = vpop.f32.mrf.mxu1  ;;  %4467 = vmatprep.mubr.bf16.mxu0 %v5284_v37 }
 0x134   : > { %v5650_v38 = vadd.f32 %v4174_v11, %v1136_v4  ;;  %v1128_v24 = vadd.f32 %v1127_v35, %v5566_v36  ;;  %v1561_v17 = vpop.f32.mrf.mxu0 }
 0x135   : > { %v4129_v28 = vpop.f32.mrf.mxu1  ;;  %4416 = vmatmul.mubr.bf16.gmra.mxu1 %v5057_v20 }
 0x136   : > { %v5654_v60 = vadd.f32 %v1548_v30, %v1128_v24  ;;  %v1149_v45 = vadd.f32 %v4129_v28, %v5571_v25  ;;  %v4178_v52 = vpop.f32.mrf.mxu0  ;;  %4419 = vmatprep.mubr.bf16.mxu1 %v6191_v7 }
 0x137   : > { %v1140_v14 = vpop.f32.mrf.mxu1 }
 0x138   : > { %v5658_v46 = vadd.f32 %v4177_v49, %v1149_v45  ;;  %v1141_v37 = vadd.f32 %v1140_v14, %v5578_v12  ;;  %v1564_v21 = vpop.f32.mrf.mxu0  ;;  %v2786_v45 = vshrl.u32 %v5590_v8, 16 }
 0x139   : > { %v4130_v43 = vpop.f32.mrf.mxu1 }
 0x13a   : > { %v5661_v39 = vadd.f32 %v1561_v17, %v1141_v37  ;;  %v1152_v36 = vadd.f32 %v4130_v43, %v5583_v50  ;;  %v4181_v19 = vpop.f32.mrf.mxu0  ;;  %4468 = vmatmul.mubr.bf16.gmra.mxu0 %v5334_v53  ;;  %v2773_v17 = vshrl.u32 %v5587_v34, 16 }
 0x13b   : > { %v1143_v20 = vpop.f32.mrf.mxu1  ;;  %4471 = vmatprep.mubr.bf16.mxu0 %v5336_v41 }
 0x13c   : > { %v5666_v25 = vadd.f32 %v4178_v52, %v1152_v36  ;;  %v1144_v7 = vadd.f32 %v1143_v20, %v5595_v3  ;;  %v1577_v11 = vpop.f32.mrf.mxu0  ;;  %v2775_v43 = vrot.slane %v2773_v17, 4  ;;  %v2788_v20 = vrot.slane %v2786_v45, 4 }
 0x13d   : > { %v4133_v5 = vpop.f32.mrf.mxu1  ;;  %4420 = vmatmul.mubr.bf16.gmra.mxu1 %v6192_v48 }
 0x13e   : > { %v5670_v12 = vadd.f32 %v1564_v21, %v1144_v7  ;;  %v1165_v56 = vadd.f32 %v4133_v5, %v5602_v27  ;;  %v4182_v30 = vpop.f32.mrf.mxu0  ;;  %4423 = vmatprep.mubr.bf16.mxu1 %v6193_v62 }
 0x13f   : > { %v1156_v50 = vpop.f32.mrf.mxu1 }
 0x140   : > { %v5674_v53 = vadd.f32 %v4181_v19, %v1165_v56  ;;  %v1157_v41 = vadd.f32 %v1156_v50, %v5605_v54  ;;  %v1580_v22 = vpop.f32.mrf.mxu0  ;;  %v2776_v54 = vshll.u32 %v5587_v34, 16  ;;  %v236_v56 = vld [vmem:[%s4662_s23 + $0xd4] sm:$0x1]  ;;  %s3838_s23 = sshll.u32 %s6303_s13, 8 }
 0x141   : > { %v4134_v4 = vpop.f32.mrf.mxu1  ;;  %s5989_s19 = scalar_lea.vmem %s6118_s2, %s3838_s23 }
 0x142   : > { %v5677_v49 = vadd.f32 %v1577_v11, %v1157_v41  ;;  %v1168_v3 = vadd.f32 %v4134_v4, %v5610_v55  ;;  %v4185_v35 = vpop.f32.mrf.mxu0  ;;  %4472 = vmatmul.mubr.bf16.gmra.mxu0 %v5234_v47  ;;  %v2782_v55 = vshll.u32 %v5590_v8, 16 }
 0x143   : > { %v1159_v48 = vpop.f32.mrf.mxu1  ;;  %4475 = vmatprep.mubr.bf16.mxu0 %v5255_v15 }
 0x144   : > { %v5682_v27 = vadd.f32 %v4182_v30, %v1168_v3  ;;  %v1160_v62 = vadd.f32 %v1159_v48, %v5615_v18  ;;  %v1593_v24 = vpop.f32.mrf.mxu0  ;;  %v2784_v19 = vrot.slane %v2782_v55, 5  ;;  %v2792_v3 = vshll.u32 %v236_v56, 16 }
 0x145   : > { %v4137_v28 = vpop.f32.mrf.mxu1  ;;  %4424 = vmatmul.mubr.bf16.gmra.mxu1 %v6194_v16  ;;  %v2778_v16 = vrot.slane %v2776_v54, 5 }
 0x146   : > { %v5690_v47 = vadd.f32 %v1580_v22, %v1160_v62  ;;  %v1181_v15 = vadd.f32 %v4137_v28, %v5503_v63  ;;  %v4186_v52 = vpop.f32.mrf.mxu0  ;;  %4427 = vmatprep.mubr.bf16.mxu1 %v6195_v23  ;;  %v3061_v23 = vrot.slane %v5590_v8, 5  ;;  %v2789_v8 = vor.u32 %v2788_v20, %v2784_v19 }
 0x147   : > { %v1172_v18 = vpop.f32.mrf.mxu1  ;;  %v2779_v22 = vor.u32 %v2778_v16, %v2775_v43  ;;  %v3064_v62 = vrot.slane %v236_v56, 5  ;;  %v2794_v45 = vrot.slane %v2792_v3, 5  ;;  %v6211_v56 = vld [vmem:[#allocation15_spill] sm:$0xff] }
 0x148   : > { %v5694_v14 = vadd.f32 %v4185_v35, %v1181_v15  ;;  %v1173_v37 = vadd.f32 %v1172_v18, %v5514_v40  ;;  %v1596_v21 = vpop.f32.mrf.mxu0  ;;  %v3063_v48 = vrot.slane %v3061_v23, 4 }
 0x149   : > { %v4138_v36 = vpop.f32.mrf.mxu1  ;;  %v2780_v54 = vrot.slane %v2779_v22, 4  ;;  %v6212_v22 = vld [vmem:[#allocation18_spill] sm:$0xff] }
 0x14a   : > { %v5697_v7 = vadd.f32 %v1593_v24, %v1173_v37  ;;  %v1184_v11 = vadd.f32 %v4138_v36, %v5527_v1  ;;  %v4189_v63 = vpop.f32.mrf.mxu0  ;;  %4476 = vmatmul.mubr.bf16.gmra.mxu0 %v5264_v26 }
 0x14b   : > { %v1175_v5 = vpop.f32.mrf.mxu1  ;;  %4479 = vmatprep.mubr.bf16.mxu0 %v5292_v6  ;;  %v3810_v6 = vrot.slane %v5587_v34, 9  ;;  %v2785_v43 = vsel %vm4696_vm2, %v2780_v54, %v2784_v19 }
 0x14c   : > { %v5704_v40 = vadd.f32 %v4186_v52, %v1184_v11  ;;  %v1176_v30 = vadd.f32 %v1175_v5, %v5538_v13  ;;  %v1609_v50 = vpop.f32.mrf.mxu0  ;;  %v6210_v11 = vld [vmem:[#allocation14_spill] sm:$0xff] }
 0x14d   : > { %v4141_v41 = vpop.f32.mrf.mxu1  ;;  %4428 = vmatmul.mubr.bf16.gmra.mxu1 %v6196_v51  ;;  %v3062_v52 = vsel %vm5042_vm5, %v3810_v6, %v3061_v23  ;;  %v6213_v6 = vld [vmem:[#allocation4_spill] sm:$0xff] }
 0x14e   : > { %v5708_v4 = vadd.f32 %v1596_v21, %v1176_v30  ;;  %v1197_v1 = vadd.f32 %v4141_v41, %v5551_v59  ;;  %v4190_v26 = vpop.f32.mrf.mxu0  ;;  %4431 = vmatprep.mubr.bf16.mxu1 %v6197_v58  ;;  %v2790_v58 = vrot.slane %v2789_v8, 4 }
 0x14f   : > { %v1188_v35 = vpop.f32.mrf.mxu1 }
 0x150   : > { %v5713_v13 = vadd.f32 %v4189_v63, %v1197_v1  ;;  %v1189_v24 = vadd.f32 %v1188_v35, %v5556_v0  ;;  %v1612_v51 = vpop.f32.mrf.mxu0  ;;  %v3065_v0 = vsel %vm5042_vm5, %v3063_v48, %v3064_v62  ;;  %v2795_v63 = vsel %vm4696_vm2, %v2790_v58, %v2794_v45  ;;  %v6215_v58 = vld [vmem:[#allocation8_spill] sm:$0xff] }
 0x151   : > { %v4142_v17 = vpop.f32.mrf.mxu1  ;;  %v3827_v23 = vcombine.low %v3062_v52, %v3065_v0  ;;  %v3801_v41 = vcombine.low %v2785_v43, %v2795_v63  ;;  %v6216_v0 = vld [vmem:[#allocation10_spill] sm:$0xff]  ;;  %v6217_v43 = vld [vmem:[#allocation13_spill] sm:$0xff] }
 0x152   : > { %v5716_v28 = vadd.f32 %v1609_v50, %v1189_v24  ;;  %v1200_v59 = vadd.f32 %v4142_v17, %v5563_v32  ;;  %v4193_v55 = vpop.f32.mrf.mxu0  ;;  %4480 = vmatmul.mubr.bf16.gmra.mxu0 %v5303_v9 }
 0x153   : > { %v1191_v34 = vpop.f32.mrf.mxu1  ;;  %4483 = vmatprep.mubr.bf16.mxu0 %v5377_v42  ;;  %v6209_v42 = vld [vmem:[#allocation12_spill] sm:$0xff] }
 0x154   : > { %v5725_v18 = vadd.f32 %v4190_v26, %v1200_v59  ;;  %v1192_v37 = vadd.f32 %v1191_v34, %v5568_v33  ;;  %v1625_v21 = vpop.f32.mrf.mxu0 }
 0x155   : > { %v4145_v32 = vpop.f32.mrf.mxu1  ;;  %4432 = vmatmul.mubr.bf16.gmra.mxu1 %v5076_v61 }
 0x156   : > { %v5731_v16 = vadd.f32 %v1612_v51, %v1192_v37  ;;  %v1213_v36 = vadd.f32 %v4145_v32, %v6209_v42  ;;  %v4194_v20 = vpop.f32.mrf.mxu0  ;;  %4435 = vmatprep.mubr.bf16.mxu1 %v6210_v11  ;;  %v6214_v51 = vld [vmem:[#allocation6_spill] sm:$0xff] }
 0x157   : > { %v1204_v5 = vpop.f32.mrf.mxu1 }
 0x158   : > { %v5737_v33 = vadd.f32 %v4193_v55, %v1213_v36  ;;  %v1205_v30 = vadd.f32 %v1204_v5, %v6211_v56  ;;  %v1628_v61 = vpop.f32.mrf.mxu0 }
 0x159   : > { %v4146_v50 = vpop.f32.mrf.mxu1 }
 0x15a   : > { %v5740_v19 = vadd.f32 %v1625_v21, %v1205_v30  ;;  %v1216_v1 = vadd.f32 %v4146_v50, %v6212_v22  ;;  %v4197_v26 = vpop.f32.mrf.mxu0  ;;  %4484 = vmatmul.mubr.bf16.gmra.mxu0 %v3827_v23 }
 0x15b   : > { %v1207_v8 = vpop.f32.mrf.mxu1 }
 0x15c   : > { %v5743_v3 = vadd.f32 %v4194_v20, %v1216_v1  ;;  %v1208_v35 = vadd.f32 %v1207_v8, %v6213_v6  ;;  %v1641_v48 = vpop.f32.mrf.mxu0 }
 0x15d   : > { %v4149_v62 = vpop.f32.mrf.mxu1  ;;  %4436 = vmatmul.mubr.bf16.gmra.mxu1 %v3801_v41 }
 0x15e   : > { %v5746_v24 = vadd.f32 %v1628_v61, %v1208_v35  ;;  %v1229_v17 = vadd.f32 %v4149_v62, %v6214_v51  ;;  %v4198_v54 = vpop.f32.mrf.mxu0 }
 0x15f   : > { %v1220_v59 = vpop.f32.mrf.mxu1 }
 0x160   : > { %v5749_v55 = vadd.f32 %v4197_v26, %v1229_v17  ;;  %v1221_v45 = vadd.f32 %v1220_v59, %v6215_v58  ;;  %v1644_v34 = vpop.f32.mrf.mxu0 }
 0x161   : > { %v4150_v15 = vpop.f32.mrf.mxu1 }
 0x162   : > { %v5752_v52 = vadd.f32 %v1641_v48, %v1221_v45  ;;  %v1232_v37 = vadd.f32 %v4150_v15, %v6216_v0  ;;  %v4265_v21 = vpop.f32.mrf.mxu0 }
 0x163   : > { %v1223_v32 = vpop.f32.mrf.mxu1 }
 0x164   : > { %v5755_v9 = vadd.f32 %v4198_v54, %v1232_v37  ;;  %v1224_v42 = vadd.f32 %v1223_v32, %v6217_v43  ;;  %v2079_v36 = vpop.f32.mrf.mxu0 }
 0x165   : > { %v4217_v20 = vpop.f32.mrf.mxu1 }
 0x166   : > { %v5758_v11 = vadd.f32 %v1644_v34, %v1224_v42  ;;  %v1922_v63 = vadd.f32 %v4217_v20, %v5626_v31  ;;  %v4266_v23 = vpop.f32.mrf.mxu0 }
 0x167   : > { %v1793_v5 = vpop.f32.mrf.mxu1 }
 0x168   : > { %v5761_v56 = vadd.f32 %v4265_v21, %v1922_v63  ;;  %v1920_v30 = vadd.f32 %v1793_v5, %v5629_v29  ;;  %v2082_v61 = vpop.f32.mrf.mxu0 }
 0x169   : > { %v4218_v50 = vpop.f32.mrf.mxu1 }
 0x16a   : > { %v5764_v41 = vadd.f32 %v2079_v36, %v1920_v30  ;;  %v1923_v22 = vadd.f32 %v4218_v50, %v5634_v44  ;;  %v4269_v1 = vpop.f32.mrf.mxu0 }
 0x16b   : > { %v1796_v26 = vpop.f32.mrf.mxu1 }
 0x16c   : > { %v5767_v8 = vadd.f32 %v4266_v23, %v1923_v22  ;;  %v1921_v6 = vadd.f32 %v1796_v26, %v5638_v57  ;;  %v2095_v35 = vpop.f32.mrf.mxu0 }
 0x16d   : > { %v4221_v31 = vpop.f32.mrf.mxu1 }
 0x16e   : > { %v5770_v48 = vadd.f32 %v2082_v61, %v1921_v6  ;;  %v1926_v62 = vadd.f32 %v4221_v31, %v5642_v2  ;;  %v4270_v51 = vpop.f32.mrf.mxu0 }
 0x16f   : > { %v1809_v29 = vpop.f32.mrf.mxu1 }
 0x170   : > { %v5773_v17 = vadd.f32 %v4269_v1, %v1926_v62  ;;  %v1924_v54 = vadd.f32 %v1809_v29, %v5645_v10  ;;  %v2098_v59 = vpop.f32.mrf.mxu0 }
 0x171   : > { %v4222_v44 = vpop.f32.mrf.mxu1 }
 0x172   : > { %v5776_v58 = vadd.f32 %v2095_v35, %v1924_v54  ;;  %v1927_v45 = vadd.f32 %v4222_v44, %v5650_v38  ;;  %v4273_v34 = vpop.f32.mrf.mxu0 }
 0x173   : > { %v1812_v57 = vpop.f32.mrf.mxu1 }
 0x174   : > { %v5779_v15 = vadd.f32 %v4270_v51, %v1927_v45  ;;  %v1925_v0 = vadd.f32 %v1812_v57, %v5654_v60  ;;  %v2111_v37 = vpop.f32.mrf.mxu0 }
 0x175   : > { %v4225_v2 = vpop.f32.mrf.mxu1 }
 0x176   : > { %v5782_v21 = vadd.f32 %v2098_v59, %v1925_v0  ;;  %v1930_v32 = vadd.f32 %v4225_v2, %v5658_v46  ;;  %v4274_v43 = vpop.f32.mrf.mxu0 }
 0x177   : > { %v1825_v10 = vpop.f32.mrf.mxu1 }
 0x178   : > { %v5785_v42 = vadd.f32 %v4273_v34, %v1930_v32  ;;  %v1928_v36 = vadd.f32 %v1825_v10, %v5661_v39  ;;  %v2114_v20 = vpop.f32.mrf.mxu0 }
 0x179   : > { %v4226_v38 = vpop.f32.mrf.mxu1 }
 0x17a   : > { %v5788_v63 = vadd.f32 %v2111_v37, %v1928_v36  ;;  %v1931_v23 = vadd.f32 %v4226_v38, %v5666_v25  ;;  %v4277_v5 = vpop.f32.mrf.mxu0 }
 0x17b   : > { %v1828_v60 = vpop.f32.mrf.mxu1 }
 0x17c   : > { %v5791_v30 = vadd.f32 %v4274_v43, %v1931_v23  ;;  %v1929_v61 = vadd.f32 %v1828_v60, %v5670_v12  ;;  %v2127_v50 = vpop.f32.mrf.mxu0 }
 0x17d   : > { %v4229_v46 = vpop.f32.mrf.mxu1 }
 0x17e   : > { %v5794_v22 = vadd.f32 %v2114_v20, %v1929_v61  ;;  %v1934_v1 = vadd.f32 %v4229_v46, %v5674_v53  ;;  %v4278_v26 = vpop.f32.mrf.mxu0 }
 0x17f   : > { %v1841_v39 = vpop.f32.mrf.mxu1 }
 0x180   : > { %v5797_v6 = vadd.f32 %v4277_v5, %v1934_v1  ;;  %v1932_v35 = vadd.f32 %v1841_v39, %v5677_v49  ;;  %v2130_v31 = vpop.f32.mrf.mxu0 }
 0x181   : > { %v4230_v25 = vpop.f32.mrf.mxu1 }
 0x182   : > { %v5800_v62 = vadd.f32 %v2127_v50, %v1932_v35  ;;  %v1935_v51 = vadd.f32 %v4230_v25, %v5682_v27  ;;  %v4281_v29 = vpop.f32.mrf.mxu0 }
 0x183   : > { %v1844_v12 = vpop.f32.mrf.mxu1 }
 0x184   : > { %v5803_v54 = vadd.f32 %v4278_v26, %v1935_v51  ;;  %v1933_v59 = vadd.f32 %v1844_v12, %v5690_v47  ;;  %v2143_v44 = vpop.f32.mrf.mxu0 }
 0x185   : > { %v4233_v53 = vpop.f32.mrf.mxu1 }
 0x186   : > { %v5806_v45 = vadd.f32 %v2130_v31, %v1933_v59  ;;  %v1938_v34 = vadd.f32 %v4233_v53, %v5694_v14  ;;  %v4282_v57 = vpop.f32.mrf.mxu0 }
 0x187   : > { %v1857_v49 = vpop.f32.mrf.mxu1 }
 0x188   : > { %v5809_v0 = vadd.f32 %v4281_v29, %v1938_v34  ;;  %v1936_v37 = vadd.f32 %v1857_v49, %v5697_v7  ;;  %v2146_v2 = vpop.f32.mrf.mxu0 }
 0x189   : > { %v4234_v27 = vpop.f32.mrf.mxu1 }
 0x18a   : > { %v5812_v32 = vadd.f32 %v2143_v44, %v1936_v37  ;;  %v1939_v43 = vadd.f32 %v4234_v27, %v5704_v40  ;;  %v4285_v10 = vpop.f32.mrf.mxu0 }
 0x18b   : > { %v1860_v47 = vpop.f32.mrf.mxu1 }
 0x18c   : > { %v5815_v36 = vadd.f32 %v4282_v57, %v1939_v43  ;;  %v1937_v20 = vadd.f32 %v1860_v47, %v5708_v4  ;;  %v2159_v38 = vpop.f32.mrf.mxu0 }
 0x18d   : > { %v4237_v14 = vpop.f32.mrf.mxu1 }
 0x18e   : > { %6218 = vst [vmem:[#allocation17_spill] sm:$0xff] %v5815_v36  ;;  %v5818_v23 = vadd.f32 %v2146_v2, %v1937_v20  ;;  %v1942_v5 = vadd.f32 %v4237_v14, %v5713_v13  ;;  %v4286_v60 = vpop.f32.mrf.mxu0 }
 0x18f   : > { %v1873_v7 = vpop.f32.mrf.mxu1 }
 0x190   : > { %6219 = vst [vmem:[#allocation3_spill] sm:$0xff] %v5818_v23  ;;  %v5821_v61 = vadd.f32 %v4285_v10, %v1942_v5  ;;  %v1940_v50 = vadd.f32 %v1873_v7, %v5716_v28  ;;  %v2162_v46 = vpop.f32.mrf.mxu0 }
 0x191   : > { %v4238_v40 = vpop.f32.mrf.mxu1 }
 0x192   : > { %6220 = vst [vmem:[#allocation5_spill] sm:$0xff] %v5821_v61  ;;  %v5824_v1 = vadd.f32 %v2159_v38, %v1940_v50  ;;  %v1943_v26 = vadd.f32 %v4238_v40, %v5725_v18  ;;  %v4289_v39 = vpop.f32.mrf.mxu0 }
 0x193   : > { %v1876_v4 = vpop.f32.mrf.mxu1 }
 0x194   : > { %6221 = vst [vmem:[#allocation7_spill] sm:$0xff] %v5824_v1  ;;  %v5827_v35 = vadd.f32 %v4286_v60, %v1943_v26  ;;  %v1941_v31 = vadd.f32 %v1876_v4, %v5731_v16  ;;  %v2175_v25 = vpop.f32.mrf.mxu0 }
 0x195   : > { %v4241_v13 = vpop.f32.mrf.mxu1 }
 0x196   : > { %6222 = vst [vmem:[#allocation9_spill] sm:$0xff] %v5827_v35  ;;  %v5830_v51 = vadd.f32 %v2162_v46, %v1941_v31  ;;  %v1946_v29 = vadd.f32 %v4241_v13, %v5737_v33  ;;  %v4290_v12 = vpop.f32.mrf.mxu0 }
 0x197   : > { %v1889_v28 = vpop.f32.mrf.mxu1 }
 0x198   : > { %6223 = vst [vmem:[#allocation11_spill] sm:$0xff] %v5830_v51  ;;  %v5833_v59 = vadd.f32 %v4289_v39, %v1946_v29  ;;  %v1944_v44 = vadd.f32 %v1889_v28, %v5740_v19  ;;  %v2178_v53 = vpop.f32.mrf.mxu0 }
 0x199   : > { %v4242_v18 = vpop.f32.mrf.mxu1 }
 0x19a   : > { %6224 = vst [vmem:[#allocation16_spill] sm:$0xff] %v5833_v59  ;;  %v5836_v34 = vadd.f32 %v2175_v25, %v1944_v44  ;;  %v1947_v57 = vadd.f32 %v4242_v18, %v5743_v3  ;;  %v4293_v49 = vpop.f32.mrf.mxu0 }
 0x19b   : > { %v1892_v16 = vpop.f32.mrf.mxu1 }
 0x19c   : > { %6225 = vst [vmem:[#allocation19_spill] sm:$0xff] %v5836_v34  ;;  %v5839_v37 = vadd.f32 %v4290_v12, %v1947_v57  ;;  %v1945_v2 = vadd.f32 %v1892_v16, %v5746_v24  ;;  %v2191_v27 = vpop.f32.mrf.mxu0 }
 0x19d   : > { %v4245_v33 = vpop.f32.mrf.mxu1 }
 0x19e   : > { %6226 = vst [vmem:[#allocation20_spill] sm:$0xff] %v5839_v37  ;;  %v5842_v43 = vadd.f32 %v2178_v53, %v1945_v2  ;;  %v1950_v10 = vadd.f32 %v4245_v33, %v5749_v55  ;;  %v4294_v47 = vpop.f32.mrf.mxu0 }
 0x19f   : > { %v1905_v19 = vpop.f32.mrf.mxu1 }
 0x1a0   : > { %6227 = vst [vmem:[#allocation2_spill] sm:$0xff] %v5842_v43  ;;  %v5845_v20 = vadd.f32 %v4293_v49, %v1950_v10  ;;  %v1948_v38 = vadd.f32 %v1905_v19, %v5752_v52  ;;  %v2194_v14 = vpop.f32.mrf.mxu0 }
 0x1a1   : > { %v4246_v3 = vpop.f32.mrf.mxu1 }
 0x1a2   : > { %6228 = vst [vmem:[#allocation12_spill] sm:$0xff] %v5845_v20  ;;  %v5848_v5 = vadd.f32 %v2191_v27, %v1948_v38  ;;  %v1951_v60 = vadd.f32 %v4246_v3, %v5755_v9  ;;  %v5851_v7 = vpop.f32.mrf.mxu0 }
 0x1a3   : > { %v1908_v24 = vpop.f32.mrf.mxu1 }
 0x1a4   : > { %6229 = vst [vmem:[#allocation14_spill] sm:$0xff] %v5848_v5  ;;  %v5853_v50 = vadd.f32 %v4294_v47, %v1951_v60  ;;  %v1949_v46 = vadd.f32 %v1908_v24, %v5758_v11  ;;  %v5856_v55 = vpop.f32.mrf.mxu0 }
 0x1a5   : > { %v4313_v40 = vpop.f32.mrf.mxu1 }
 0x1a6   : > { %6230 = vst [vmem:[#allocation15_spill] sm:$0xff] %v5853_v50  ;;  %v5858_v26 = vadd.f32 %v2194_v14, %v1949_v46  ;;  %v5860_v39 = vpop.f32.mrf.mxu0 }
 0x1a7   : > { %v2349_v52 = vpop.f32.mrf.mxu1 }
 0x1a8   : > { %6231 = vst [vmem:[#allocation18_spill] sm:$0xff] %v5858_v26  ;;  %v5862_v4 = vpop.f32.mrf.mxu0 }
 0x1a9   : > { %v4314_v31 = vpop.f32.mrf.mxu1 }
 0x1aa   : > { %v5864_v25 = vpop.f32.mrf.mxu0 }
 0x1ab   : > { %v5866_v9 = vpop.f32.mrf.mxu1 }
 0x1ac   : > { %v5868_v13 = vpop.f32.mrf.mxu0 }
 0x1ad   : > { %v5870_v29 = vpop.f32.mrf.mxu1 }
 0x1ae   : > { %v5872_v11 = vpop.f32.mrf.mxu0 }
 0x1af   : > { %v5874_v12 = vpop.f32.mrf.mxu1 }
 0x1b0   : > { %v5876_v28 = vpop.f32.mrf.mxu0 }
 0x1b1   : > { %v5878_v44 = vpop.f32.mrf.mxu1 }
 0x1b2   : > { %v5880_v53 = vpop.f32.mrf.mxu0 }
 0x1b3   : > { %v5882_v18 = vpop.f32.mrf.mxu1 }
 0x1b4   : > { %v5884_v57 = vpop.f32.mrf.mxu0 }
 0x1b5   : > { %v5886_v49 = vpop.f32.mrf.mxu1 }
 0x1b6   : > { %v5888_v16 = vpop.f32.mrf.mxu0 }
 0x1b7   : > { %v5890_v2 = vpop.f32.mrf.mxu1 }
 0x1b8   : > { %v5892_v27 = vpop.f32.mrf.mxu0 }
 0x1b9   : > { %v5894_v33 = vpop.f32.mrf.mxu1 }
 0x1ba   : > { %v5896_v10 = vpop.f32.mrf.mxu0 }
 0x1bb   : > { %v5898_v47 = vpop.f32.mrf.mxu1 }
 0x1bc   : > { %v5900_v19 = vpop.f32.mrf.mxu0 }
 0x1bd   : > { %v5902_v38 = vpop.f32.mrf.mxu1 }
 0x1be   : > { %v5904_v14 = vpop.f32.mrf.mxu0 }
 0x1bf   : > { %v5906_v3 = vpop.f32.mrf.mxu1 }
 0x1c0   : > { %v5908_v60 = vpop.f32.mrf.mxu0 }
 0x1c1   : > { %v5910_v24 = vpop.f32.mrf.mxu1 }
 0x1c2   : > { %v5912_v46 = vpop.f32.mrf.mxu0 }
 0x1c3   : > { %v5914_v26 = vpop.f32.mrf.mxu1 }
 0x1c4   : > { %v5916_v50 = vpop.f32.mrf.mxu0 }
 0x1c5   : > { %6232 = vst [vmem:[#allocation4_spill] sm:$0xff] %v5916_v50  ;;  %v5918_v5 = vpop.f32.mrf.mxu1 }
 0x1c6   : > { %v5920_v20 = vpop.f32.mrf.mxu0 }
 0x1c7   : > { %6233 = vst [vmem:[#allocation6_spill] sm:$0xff] %v5920_v20  ;;  %v5922_v43 = vpop.f32.mrf.mxu1 }
 0x1c8   : > { %v5924_v37 = vpop.f32.mrf.mxu0 }
 0x1c9   : > { %6234 = vst [vmem:[#allocation8_spill] sm:$0xff] %v5924_v37  ;;  %v5926_v34 = vpop.f32.mrf.mxu1 }
 0x1ca   : > { %6235 = vst [vmem:[#allocation10_spill] sm:$0xff] %v5926_v34  ;;  %v5928_v59 = vpop.f32.mrf.mxu0 }
 0x1cb   : > { %6236 = vst [vmem:[#allocation13_spill] sm:$0xff] %v5928_v59  ;;  %v5930_v51 = vpop.f32.mrf.mxu1 }
 0x1cc   : > { %6237 = vst [vmem:[#allocation21_spill] sm:$0xff] %v5930_v51  ;;  %v5932_v35 = vpop.f32.mrf.mxu0 }
 0x1cd   : > { %6238 = vst [vmem:[#allocation22_spill] sm:$0xff] %v5932_v35  ;;  %v5934_v1 = vpop.f32.mrf.mxu1 }
 0x1ce   : > { %6239 = vst [vmem:[#allocation23_spill] sm:$0xff] %v5934_v1  ;;  %v5936_v61 = vpop.f32.mrf.mxu0 }
 0x1cf   : > { %6240 = vst [vmem:[#allocation24_spill] sm:$0xff] %v5936_v61  ;;  %v5938_v23 = vpop.f32.mrf.mxu1 }
 0x1d0   : > { %6241 = vst [vmem:[#allocation25_spill] sm:$0xff] %v5938_v23  ;;  %v5940_v50 = vpop.f32.mrf.mxu0 }
 0x1d1   : > { %6242 = vst [vmem:[#allocation26_spill] sm:$0xff] %v5940_v50  ;;  %v5942_v20 = vpop.f32.mrf.mxu1 }
 0x1d2   : > { %6243 = vst [vmem:[#allocation27_spill] sm:$0xff] %v5942_v20  ;;  %v5944_v36 = vpop.f32.mrf.mxu0 }
 0x1d3   : > { %6244 = vst [vmem:[#allocation28_spill] sm:$0xff] %v5944_v36  ;;  %v5946_v37 = vpop.f32.mrf.mxu1 }
 0x1d4   : > { %6245 = vst [vmem:[#allocation29_spill] sm:$0xff] %v5946_v37  ;;  %v5948_v34 = vpop.f32.mrf.mxu0 }
 0x1d5   : > { %6246 = vst [vmem:[#allocation30_spill] sm:$0xff] %v5948_v34  ;;  %v5950_v59 = vpop.f32.mrf.mxu1 }
 0x1d6   : > { %6247 = vst [vmem:[#allocation31_spill] sm:$0xff] %v5950_v59  ;;  %v5952_v51 = vpop.f32.mrf.mxu0 }
 0x1d7   : > { %6248 = vst [vmem:[#allocation32_spill] sm:$0xff] %v5952_v51  ;;  %v5954_v35 = vpop.f32.mrf.mxu1  ;;  %v2478_v51 = vadd.f32 %v4313_v40, %v5761_v56  ;;  %v2477_v56 = vadd.f32 %v5866_v9, %v5770_v48 }
 0x1d8   : > { %6249 = vst [vmem:[#allocation33_spill] sm:$0xff] %v5954_v35  ;;  %v5956_v1 = vpop.f32.mrf.mxu0 }
 0x1d9   : > { %6250 = vst [vmem:[#allocation34_spill] sm:$0xff] %v5956_v1  ;;  %v5958_v61 = vpop.f32.mrf.mxu1  ;;  %v2741_v48 = vadd.f32 %v5862_v4, %v2477_v56  ;;  %v2481_v4 = vadd.f32 %v5882_v18, %v5782_v21 }
 0x1da   : > { %6251 = vst [vmem:[#allocation35_spill] sm:$0xff] %v5958_v61  ;;  %v5960_v50 = vpop.f32.mrf.mxu0  ;;  %v2476_v61 = vadd.f32 %v2349_v52, %v5764_v41 }
 0x1db   : > { %6252 = vst [vmem:[#allocation36_spill] sm:$0xff] %v5960_v50  ;;  %v5962_v20 = vpop.f32.mrf.mxu1 }
 0x1dc   : > { %6253 = vst [vmem:[#allocation37_spill] sm:$0xff] %v5962_v20  ;;  %v5964_v36 = vpop.f32.mrf.mxu0  ;;  %v2742_v20 = vadd.f32 %v5851_v7, %v2478_v51  ;;  %v2482_v51 = vadd.f32 %v5870_v29, %v5773_v17 }
 0x1dd   : > { %6254 = vst [vmem:[#allocation38_spill] sm:$0xff] %v5964_v36  ;;  %v5966_v37 = vpop.f32.mrf.mxu1  ;;  %v2479_v36 = vadd.f32 %v4314_v31, %v5767_v8 }
 0x1de   : > { %6255 = vst [vmem:[#allocation39_spill] sm:$0xff] %v5966_v37  ;;  %v5968_v34 = vpop.f32.mrf.mxu0 }
 0x1df   : > { %6256 = vst [vmem:[#allocation40_spill] sm:$0xff] %v5968_v34  ;;  %v5970_v59 = vpop.f32.mrf.mxu1  ;;  %v2743_v8 = vadd.f32 %v5860_v39, %v2479_v36  ;;  %v2746_v36 = vadd.f32 %v5864_v25, %v2482_v51  ;;  %v2483_v39 = vadd.f32 %v5878_v44, %v5779_v15  ;;  %v2486_v25 = vadd.f32 %v5886_v49, %v5785_v42 }
 0x1e0   : > { %6257 = vst [vmem:[#allocation41_spill] sm:$0xff] %v5970_v59  ;;  %v5973_v35 = vpop.f32.mrf.mxu0  ;;  %v2740_v59 = vadd.f32 %v5856_v55, %v2476_v61 }
 0x1e1   : > { %6258 = vst [vmem:[#allocation42_spill] sm:$0xff] %v5973_v35  ;;  %v5975_v1 = vpop.f32.mrf.mxu1  ;;  %v2747_v21 = vadd.f32 %v5872_v11, %v2483_v39  ;;  %v2750_v49 = vadd.f32 %v5880_v53, %v2486_v25 }
 0x1e2   : > { %v4457_v23 = vpop.f32.mrf.mxu0 }
 0x1e3   : > { %v5978_v50 = vpop.f32.mrf.mxu1 }
 0x1e4   : > { %6259 = vst [vmem:[#allocation43_spill] sm:$0xff] %v5978_v50  ;;  %v3169_v37 = vpop.f32.mrf.mxu0 }
 0x1e5   : > { %v4409_v34 = vpop.f32.mrf.mxu1 }
 0x1e6   : > { %v3028_v40 = vadd.f32 %v4409_v34, %v2742_v20  ;;  %v4458_v35 = vpop.f32.mrf.mxu0  ;;  %v2480_v34 = vadd.f32 %v5874_v12, %v5776_v58 }
 0x1e7   : > { %v2899_v41 = vpop.f32.mrf.mxu1 }
 0x1e8   : > { %v3298_v7 = vadd.f32 %v4457_v23, %v3028_v40  ;;  %v3026_v61 = vadd.f32 %v2899_v41, %v2740_v59  ;;  %v3172_v55 = vpop.f32.mrf.mxu0  ;;  %v2744_v58 = vadd.f32 %v5868_v13, %v2480_v34  ;;  %v2745_v13 = vadd.f32 %v5876_v28, %v2481_v4 }
 0x1e9   : > { %v4410_v52 = vpop.f32.mrf.mxu1  ;;  %v2487_v34 = vadd.f32 %v5894_v33, %v5791_v30 }
 0x1ea   : > { %3330 = vst [vmem:[%s5989_s19 + $0x10] sm:$0xff] %v3298_v7  ;;  %v3296_v20 = vadd.f32 %v3169_v37, %v3026_v61  ;;  %v3029_v31 = vadd.f32 %v4410_v52, %v2743_v8  ;;  %v4461_v9 = vpop.f32.mrf.mxu0  ;;  %v3399_v51 = vmul.f32 %v3298_v7, %v3298_v7 }
 0x1eb   : > { %v2902_v50 = vpop.f32.mrf.mxu1 }
 0x1ec   : > { %3328 = vst [vmem:[%s5989_s19] sm:$0xff] %v3296_v20  ;;  %v3299_v17 = vadd.f32 %v4458_v35, %v3029_v31  ;;  %v3027_v23 = vadd.f32 %v2902_v50, %v2741_v48  ;;  %v3185_v59 = vpop.f32.mrf.mxu0  ;;  %v3397_v35 = vmul.f32 %v3296_v20, %v3296_v20  ;;  %v2484_v48 = vadd.f32 %v5890_v2, %v5788_v63 }
 0x1ed   : > { %v4413_v29 = vpop.f32.mrf.mxu1 }
 0x1ee   : > { %3331 = vst [vmem:[%s5989_s19 + $0x18] sm:$0xff] %v3299_v17  ;;  %v3297_v37 = vadd.f32 %v3172_v55, %v3027_v23  ;;  %v3032_v12 = vadd.f32 %v4413_v29, %v2746_v36  ;;  %v4462_v56 = vpop.f32.mrf.mxu0  ;;  %v3400_v31 = vmul.f32 %v3299_v17, %v3299_v17  ;;  %v2485_v23 = vadd.f32 %v5898_v47, %v5794_v22 }
 0x1ef   : > { %v2915_v50 = vpop.f32.mrf.mxu1  ;;  %v2748_v29 = vadd.f32 %v5884_v57, %v2484_v48 }
 0x1f0   : > { %3329 = vst [vmem:[%s5989_s19 + $0x8] sm:$0xff] %v3297_v37  ;;  %v3360_v40 = vadd.f32 %v3297_v37, %v3296_v20  ;;  %v3398_v41 = vmul.f32 %v3297_v37, %v3297_v37  ;;  %v3302_v15 = vadd.f32 %v4461_v9, %v3032_v12  ;;  %v3030_v44 = vadd.f32 %v2915_v50, %v2744_v58  ;;  %v3188_v8 = vpop.f32.mrf.mxu0 }
 0x1f1   : > { %v4414_v18 = vpop.f32.mrf.mxu1  ;;  %v2751_v58 = vadd.f32 %v5888_v16, %v2487_v34  ;;  %v2488_v50 = vadd.f32 %v5906_v3, %v5800_v62 }
 0x1f2   : > { %v3361_v61 = vadd.f32 %v3360_v40, %v3298_v7  ;;  %v3429_v55 = vadd.f32 %v3398_v41, %v3397_v35  ;;  %3334 = vst [vmem:[%s5989_s19 + $0x30] sm:$0xff] %v3302_v15  ;;  %v3300_v52 = vadd.f32 %v3185_v59, %v3030_v44  ;;  %v4465_v42 = vpop.f32.mrf.mxu0  ;;  %v3033_v20 = vadd.f32 %v4414_v18, %v2747_v21 }
 0x1f3   : > { %v2918_v11 = vpop.f32.mrf.mxu1  ;;  %v2490_v35 = vadd.f32 %v5902_v38, %v5797_v6  ;;  %v3403_v16 = vmul.f32 %v3302_v15, %v3302_v15 }
 0x1f4   : > { %v3430_v9 = vadd.f32 %v3429_v55, %v3399_v51  ;;  %3332 = vst [vmem:[%s5989_s19 + $0x20] sm:$0xff] %v3300_v52  ;;  %v3362_v28 = vadd.f32 %v3361_v61, %v3299_v17  ;;  %v3031_v7 = vadd.f32 %v2918_v11, %v2745_v13  ;;  %v3201_v36 = vpop.f32.mrf.mxu0  ;;  %v3401_v53 = vmul.f32 %v3300_v52, %v3300_v52 }
 0x1f5   : > { %v3303_v59 = vadd.f32 %v4462_v56, %v3033_v20  ;;  %v4417_v39 = vpop.f32.mrf.mxu1  ;;  %v2749_v56 = vadd.f32 %v5892_v27, %v2485_v23  ;;  %v2491_v13 = vadd.f32 %v5910_v24, %v5803_v54  ;;  %v2754_v55 = vadd.f32 %v5896_v10, %v2490_v35 }
 0x1f6   : > { %v3363_v63 = vadd.f32 %v3362_v28, %v3300_v52  ;;  %v3431_v2 = vadd.f32 %v3430_v9, %v3400_v31  ;;  %v3301_v4 = vadd.f32 %v3188_v8, %v3031_v7  ;;  %v3036_v30 = vadd.f32 %v4417_v39, %v2750_v49  ;;  %v4466_v33 = vpop.f32.mrf.mxu0 }
 0x1f7   : > { %3335 = vst [vmem:[%s5989_s19 + $0x38] sm:$0xff] %v3303_v59  ;;  %v2931_v17 = vpop.f32.mrf.mxu1  ;;  %v3404_v27 = vmul.f32 %v3303_v59, %v3303_v59  ;;  %v2755_v34 = vadd.f32 %v5904_v14, %v2491_v13  ;;  %v2489_v20 = vadd.f32 %v5914_v26, %v5806_v45  ;;  %v2494_v11 = vadd.f32 %v5918_v5, %v5809_v0  ;;  %v6266_v13 = vld [vmem:[#allocation5_spill] sm:$0xff] }
 0x1f8   : > { %v3432_v37 = vadd.f32 %v3431_v2, %v3401_v53  ;;  %3333 = vst [vmem:[%s5989_s19 + $0x28] sm:$0xff] %v3301_v4  ;;  %v3364_v12 = vadd.f32 %v3363_v63, %v3301_v4  ;;  %v3402_v25 = vmul.f32 %v3301_v4, %v3301_v4  ;;  %v3306_v22 = vadd.f32 %v4465_v42, %v3036_v30  ;;  %v3204_v47 = vpop.f32.mrf.mxu0  ;;  %v6260_v4 = vld [vmem:[#allocation17_spill] sm:$0xff]  ;;  %v6261_v30 = vld [vmem:[#allocation10_spill] sm:$0xff] }
 0x1f9   : > { %v3034_v57 = vadd.f32 %v2931_v17, %v2748_v29  ;;  %v4418_v40 = vpop.f32.mrf.mxu1  ;;  %v2492_v23 = vadd.f32 %v5922_v43, %v5812_v32  ;;  %v2753_v63 = vadd.f32 %v5908_v60, %v2489_v20  ;;  %v2758_v2 = vadd.f32 %v5912_v46, %v2494_v11  ;;  %v6271_v20 = vld [vmem:[#allocation9_spill] sm:$0xff]  ;;  %v6272_v11 = vld [vmem:[#allocation27_spill] sm:$0xff] }
 0x1fa   : > { %v3365_v41 = vadd.f32 %v3364_v12, %v3302_v15  ;;  %v3433_v44 = vadd.f32 %v3432_v37, %v3402_v25  ;;  %3338 = vst [vmem:[%s5989_s19 + $0x50] sm:$0xff] %v3306_v22  ;;  %v3037_v8 = vadd.f32 %v4418_v40, %v2751_v58  ;;  %v4469_v21 = vpop.f32.mrf.mxu0  ;;  %v2752_v15 = vadd.f32 %v5900_v19, %v2488_v50  ;;  %v6262_v12 = vld [vmem:[#allocation4_spill] sm:$0xff] }
 0x1fb   : > { %v3304_v18 = vadd.f32 %v3201_v36, %v3034_v57  ;;  %v2934_v51 = vpop.f32.mrf.mxu1  ;;  %v3407_v14 = vmul.f32 %v3306_v22, %v3306_v22  ;;  %v2756_v25 = vadd.f32 %v6262_v12, %v2492_v23 }
 0x1fc   : > { %v3434_v6 = vadd.f32 %v3433_v44, %v3403_v16  ;;  %v3366_v38 = vadd.f32 %v3365_v41, %v3303_v59  ;;  %v3307_v61 = vadd.f32 %v4466_v33, %v3037_v8  ;;  %v3035_v62 = vadd.f32 %v2934_v51, %v2749_v56  ;;  %v3217_v3 = vpop.f32.mrf.mxu0  ;;  %v6265_v41 = vld [vmem:[#allocation6_spill] sm:$0xff] }
 0x1fd   : > { %3336 = vst [vmem:[%s5989_s19 + $0x40] sm:$0xff] %v3304_v18  ;;  %v4421_v52 = vpop.f32.mrf.mxu1  ;;  %v3405_v49 = vmul.f32 %v3304_v18, %v3304_v18  ;;  %v2495_v33 = vadd.f32 %v6261_v30, %v6260_v4  ;;  %v6276_v4 = vld [vmem:[#allocation29_spill] sm:$0xff] }
 0x1fe   : > { %v3367_v42 = vadd.f32 %v3366_v38, %v3304_v18  ;;  %v3435_v48 = vadd.f32 %v3434_v6, %v3404_v27  ;;  %3339 = vst [vmem:[%s5989_s19 + $0x58] sm:$0xff] %v3307_v61  ;;  %v3305_v54 = vadd.f32 %v3204_v47, %v3035_v62  ;;  %v4470_v24 = vpop.f32.mrf.mxu0  ;;  %v3040_v10 = vadd.f32 %v4421_v52, %v2754_v55  ;;  %v6264_v47 = vld [vmem:[#allocation21_spill] sm:$0xff]  ;;  %v6267_v27 = vld [vmem:[#allocation23_spill] sm:$0xff] }
 0x1ff   : > { %v2947_v31 = vpop.f32.mrf.mxu1  ;;  %v3408_v32 = vmul.f32 %v3307_v61, %v3307_v61  ;;  %v2759_v44 = vadd.f32 %v6265_v41, %v2495_v33  ;;  %v2498_v18 = vadd.f32 %v6267_v27, %v6266_v13 }
 0x200   : > { %v3436_v9 = vadd.f32 %v3435_v48, %v3405_v49  ;;  %3337 = vst [vmem:[%s5989_s19 + $0x48] sm:$0xff] %v3305_v54  ;;  %v3368_v19 = vadd.f32 %v3367_v42, %v3305_v54  ;;  %v3406_v28 = vmul.f32 %v3305_v54, %v3305_v54  ;;  %v3038_v7 = vadd.f32 %v2947_v31, %v2752_v15  ;;  %v3220_v36 = vpop.f32.mrf.mxu0  ;;  %v6268_v15 = vld [vmem:[#allocation8_spill] sm:$0xff]  ;;  %v6269_v42 = vld [vmem:[#allocation7_spill] sm:$0xff]  ;;  %v6270_v49 = vld [vmem:[#allocation25_spill] sm:$0xff] }
 0x201   : > { %v3310_v53 = vadd.f32 %v4469_v21, %v3040_v10  ;;  %v4422_v59 = vpop.f32.mrf.mxu1  ;;  %v2496_v48 = vadd.f32 %v6270_v49, %v6269_v42  ;;  %v2499_v10 = vadd.f32 %v6272_v11, %v6271_v20 }
 0x202   : > { %v3369_v45 = vadd.f32 %v3368_v19, %v3306_v22  ;;  %v3437_v26 = vadd.f32 %v3436_v9, %v3406_v28  ;;  %v3308_v39 = vadd.f32 %v3217_v3, %v3038_v7  ;;  %v3041_v0 = vadd.f32 %v4422_v59, %v2755_v34  ;;  %v4473_v5 = vpop.f32.mrf.mxu0  ;;  %v6263_v22 = vld [vmem:[#allocation3_spill] sm:$0xff]  ;;  %v6273_v7 = vld [vmem:[#allocation13_spill] sm:$0xff] }
 0x203   : > { %3342 = vst [vmem:[%s5989_s19 + $0x70] sm:$0xff] %v3310_v53  ;;  %v2950_v29 = vpop.f32.mrf.mxu1  ;;  %v2493_v56 = vadd.f32 %v6264_v47, %v6263_v22  ;;  %v3411_v31 = vmul.f32 %v3310_v53, %v3310_v53  ;;  %v6278_v22 = vld [vmem:[#allocation16_spill] sm:$0xff]  ;;  %v6279_v47 = vld [vmem:[#allocation31_spill] sm:$0xff] }
 0x204   : > { %v3438_v43 = vadd.f32 %v3437_v26, %v3407_v14  ;;  %3340 = vst [vmem:[%s5989_s19 + $0x60] sm:$0xff] %v3308_v39  ;;  %v3370_v58 = vadd.f32 %v3369_v45, %v3307_v61  ;;  %v3311_v17 = vadd.f32 %v4470_v24, %v3041_v0  ;;  %v3233_v37 = vpop.f32.mrf.mxu0  ;;  %v3039_v60 = vadd.f32 %v2950_v29, %v2753_v63 }
 0x205   : > { %v4425_v46 = vpop.f32.mrf.mxu1  ;;  %v3409_v50 = vmul.f32 %v3308_v39, %v3308_v39  ;;  %v2757_v52 = vadd.f32 %v6268_v15, %v2493_v56 }
 0x206   : > { %v3371_v35 = vadd.f32 %v3370_v58, %v3308_v39  ;;  %v3439_v57 = vadd.f32 %v3438_v43, %v3408_v32  ;;  %3343 = vst [vmem:[%s5989_s19 + $0x78] sm:$0xff] %v3311_v17  ;;  %v3044_v40 = vadd.f32 %v4425_v46, %v2758_v2  ;;  %v4474_v16 = vpop.f32.mrf.mxu0  ;;  %v3309_v8 = vadd.f32 %v3220_v36, %v3039_v60  ;;  %v6275_v2 = vld [vmem:[#allocation11_spill] sm:$0xff]  ;;  %v6277_v32 = vld [vmem:[#allocation24_spill] sm:$0xff] }
 0x207   : > { %v2963_v21 = vpop.f32.mrf.mxu1  ;;  %v2762_v36 = vadd.f32 %v6273_v7, %v2498_v18  ;;  %v3412_v45 = vmul.f32 %v3311_v17, %v3311_v17  ;;  %v2497_v30 = vadd.f32 %v6276_v4, %v6275_v2  ;;  %v2763_v43 = vadd.f32 %v6277_v32, %v2499_v10  ;;  %v6286_v10 = vld [vmem:[#allocation30_spill] sm:$0xff] }
 0x208   : > { %v3440_v51 = vadd.f32 %v3439_v57, %v3409_v50  ;;  %v3314_v6 = vadd.f32 %v4473_v5, %v3044_v40  ;;  %v3042_v38 = vadd.f32 %v2963_v21, %v2756_v25  ;;  %v3236_v61 = vpop.f32.mrf.mxu0  ;;  %3341 = vst [vmem:[%s5989_s19 + $0x68] sm:$0xff] %v3309_v8  ;;  %v3372_v62 = vadd.f32 %v3371_v35, %v3309_v8  ;;  %v6274_v5 = vld [vmem:[#allocation22_spill] sm:$0xff] }
 0x209   : > { %v3410_v3 = vmul.f32 %v3309_v8, %v3309_v8  ;;  %v4426_v55 = vpop.f32.mrf.mxu1  ;;  %v2760_v63 = vadd.f32 %v6274_v5, %v2496_v48  ;;  %v6282_v8 = vld [vmem:[#allocation33_spill] sm:$0xff]  ;;  %v6290_v5 = vld [vmem:[#allocation12_spill] sm:$0xff] }
 0x20a   : > { %3346 = vst [vmem:[%s5989_s19 + $0x90] sm:$0xff] %v3314_v6  ;;  %v3312_v54 = vadd.f32 %v3233_v37, %v3042_v38  ;;  %v3045_v24 = vadd.f32 %v4426_v55, %v2759_v44  ;;  %v4477_v34 = vpop.f32.mrf.mxu0  ;;  %v3373_v9 = vadd.f32 %v3372_v62, %v3310_v53  ;;  %v6281_v44 = vld [vmem:[#allocation19_spill] sm:$0xff]  ;;  %v3415_v62 = vmul.f32 %v3314_v6, %v3314_v6 }
 0x20b   : > { %v3441_v19 = vadd.f32 %v3440_v51, %v3410_v3  ;;  %v2966_v28 = vpop.f32.mrf.mxu1  ;;  %v2500_v21 = vadd.f32 %v6282_v8, %v6281_v44  ;;  %v6283_v51 = vld [vmem:[#allocation20_spill] sm:$0xff]  ;;  %v6284_v38 = vld [vmem:[#allocation35_spill] sm:$0xff] }
 0x20c   : > { %3344 = vst [vmem:[%s5989_s19 + $0x80] sm:$0xff] %v3312_v54  ;;  %v3315_v23 = vadd.f32 %v4474_v16, %v3045_v24  ;;  %v3043_v14 = vadd.f32 %v2966_v28, %v2757_v52  ;;  %v3249_v59 = vpop.f32.mrf.mxu0  ;;  %v3374_v39 = vadd.f32 %v3373_v9, %v3311_v17  ;;  %v3413_v37 = vmul.f32 %v3312_v54, %v3312_v54  ;;  %v6280_v16 = vld [vmem:[#allocation26_spill] sm:$0xff]  ;;  %v6285_v52 = vld [vmem:[#allocation28_spill] sm:$0xff] }
 0x20d   : > { %v3442_v26 = vadd.f32 %v3441_v19, %v3411_v31  ;;  %v4429_v0 = vpop.f32.mrf.mxu1  ;;  %v2502_v17 = vadd.f32 %v6279_v47, %v6278_v22  ;;  %v2761_v41 = vadd.f32 %v6280_v16, %v2497_v30  ;;  %v2764_v31 = vadd.f32 %v6286_v10, %v2500_v21  ;;  %v6287_v9 = vld [vmem:[#allocation2_spill] sm:$0xff]  ;;  %v6288_v19 = vld [vmem:[#allocation37_spill] sm:$0xff]  ;;  %v6296_v16 = vld [vmem:[#allocation15_spill] sm:$0xff] }
 0x20e   : > { %3347 = vst [vmem:[%s5989_s19 + $0x98] sm:$0xff] %v3315_v23  ;;  %v3313_v53 = vadd.f32 %v3236_v61, %v3043_v14  ;;  %v3048_v33 = vadd.f32 %v4429_v0, %v2762_v36  ;;  %v4478_v29 = vpop.f32.mrf.mxu0  ;;  %v3375_v58 = vadd.f32 %v3374_v39, %v3312_v54  ;;  %v2503_v61 = vadd.f32 %v6284_v38, %v6283_v51  ;;  %v6289_v14 = vld [vmem:[#allocation32_spill] sm:$0xff]  ;;  %v6297_v38 = vld [vmem:[#allocation38_spill] sm:$0xff] }
 0x20f   : > { %v3443_v12 = vadd.f32 %v3442_v26, %v3412_v45  ;;  %v2979_v25 = vpop.f32.mrf.mxu1  ;;  %v2766_v42 = vadd.f32 %v6285_v52, %v2502_v17  ;;  %v3416_v24 = vmul.f32 %v3315_v23, %v3315_v23  ;;  %v2501_v28 = vadd.f32 %v6288_v19, %v6287_v9  ;;  %v6301_v19 = vld [vmem:[#allocation42_spill] sm:$0xff] }
 0x210   : > { %3345 = vst [vmem:[%s5989_s19 + $0x88] sm:$0xff] %v3313_v53  ;;  %v3414_v56 = vmul.f32 %v3313_v53, %v3313_v53  ;;  %v3318_v60 = vadd.f32 %v4477_v34, %v3048_v33  ;;  %v3046_v46 = vadd.f32 %v2979_v25, %v2760_v63  ;;  %v3252_v35 = vpop.f32.mrf.mxu0  ;;  %v3376_v57 = vadd.f32 %v3375_v58, %v3313_v53  ;;  %v6291_v63 = vld [vmem:[#allocation39_spill] sm:$0xff] }
 0x211   : > { %v3444_v50 = vadd.f32 %v3443_v12, %v3413_v37  ;;  %v4430_v40 = vpop.f32.mrf.mxu1  ;;  %v6293_v37 = vld [vmem:[#allocation14_spill] sm:$0xff]  ;;  %v6294_v12 = vld [vmem:[#allocation41_spill] sm:$0xff] }
 0x212   : > { %3350 = vst [vmem:[%s5989_s19 + $0xb0] sm:$0xff] %v3318_v60  ;;  %v3316_v13 = vadd.f32 %v3249_v59, %v3046_v46  ;;  %v3049_v27 = vadd.f32 %v4430_v40, %v2763_v43  ;;  %v4481_v18 = vpop.f32.mrf.mxu0  ;;  %v3377_v3 = vadd.f32 %v3376_v57, %v3314_v6  ;;  %v2767_v59 = vadd.f32 %v6289_v14, %v2503_v61  ;;  %v6292_v43 = vld [vmem:[#allocation34_spill] sm:$0xff]  ;;  %v6295_v57 = vld [vmem:[#allocation36_spill] sm:$0xff] }
 0x213   : > { %v3445_v55 = vadd.f32 %v3444_v50, %v3414_v56  ;;  %v2982_v15 = vpop.f32.mrf.mxu1  ;;  %v2765_v58 = vadd.f32 %v6292_v43, %v2501_v28  ;;  %v2504_v25 = vadd.f32 %v6294_v12, %v6293_v37  ;;  %v3419_v56 = vmul.f32 %v3318_v60, %v3318_v60 }
 0x214   : > { %3348 = vst [vmem:[%s5989_s19 + $0xa0] sm:$0xff] %v3316_v13  ;;  %v3319_v49 = vadd.f32 %v4478_v29, %v3049_v27  ;;  %v3047_v48 = vadd.f32 %v2982_v15, %v2761_v41  ;;  %v3265_v54 = vpop.f32.mrf.mxu0  ;;  %v3378_v20 = vadd.f32 %v3377_v3, %v3315_v23  ;;  %v3417_v26 = vmul.f32 %v3316_v13, %v3316_v13 }
 0x215   : > { %v3446_v34 = vadd.f32 %v3445_v55, %v3415_v62  ;;  %v4433_v11 = vpop.f32.mrf.mxu1  ;;  %v2506_v23 = vadd.f32 %v6291_v63, %v6290_v5  ;;  %v2507_v41 = vadd.f32 %v5975_v1, %v6296_v16  ;;  %v2768_v61 = vadd.f32 %v6297_v38, %v2504_v25  ;;  %v6298_v62 = vld [vmem:[#allocation18_spill] sm:$0xff] }
 0x216   : > { %3351 = vst [vmem:[%s5989_s19 + $0xb8] sm:$0xff] %v3319_v49  ;;  %v3317_v6 = vadd.f32 %v3252_v35, %v3047_v48  ;;  %v3052_v7 = vadd.f32 %v4433_v11, %v2766_v42  ;;  %v4482_v36 = vpop.f32.mrf.mxu0  ;;  %v3379_v45 = vadd.f32 %v3378_v20, %v3316_v13  ;;  %v3420_v21 = vmul.f32 %v3319_v49, %v3319_v49 }
 0x217   : > { %v3447_v39 = vadd.f32 %v3446_v34, %v3416_v24  ;;  %v2995_v0 = vpop.f32.mrf.mxu1  ;;  %v2770_v40 = vadd.f32 %v6295_v57, %v2506_v23 }
 0x218   : > { %3349 = vst [vmem:[%s5989_s19 + $0xa8] sm:$0xff] %v3317_v6  ;;  %v3418_v2 = vmul.f32 %v3317_v6, %v3317_v6  ;;  %v3322_v4 = vadd.f32 %v4481_v18, %v3052_v7  ;;  %v3050_v30 = vadd.f32 %v2995_v0, %v2764_v31  ;;  %v3268_v53 = vpop.f32.mrf.mxu0  ;;  %v3380_v29 = vadd.f32 %v3379_v45, %v3317_v6 }
 0x219   : > { %v3448_v33 = vadd.f32 %v3447_v39, %v3417_v26  ;;  %v4434_v32 = vpop.f32.mrf.mxu1 }
 0x21a   : > { %3354 = vst [vmem:[%s5989_s19 + $0xd0] sm:$0xff] %v3322_v4  ;;  %v3320_v22 = vadd.f32 %v3265_v54, %v3050_v30  ;;  %v3053_v47 = vadd.f32 %v4434_v32, %v2767_v59  ;;  %v4485_v17 = vpop.f32.mrf.mxu0  ;;  %v3381_v46 = vadd.f32 %v3380_v29, %v3318_v60  ;;  %v6299_v60 = vld [vmem:[#allocation43_spill] sm:$0xff]  ;;  %v6300_v54 = vld [vmem:[#allocation40_spill] sm:$0xff] }
 0x21b   : > { %v3449_v35 = vadd.f32 %v3448_v33, %v3418_v2  ;;  %v2998_v50 = vpop.f32.mrf.mxu1  ;;  %v2505_v3 = vadd.f32 %v6299_v60, %v6298_v62  ;;  %v2771_v24 = vadd.f32 %v6300_v54, %v2507_v41 }
 0x21c   : > { %3352 = vst [vmem:[%s5989_s19 + $0xc0] sm:$0xff] %v3320_v22  ;;  %v3323_v44 = vadd.f32 %v4482_v36, %v3053_v47  ;;  %v3051_v8 = vadd.f32 %v2998_v50, %v2765_v58  ;;  %v3382_v27 = vadd.f32 %v3381_v46, %v3319_v49  ;;  %v3281_v51 = vpop.f32.mrf.mxu0  ;;  %v3421_v1 = vmul.f32 %v3320_v22, %v3320_v22 }
 0x21d   : > { %v3450_v13 = vadd.f32 %v3449_v35, %v3419_v56  ;;  %v4437_v18 = vpop.f32.mrf.mxu1  ;;  %v2769_v28 = vadd.f32 %v6301_v19, %v2505_v3  ;;  %v3423_v36 = vmul.f32 %v3322_v4, %v3322_v4 }
 0x21e   : > { %3355 = vst [vmem:[%s5989_s19 + $0xd8] sm:$0xff] %v3323_v44  ;;  %v3321_v55 = vadd.f32 %v3268_v53, %v3051_v8  ;;  %v3056_v15 = vadd.f32 %v4437_v18, %v2770_v40  ;;  %v3383_v52 = vadd.f32 %v3382_v27, %v3320_v22  ;;  %v4486_v9 = vpop.f32.mrf.mxu0  ;;  %v3424_v0 = vmul.f32 %v3323_v44, %v3323_v44 }
 0x21f   : > { %v3451_v42 = vadd.f32 %v3450_v13, %v3420_v21  ;;  %v3011_v48 = vpop.f32.mrf.mxu1 }
 0x220   : > { %3353 = vst [vmem:[%s5989_s19 + $0xc8] sm:$0xff] %v3321_v55  ;;  %v3422_v49 = vmul.f32 %v3321_v55, %v3321_v55  ;;  %v3326_v34 = vadd.f32 %v4485_v17, %v3056_v15  ;;  %v3054_v20 = vadd.f32 %v3011_v48, %v2768_v61  ;;  %v3384_v10 = vadd.f32 %v3383_v52, %v3321_v55  ;;  %v3284_v23 = vpop.f32.mrf.mxu0 }
 0x221   : > { %v3452_v11 = vadd.f32 %v3451_v42, %v3421_v1  ;;  %v4438_v31 = vpop.f32.mrf.mxu1 }
 0x222   : > { %3358 = vst [vmem:[%s5989_s19 + $0xf0] sm:$0xff] %v3326_v34  ;;  %v3324_v6 = vadd.f32 %v3281_v51, %v3054_v20  ;;  %v3057_v7 = vadd.f32 %v4438_v31, %v2771_v24  ;;  %v3385_v14 = vadd.f32 %v3384_v10, %v3322_v4  ;;  %v3427_v58 = vmul.f32 %v3326_v34, %v3326_v34 }
 0x223   : > { %v3453_v59 = vadd.f32 %v3452_v11, %v3422_v49  ;;  %v3014_v45 = vpop.f32.mrf.mxu1 }
 0x224   : > { %3356 = vst [vmem:[%s5989_s19 + $0xe0] sm:$0xff] %v3324_v6  ;;  %v3327_v26 = vadd.f32 %v4486_v9, %v3057_v7  ;;  %v3055_v39 = vadd.f32 %v3014_v45, %v2769_v28  ;;  %v3386_v63 = vadd.f32 %v3385_v14, %v3323_v44  ;;  %v3425_v53 = vmul.f32 %v3324_v6, %v3324_v6 }
 0x225   : > { %v3454_v5 = vadd.f32 %v3453_v59, %v3423_v36 }
 0x226   : > { %3359 = vst [vmem:[%s5989_s19 + $0xf8] sm:$0xff] %v3327_v26  ;;  %v3325_v2 = vadd.f32 %v3284_v23, %v3055_v39  ;;  %v3387_v30 = vadd.f32 %v3386_v63, %v3324_v6  ;;  %v3428_v12 = vmul.f32 %v3327_v26, %v3327_v26 }
 0x227   : > { %v3455_v33 = vadd.f32 %v3454_v5, %v3424_v0 }
 0x228   : > { %3357 = vst [vmem:[%s5989_s19 + $0xe8] sm:$0xff] %v3325_v2  ;;  %v3426_v29 = vmul.f32 %v3325_v2, %v3325_v2  ;;  %v3388_v43 = vadd.f32 %v3387_v30, %v3325_v2 }
 0x229   : > { %v3456_v32 = vadd.f32 %v3455_v33, %v3425_v53 }
 0x22a   : > { %v3389_v4 = vadd.f32 %v3388_v43, %v3326_v34 }
 0x22b   : > { %v3457_v37 = vadd.f32 %v3456_v32, %v3426_v29 }
 0x22c   : > { %v3390_v25 = vadd.f32 %v3389_v4, %v3327_v26 }
 0x22d   : > { %v3458_v22 = vadd.f32 %v3457_v37, %v3427_v58 }
 0x22e   : > { %v3391_v47 = vrot.slane %v3390_v25, 4 }
 0x22f   : > { %v3459_v17 = vadd.f32 %v3458_v22, %v3428_v12 }
 0x230   : > { %v3392_v56 = vadd.f32 %v3391_v47, %v3390_v25 }
 0x231   : > { %v3460_v46 = vrot.slane %v3459_v17, 4 }
 0x232   : > { %v3393_v35 = vrot.slane %v3392_v56, 2 }
 0x233   : > { %v3461_v50 = vadd.f32 %v3460_v46, %v3459_v17 }
 0x234   : > { %v3394_v57 = vadd.f32 %v3393_v35, %v3392_v56 }
 0x235   : > { %v3462_v40 = vrot.slane %v3461_v50, 2 }
 0x236   : > { %v3395_v16 = vrot.slane %v3394_v57, 1 }
 0x237   : > { %v3463_v41 = vadd.f32 %v3462_v40, %v3461_v50 }
 0x238   : > { %v3396_v8 = vadd.f32 %v3395_v16, %v3394_v57 }
 0x239   : > { %v3464_v44 = vrot.slane %v3463_v41, 1 }
 0x23b   : > { %v3465_v21 = vadd.f32 %v3464_v44, %v3463_v41 }
 0x23d   : > { %v3467_v13 = vsel %vm3466_vm6, %v3396_v8, %v3465_v21 }
 0x23e   : > { %3468 = vst [vmem:[%s181_s24] sm:$0x3] %v3467_v13 }
 0x23f PF: > { %s14_s12 = sadd.s32 1, %s4617_s12  }
 0x240   : > { %p11_p4 = scmp.ge.s32.totalorder %s14_s12, 4  }
 0x242   :  { %13 = sbr.rel (!%p11_p4) target bundleno = 1 (0x1), region = 78 }

</bundles_post_ra>
